<compile_context>
chip_gen: v7x
topology: tpu7x:2x2x1
jax: 0.10.0
libtpu: 0.0.40
codegen_flags: <defaults>
</compile_context>

<pallas_src>
import functools

import jax
import jax.numpy as jnp
from jax import lax
from jax.experimental import pallas as pl
from jax.experimental.pallas import tpu as pltpu


def _gru_decoder_kernel(x_ref, h0_ref, w0_ref, wih_ref, whh_ref, bg_ref, bhn_ref,
                        wlin_ref, blin_ref, y_ref, hn_ref, gi_scr, seq_scr,
                        *, num_layers, seq_len, block_batch, hidden_size, unroll):
    """GRU stack + hoisted output Linear for one batch block.

    x_ref    : (T*Bb, 1)      f32  scalar GRU input, time-major within the block
    h0_ref   : (L, Bb, H)     f32
    w0_ref   : (1, 3H)        f32  layer-0 W_ih as a lane row, gate order (r, z, n)
    wih_ref  : (L-1, H, 3H)   f32  gate-fused, pre-transposed W_ih for layers >= 1
    whh_ref  : (L, H, 3H)     f32  gate-fused, pre-transposed W_hh
    bg_ref   : (L, 3H)        f32  [b_r(=ir+hr), b_z(=iz+hz), b_in] concatenated
    bhn_ref  : (L, H)         f32  b_hn kept separate: n = tanh(gi_n + r*(W_hn h + b_hn))
    wlin_ref : (H, 1)         f32  pre-transposed Linear weight
    blin_ref : (1, 1)         f32  SMEM scalar
    y_ref    : (1, T*Bb, 1)   f32  output block (time-major rows; wrapper re-lays out)
    hn_ref   : (L, Bb, H)     f32
    gi_scr   : (T*Bb, 3H)     f32  VMEM scratch: hoisted input projections (one layer)
    seq_scr  : (T*Bb, H)      f32  VMEM scratch: current layer's output sequence
    """
    L, T, Bb, H = num_layers, seq_len, block_batch, hidden_size

    x = x_ref[...]                                    # (T*Bb, 1)
    w0 = w0_ref[...]                                  # (1, 3H)

    for layer in range(L):
        bg = bg_ref[layer:layer + 1, :]               # (1, 3H)
        bhn = bhn_ref[layer:layer + 1, :]             # (1, H)

        # ---- hoisted, gate-fused input projections for ALL timesteps ----
        if layer == 0:
            # input feature dim is 1 -> pure VPU broadcast outer product
            gi = x * w0 + bg                          # (T*Bb, 3H)
        else:
            # one lane-dense (T*Bb, H) @ (H, 3H) MXU matmul, off the serial path
            gi = jnp.dot(seq_scr[...], wih_ref[layer - 1],
                         preferred_element_type=jnp.float32) + bg
        gi_scr[...] = gi

        # ---- serial recurrence: ONE fused (Bb,H)@(H,3H) MXU op per timestep ----
        def step(t, h, _layer=layer, _bhn=bhn):
            lo = pl.multiple_of(t * Bb, Bb)
            g_i = gi_scr[pl.ds(lo, Bb), :]                          # (Bb, 3H)
            w_h = whh_ref[_layer]                                   # (H, 3H)
            g_h = jnp.dot(h, w_h, preferred_element_type=jnp.float32)
            r = jax.nn.sigmoid(g_i[:, 0:H] + g_h[:, 0:H])
            z = jax.nn.sigmoid(g_i[:, H:2 * H] + g_h[:, H:2 * H])
            n = jnp.tanh(g_i[:, 2 * H:3 * H] + r * (g_h[:, 2 * H:3 * H] + _bhn))
            h = (1.0 - z) * n + z * h                               # (Bb, H)
            # layer output: next layer's input and (for the last layer) head input
            seq_scr[pl.ds(lo, Bb), :] = h
            return h

        h_last = lax.fori_loop(0, T, step, h0_ref[layer], unroll=unroll)
        hn_ref[layer] = h_last

    # ---- output head, hoisted out of the loop: single (T*Bb,H)@(H,1) matmul ----
    y = jnp.dot(seq_scr[...], wlin_ref[...],
                preferred_element_type=jnp.float32) + blin_ref[0, 0]
    y_ref[0] = y                                      # one store, off the critical path


def prepare_params(params, hidden_size, num_layers):
    """Host-side re-layout of PyTorch-shaped GRU/Linear params for the kernel."""
    H, L = hidden_size, num_layers

    # Layer 0: W_ih is (3H, 1) -> one lane row in gate order (r, z, n).
    w0 = params["w_ih"][0].reshape(1, 3 * H)

    # Gate-fused, pre-transposed recurrent weights: (3H, H).T == concat of per-gate
    # transposes along lanes, so a plain transpose gives the fused (H, 3H) RHS.
    whh = jnp.stack([params["w_hh"][l].T for l in range(L)], axis=0)       # (L, H, 3H)
    if L > 1:
        wih = jnp.stack([params["w_ih"][l].T for l in range(1, L)], axis=0)  # (L-1,H,3H)
    else:
        wih = jnp.zeros((1, 8, 128), jnp.float32)      # tiny unused placeholder

    bg_rows, bhn_rows = [], []
    for l in range(L):
        b_ih, b_hh = params["b_ih"][l], params["b_hh"][l]
        bg_rows.append(jnp.concatenate([
            b_ih[0:H] + b_hh[0:H],            # b_r (combined)
            b_ih[H:2 * H] + b_hh[H:2 * H],    # b_z (combined)
            b_ih[2 * H:3 * H],                # b_in
        ]))
        bhn_rows.append(b_hh[2 * H:3 * H])    # b_hn kept separate (inside r*(...))
    bg = jnp.stack(bg_rows, axis=0)                                       # (L, 3H)
    bhn = jnp.stack(bhn_rows, axis=0)                                     # (L, H)

    wlin = params["w_lin"].T                                              # (H, 1)
    blin = params["b_lin"].reshape(1, 1)                                  # (1, 1) SMEM
    return {"w0": w0, "wih": wih, "whh": whh, "bg": bg, "bhn": bhn,
            "wlin": wlin, "blin": blin}


def _num_tensorcores_per_chip():
    """Only v7x exposes 2 TensorCores per chip; everything else gets 1."""
    # TODO(synk): switch to pltpu.get_tpu_info() once a core-count field is exposed.
    try:
        kind = jax.devices()[0].device_kind.lower()
    except Exception:
        return 1
    return 2 if "v7" in kind else 1


def rnn_decoder_forward(x, hidden, params):
    """x: (T, B, 1) f32, hidden: (L, B, H) f32 -> (output (B, T, 1), hidden (L, B, H))."""
    T, B, _ = x.shape
    L, _, H = hidden.shape
    kp = prepare_params(params, H, L)

    # Generation-aware batch split: 2 blocks only on 2-TC chips (v7x); on single-TC
    # chips splitting just serializes the latency-bound recurrence twice.
    nb = 1
    if _num_tensorcores_per_chip() >= 2 and B % 2 == 0 and (B // 2) % 8 == 0:
        nb = 2
    Bb = B // nb

    # Host-side relayout: batch-block-major, time-major inside each block.
    x2d = x.reshape(T, nb, Bb).transpose(1, 0, 2).reshape(nb * T * Bb, 1)
    h0 = hidden.reshape(L, nb, Bb, H).transpose(1, 0, 2, 3).reshape(nb * L, Bb, H)

    # Moderate unroll keeps LLO scheduler visibility without unbounded live ranges.
    unroll = 1
    for u in (8, 4, 2):
        if T % u == 0:
            unroll = u
            break

    kernel = functools.partial(_gru_decoder_kernel, num_layers=L, seq_len=T,
                               block_batch=Bb, hidden_size=H, unroll=unroll)

    # Explicit VMEM budget: weights + scratch + double-buffered (lane-padded) blocks.
    weight_bytes = sum(int(kp[k].size) * 4 for k in ("w0", "wih", "whh", "bg", "bhn", "wlin"))
    scratch_bytes = 4 * (T * Bb * 3 * H + T * Bb * H)
    io_block_bytes = 4 * (2 * T * Bb * 128 + 2 * L * Bb * H)   # x & y tiles pad lanes to 128
    need = weight_bytes + scratch_bytes + 2 * io_block_bytes
    vmem_limit = int(min(64 << 20, max(16 << 20, 2 * need + (4 << 20))))

    vmem_full = pl.BlockSpec(memory_space=pltpu.MemorySpace.VMEM)   # whole array resident
    smem_full = pl.BlockSpec(memory_space=pltpu.MemorySpace.SMEM)   # scalar param

    y, hn = pl.pallas_call(
        kernel,
        grid=(nb,),
        out_shape=(
            jax.ShapeDtypeStruct((nb, T * Bb, 1), jnp.float32),
            jax.ShapeDtypeStruct((nb * L, Bb, H), jnp.float32),
        ),
        in_specs=[
            pl.BlockSpec((T * Bb, 1), lambda i: (i, 0)),      # x (one batch block / step)
            pl.BlockSpec((L, Bb, H), lambda i: (i, 0, 0)),    # h0
            vmem_full,   # w0   (1, 3H)
            vmem_full,   # wih  (L-1, H, 3H) or placeholder
            vmem_full,   # whh  (L, H, 3H)
            vmem_full,   # bg   (L, 3H)
            vmem_full,   # bhn  (L, H)
            vmem_full,   # wlin (H, 1)
            smem_full,   # blin (1, 1)
        ],
        out_specs=(
            pl.BlockSpec((1, T * Bb, 1), lambda i: (i, 0, 0)),  # y
            pl.BlockSpec((L, Bb, H), lambda i: (i, 0, 0)),      # hn
        ),
        scratch_shapes=[
            pltpu.VMEM((T * Bb, 3 * H), jnp.float32),   # gi scratch
            pltpu.VMEM((T * Bb, H), jnp.float32),       # layer output sequence
        ],
        compiler_params=pltpu.CompilerParams(
            dimension_semantics=("parallel",),
            vmem_limit_bytes=vmem_limit),
    )(x2d, h0, kp["w0"], kp["wih"], kp["whh"], kp["bg"], kp["bhn"],
      kp["wlin"], kp["blin"])

    # (nb, T*Bb, 1) -> (B, T, 1); (nb*L, Bb, H) -> (L, B, H)
    output = y.reshape(nb, T, Bb).transpose(0, 2, 1).reshape(B, T)[..., None]
    h_n = hn.reshape(nb, L, Bb, H).transpose(1, 0, 2, 3).reshape(L, B, H)
    return output, h_n


def init_params(key, hidden_size, num_layers):
    """Deterministic init matching PyTorch GRU/Linear parameter shapes."""
    H, L = hidden_size, num_layers
    bound = 1.0 / jnp.sqrt(jnp.float32(H))
    keys = jax.random.split(key, 4 * L + 2)

    w_ih, w_hh, b_ih, b_hh = [], [], [], []
    for l in range(L):
        in_dim = 1 if l == 0 else H
        w_ih.append(jax.random.uniform(keys[4 * l + 0], (3 * H, in_dim),
                                       jnp.float32, -bound, bound))
        w_hh.append(jax.random.uniform(keys[4 * l + 1], (3 * H, H),
                                       jnp.float32, -bound, bound))
        b_ih.append(jax.random.uniform(keys[4 * l + 2], (3 * H,),
                                       jnp.float32, -bound, bound))
        b_hh.append(jax.random.uniform(keys[4 * l + 3], (3 * H,),
                                       jnp.float32, -bound, bound))

    w_lin = jax.random.uniform(keys[-2], (1, H), jnp.float32, -bound, bound)
    b_lin = jax.random.uniform(keys[-1], (1,), jnp.float32, -bound, bound)
    return {"w_ih": w_ih, "w_hh": w_hh, "b_ih": b_ih, "b_hh": b_hh,
            "w_lin": w_lin, "b_lin": b_lin}


def _reference_forward(x, hidden, params):
    """Pure-JAX reference reproducing PyTorch GRU + Linear semantics."""
    T, B, _ = x.shape
    L, _, H = hidden.shape
    seq = x                                              # (T, B, in_dim)
    h_n = []
    for l in range(L):
        w_ih, w_hh = params["w_ih"][l], params["w_hh"][l]
        b_ih, b_hh = params["b_ih"][l], params["b_hh"][l]
        h = hidden[l]
        outs = []
        for t in range(T):
            gi = seq[t] @ w_ih.T + b_ih
            gh = h @ w_hh.T + b_hh
            r = jax.nn.sigmoid(gi[:, :H] + gh[:, :H])
            z = jax.nn.sigmoid(gi[:, H:2 * H] + gh[:, H:2 * H])
            n = jnp.tanh(gi[:, 2 * H:] + r * gh[:, 2 * H:])
            h = (1 - z) * n + z * h
            outs.append(h)
        seq = jnp.stack(outs)                            # (T, B, H)
        h_n.append(h)
    y = seq @ params["w_lin"].T + params["b_lin"][0]     # (T, B, 1)
    return jnp.transpose(y, (1, 0, 2)), jnp.stack(h_n)


if __name__ == "__main__":
    T, B, H, L = 8, 16, 32, 2

    key = jax.random.PRNGKey(0)
    k_x, k_h, k_p = jax.random.split(key, 3)

    x = jax.random.normal(k_x, (T, B, 1), jnp.float32)
    hidden0 = jax.random.normal(k_h, (L, B, H), jnp.float32)
    params = init_params(k_p, H, L)

    out, h_n = rnn_decoder_forward(x, hidden0, params)
    out = jax.block_until_ready(out)
    h_n = jax.block_until_ready(h_n)

    ref_out, ref_h = _reference_forward(x, hidden0, params)
    assert out.shape == (B, T, 1) and h_n.shape == (L, B, H)
    assert jnp.allclose(out, ref_out, atol=1e-4, rtol=1e-4), \
        float(jnp.max(jnp.abs(out - ref_out)))
    assert jnp.allclose(h_n, ref_h, atol=1e-4, rtol=1e-4), \
        float(jnp.max(jnp.abs(h_n - ref_h)))

    print("KERNEL_OK")
</pallas_src>

<mosaic_0001>
module attributes {stable_mosaic.version = 11 : i64} {
  func.func @_gru_decoder_kernel(%arg0: i32, %arg1: memref<128x1xf32, #tpu.memory_space<vmem>>, %arg2: memref<2x16x32xf32, #tpu.memory_space<vmem>>, %arg3: memref<1x96xf32, #tpu.memory_space<vmem>>, %arg4: memref<1x32x96xf32, #tpu.memory_space<vmem>>, %arg5: memref<2x32x96xf32, #tpu.memory_space<vmem>>, %arg6: memref<2x96xf32, #tpu.memory_space<vmem>>, %arg7: memref<2x32xf32, #tpu.memory_space<vmem>>, %arg8: memref<32x1xf32, #tpu.memory_space<vmem>>, %arg9: memref<1x1xf32, #tpu.memory_space<smem>>, %arg10: memref<1x128x1xf32, #tpu.memory_space<vmem>>, %arg11: memref<2x16x32xf32, #tpu.memory_space<vmem>>, %arg12: memref<128x96xf32, #tpu.memory_space<vmem>>, %arg13: memref<128x32xf32, #tpu.memory_space<vmem>>) attributes {dimension_semantics = [#tpu.dimension_semantics<parallel>], iteration_bounds = array<i64: 1>, scalar_prefetch = 0 : i64, scratch_operands = 2 : i64, tpu.core_type = #tpu.core_type<tc>, window_params = [{transform_indices = @transform_0, window_bounds = array<i64: 128, 1>}, {transform_indices = @transform_1, window_bounds = array<i64: 2, 16, 32>}, {pipeline_mode = #tpu.pipeline_mode<synchronous>, transform_indices = @transform_2, window_bounds = array<i64: 1, 96>}, {pipeline_mode = #tpu.pipeline_mode<synchronous>, transform_indices = @transform_3, window_bounds = array<i64: 1, 32, 96>}, {pipeline_mode = #tpu.pipeline_mode<synchronous>, transform_indices = @transform_4, window_bounds = array<i64: 2, 32, 96>}, {pipeline_mode = #tpu.pipeline_mode<synchronous>, transform_indices = @transform_5, window_bounds = array<i64: 2, 96>}, {pipeline_mode = #tpu.pipeline_mode<synchronous>, transform_indices = @transform_6, window_bounds = array<i64: 2, 32>}, {pipeline_mode = #tpu.pipeline_mode<synchronous>, transform_indices = @transform_7, window_bounds = array<i64: 32, 1>}, {transform_indices = @transform_8, window_bounds = array<i64: 1, 1>}, {transform_indices = @transform_9, window_bounds = array<i64: 1, 128, 1>}, {transform_indices = @transform_10, window_bounds = array<i64: 2, 16, 32>}]} {
    %c0 = arith.constant 0 : index
    %c0_0 = arith.constant 0 : index
    %0 = vector.load %arg1[%c0, %c0_0] : memref<128x1xf32, #tpu.memory_space<vmem>>, vector<128x1xf32>
    %c0_1 = arith.constant 0 : index
    %c0_2 = arith.constant 0 : index
    %1 = vector.load %arg3[%c0_1, %c0_2] : memref<1x96xf32, #tpu.memory_space<vmem>>, vector<1x96xf32>
    %c0_3 = arith.constant 0 : index
    %c0_4 = arith.constant 0 : index
    %2 = vector.load %arg6[%c0_3, %c0_4] : memref<2x96xf32, #tpu.memory_space<vmem>>, vector<1x96xf32>
    %c0_5 = arith.constant 0 : index
    %c0_6 = arith.constant 0 : index
    %3 = vector.load %arg7[%c0_5, %c0_6] : memref<2x32xf32, #tpu.memory_space<vmem>>, vector<1x32xf32>
    %4 = vector.broadcast %0 : vector<128x1xf32> to vector<128x96xf32>
    %5 = vector.broadcast %1 : vector<1x96xf32> to vector<128x96xf32>
    %6 = arith.mulf %4, %5 : vector<128x96xf32>
    %7 = vector.broadcast %2 : vector<1x96xf32> to vector<128x96xf32>
    %8 = arith.addf %6, %7 : vector<128x96xf32>
    %c0_7 = arith.constant 0 : index
    %c0_8 = arith.constant 0 : index
    %9 = vector.load %arg12[%c0_7, %c0_8] : memref<128x96xf32, #tpu.memory_space<vmem>>, vector<128x96xf32>
    tpu.vector_store %arg12[%c0_7, %c0_8], %8 {strides = array<i32>} : memref<128x96xf32, #tpu.memory_space<vmem>>, vector<128x96xf32>,
    %c0_9 = arith.constant 0 : index
    %c0_10 = arith.constant 0 : index
    %c0_11 = arith.constant 0 : index
    %10 = vector.load %arg2[%c0_9, %c0_10, %c0_11] : memref<2x16x32xf32, #tpu.memory_space<vmem>>, vector<1x16x32xf32>
    %11 = vector.shape_cast %10 : vector<1x16x32xf32> to vector<16x32xf32>
    %c0_i32 = arith.constant 0 : i32
    %c16_i32 = arith.constant 16 : i32
    %12 = arith.muli %c0_i32, %c16_i32 : i32
    %13 = tpu.assume_multiple %12, 16 : i32
    %14 = arith.index_cast %13 : i32 to index
    %c0_12 = arith.constant 0 : index
    %15 = vector.load %arg12[%14, %c0_12] : memref<128x96xf32, #tpu.memory_space<vmem>>, vector<16x96xf32>
    %c0_13 = arith.constant 0 : index
    %c0_14 = arith.constant 0 : index
    %c0_15 = arith.constant 0 : index
    %16 = vector.load %arg5[%c0_13, %c0_14, %c0_15] : memref<2x32x96xf32, #tpu.memory_space<vmem>>, vector<1x32x96xf32>
    %17 = vector.shape_cast %16 : vector<1x32x96xf32> to vector<32x96xf32>
    %cst = arith.constant dense<0.000000e+00> : vector<16x96xf32>
    %18 = tpu.matmul %11, %17, %cst {dimension_numbers = #tpu.dot_dimension_numbers<[1], [0], [0], [1], [0, 0, 1, 1], [], []>} : vector<16x32xf32>, vector<32x96xf32>, vector<16x96xf32> -> vector<16x96xf32>
    %19 = vector.extract_strided_slice %15 {offsets = [0, 0], sizes = [16, 32], strides = [1, 1]} : vector<16x96xf32> to vector<16x32xf32>
    %20 = vector.extract_strided_slice %18 {offsets = [0, 0], sizes = [16, 32], strides = [1, 1]} : vector<16x96xf32> to vector<16x32xf32>
    %21 = arith.addf %19, %20 : vector<16x32xf32>
    %22 = arith.negf %21 : vector<16x32xf32>
    %23 = math.exp %22 : vector<16x32xf32>
    %cst_16 = arith.constant 1.000000e+00 : f32
    %24 = vector.broadcast %cst_16 : f32 to vector<16x32xf32>
    %25 = arith.addf %24, %23 : vector<16x32xf32>
    %26 = arith.divf %24, %25 : vector<16x32xf32>
    %27 = vector.extract_strided_slice %15 {offsets = [0, 32], sizes = [16, 32], strides = [1, 1]} : vector<16x96xf32> to vector<16x32xf32>
    %28 = vector.extract_strided_slice %18 {offsets = [0, 32], sizes = [16, 32], strides = [1, 1]} : vector<16x96xf32> to vector<16x32xf32>
    %29 = arith.addf %27, %28 : vector<16x32xf32>
    %30 = arith.negf %29 : vector<16x32xf32>
    %31 = math.exp %30 : vector<16x32xf32>
    %cst_17 = arith.constant 1.000000e+00 : f32
    %32 = vector.broadcast %cst_17 : f32 to vector<16x32xf32>
    %33 = arith.addf %32, %31 : vector<16x32xf32>
    %34 = arith.divf %32, %33 : vector<16x32xf32>
    %35 = vector.extract_strided_slice %15 {offsets = [0, 64], sizes = [16, 32], strides = [1, 1]} : vector<16x96xf32> to vector<16x32xf32>
    %36 = vector.extract_strided_slice %18 {offsets = [0, 64], sizes = [16, 32], strides = [1, 1]} : vector<16x96xf32> to vector<16x32xf32>
    %37 = vector.broadcast %3 : vector<1x32xf32> to vector<16x32xf32>
    %38 = arith.addf %36, %37 : vector<16x32xf32>
    %39 = arith.mulf %26, %38 : vector<16x32xf32>
    %40 = arith.addf %35, %39 : vector<16x32xf32>
    %41 = math.tanh %40 : vector<16x32xf32>
    %cst_18 = arith.constant 1.000000e+00 : f32
    %42 = vector.broadcast %cst_18 : f32 to vector<16x32xf32>
    %43 = arith.subf %42, %34 : vector<16x32xf32>
    %44 = arith.mulf %43, %41 : vector<16x32xf32>
    %45 = arith.mulf %34, %11 : vector<16x32xf32>
    %46 = arith.addf %44, %45 : vector<16x32xf32>
    %47 = arith.index_cast %13 : i32 to index
    %c0_19 = arith.constant 0 : index
    %48 = vector.load %arg13[%47, %c0_19] : memref<128x32xf32, #tpu.memory_space<vmem>>, vector<16x32xf32>
    tpu.vector_store %arg13[%47, %c0_19], %46 {strides = array<i32>} : memref<128x32xf32, #tpu.memory_space<vmem>>, vector<16x32xf32>,
    %c1_i32 = arith.constant 1 : i32
    %c16_i32_20 = arith.constant 16 : i32
    %49 = arith.muli %c1_i32, %c16_i32_20 : i32
    %50 = tpu.assume_multiple %49, 16 : i32
    %51 = arith.index_cast %50 : i32 to index
    %c0_21 = arith.constant 0 : index
    %52 = vector.load %arg12[%51, %c0_21] : memref<128x96xf32, #tpu.memory_space<vmem>>, vector<16x96xf32>
    %c0_22 = arith.constant 0 : index
    %c0_23 = arith.constant 0 : index
    %c0_24 = arith.constant 0 : index
    %53 = vector.load %arg5[%c0_22, %c0_23, %c0_24] : memref<2x32x96xf32, #tpu.memory_space<vmem>>, vector<1x32x96xf32>
    %54 = vector.shape_cast %53 : vector<1x32x96xf32> to vector<32x96xf32>
    %cst_25 = arith.constant dense<0.000000e+00> : vector<16x96xf32>
    %55 = tpu.matmul %46, %54, %cst_25 {dimension_numbers = #tpu.dot_dimension_numbers<[1], [0], [0], [1], [0, 0, 1, 1], [], []>} : vector<16x32xf32>, vector<32x96xf32>, vector<16x96xf32> -> vector<16x96xf32>
    %56 = vector.extract_strided_slice %52 {offsets = [0, 0], sizes = [16, 32], strides = [1, 1]} : vector<16x96xf32> to vector<16x32xf32>
    %57 = vector.extract_strided_slice %55 {offsets = [0, 0], sizes = [16, 32], strides = [1, 1]} : vector<16x96xf32> to vector<16x32xf32>
    %58 = arith.addf %56, %57 : vector<16x32xf32>
    %59 = arith.negf %58 : vector<16x32xf32>
    %60 = math.exp %59 : vector<16x32xf32>
    %cst_26 = arith.constant 1.000000e+00 : f32
    %61 = vector.broadcast %cst_26 : f32 to vector<16x32xf32>
    %62 = arith.addf %61, %60 : vector<16x32xf32>
    %63 = arith.divf %61, %62 : vector<16x32xf32>
    %64 = vector.extract_strided_slice %52 {offsets = [0, 32], sizes = [16, 32], strides = [1, 1]} : vector<16x96xf32> to vector<16x32xf32>
    %65 = vector.extract_strided_slice %55 {offsets = [0, 32], sizes = [16, 32], strides = [1, 1]} : vector<16x96xf32> to vector<16x32xf32>
    %66 = arith.addf %64, %65 : vector<16x32xf32>
    %67 = arith.negf %66 : vector<16x32xf32>
    %68 = math.exp %67 : vector<16x32xf32>
    %cst_27 = arith.constant 1.000000e+00 : f32
    %69 = vector.broadcast %cst_27 : f32 to vector<16x32xf32>
    %70 = arith.addf %69, %68 : vector<16x32xf32>
    %71 = arith.divf %69, %70 : vector<16x32xf32>
    %72 = vector.extract_strided_slice %52 {offsets = [0, 64], sizes = [16, 32], strides = [1, 1]} : vector<16x96xf32> to vector<16x32xf32>
    %73 = vector.extract_strided_slice %55 {offsets = [0, 64], sizes = [16, 32], strides = [1, 1]} : vector<16x96xf32> to vector<16x32xf32>
    %74 = vector.broadcast %3 : vector<1x32xf32> to vector<16x32xf32>
    %75 = arith.addf %73, %74 : vector<16x32xf32>
    %76 = arith.mulf %63, %75 : vector<16x32xf32>
    %77 = arith.addf %72, %76 : vector<16x32xf32>
    %78 = math.tanh %77 : vector<16x32xf32>
    %cst_28 = arith.constant 1.000000e+00 : f32
    %79 = vector.broadcast %cst_28 : f32 to vector<16x32xf32>
    %80 = arith.subf %79, %71 : vector<16x32xf32>
    %81 = arith.mulf %80, %78 : vector<16x32xf32>
    %82 = arith.mulf %71, %46 : vector<16x32xf32>
    %83 = arith.addf %81, %82 : vector<16x32xf32>
    %84 = arith.index_cast %50 : i32 to index
    %c0_29 = arith.constant 0 : index
    %85 = vector.load %arg13[%84, %c0_29] : memref<128x32xf32, #tpu.memory_space<vmem>>, vector<16x32xf32>
    tpu.vector_store %arg13[%84, %c0_29], %83 {strides = array<i32>} : memref<128x32xf32, #tpu.memory_space<vmem>>, vector<16x32xf32>,
    %c2_i32 = arith.constant 2 : i32
    %c16_i32_30 = arith.constant 16 : i32
    %86 = arith.muli %c2_i32, %c16_i32_30 : i32
    %87 = tpu.assume_multiple %86, 16 : i32
    %88 = arith.index_cast %87 : i32 to index
    %c0_31 = arith.constant 0 : index
    %89 = vector.load %arg12[%88, %c0_31] : memref<128x96xf32, #tpu.memory_space<vmem>>, vector<16x96xf32>
    %c0_32 = arith.constant 0 : index
    %c0_33 = arith.constant 0 : index
    %c0_34 = arith.constant 0 : index
    %90 = vector.load %arg5[%c0_32, %c0_33, %c0_34] : memref<2x32x96xf32, #tpu.memory_space<vmem>>, vector<1x32x96xf32>
    %91 = vector.shape_cast %90 : vector<1x32x96xf32> to vector<32x96xf32>
    %cst_35 = arith.constant dense<0.000000e+00> : vector<16x96xf32>
    %92 = tpu.matmul %83, %91, %cst_35 {dimension_numbers = #tpu.dot_dimension_numbers<[1], [0], [0], [1], [0, 0, 1, 1], [], []>} : vector<16x32xf32>, vector<32x96xf32>, vector<16x96xf32> -> vector<16x96xf32>
    %93 = vector.extract_strided_slice %89 {offsets = [0, 0], sizes = [16, 32], strides = [1, 1]} : vector<16x96xf32> to vector<16x32xf32>
    %94 = vector.extract_strided_slice %92 {offsets = [0, 0], sizes = [16, 32], strides = [1, 1]} : vector<16x96xf32> to vector<16x32xf32>
    %95 = arith.addf %93, %94 : vector<16x32xf32>
    %96 = arith.negf %95 : vector<16x32xf32>
    %97 = math.exp %96 : vector<16x32xf32>
    %cst_36 = arith.constant 1.000000e+00 : f32
    %98 = vector.broadcast %cst_36 : f32 to vector<16x32xf32>
    %99 = arith.addf %98, %97 : vector<16x32xf32>
    %100 = arith.divf %98, %99 : vector<16x32xf32>
    %101 = vector.extract_strided_slice %89 {offsets = [0, 32], sizes = [16, 32], strides = [1, 1]} : vector<16x96xf32> to vector<16x32xf32>
    %102 = vector.extract_strided_slice %92 {offsets = [0, 32], sizes = [16, 32], strides = [1, 1]} : vector<16x96xf32> to vector<16x32xf32>
    %103 = arith.addf %101, %102 : vector<16x32xf32>
    %104 = arith.negf %103 : vector<16x32xf32>
    %105 = math.exp %104 : vector<16x32xf32>
    %cst_37 = arith.constant 1.000000e+00 : f32
    %106 = vector.broadcast %cst_37 : f32 to vector<16x32xf32>
    %107 = arith.addf %106, %105 : vector<16x32xf32>
    %108 = arith.divf %106, %107 : vector<16x32xf32>
    %109 = vector.extract_strided_slice %89 {offsets = [0, 64], sizes = [16, 32], strides = [1, 1]} : vector<16x96xf32> to vector<16x32xf32>
    %110 = vector.extract_strided_slice %92 {offsets = [0, 64], sizes = [16, 32], strides = [1, 1]} : vector<16x96xf32> to vector<16x32xf32>
    %111 = vector.broadcast %3 : vector<1x32xf32> to vector<16x32xf32>
    %112 = arith.addf %110, %111 : vector<16x32xf32>
    %113 = arith.mulf %100, %112 : vector<16x32xf32>
    %114 = arith.addf %109, %113 : vector<16x32xf32>
    %115 = math.tanh %114 : vector<16x32xf32>
    %cst_38 = arith.constant 1.000000e+00 : f32
    %116 = vector.broadcast %cst_38 : f32 to vector<16x32xf32>
    %117 = arith.subf %116, %108 : vector<16x32xf32>
    %118 = arith.mulf %117, %115 : vector<16x32xf32>
    %119 = arith.mulf %108, %83 : vector<16x32xf32>
    %120 = arith.addf %118, %119 : vector<16x32xf32>
    %121 = arith.index_cast %87 : i32 to index
    %c0_39 = arith.constant 0 : index
    %122 = vector.load %arg13[%121, %c0_39] : memref<128x32xf32, #tpu.memory_space<vmem>>, vector<16x32xf32>
    tpu.vector_store %arg13[%121, %c0_39], %120 {strides = array<i32>} : memref<128x32xf32, #tpu.memory_space<vmem>>, vector<16x32xf32>,
    %c3_i32 = arith.constant 3 : i32
    %c16_i32_40 = arith.constant 16 : i32
    %123 = arith.muli %c3_i32, %c16_i32_40 : i32
    %124 = tpu.assume_multiple %123, 16 : i32
    %125 = arith.index_cast %124 : i32 to index
    %c0_41 = arith.constant 0 : index
    %126 = vector.load %arg12[%125, %c0_41] : memref<128x96xf32, #tpu.memory_space<vmem>>, vector<16x96xf32>
    %c0_42 = arith.constant 0 : index
    %c0_43 = arith.constant 0 : index
    %c0_44 = arith.constant 0 : index
    %127 = vector.load %arg5[%c0_42, %c0_43, %c0_44] : memref<2x32x96xf32, #tpu.memory_space<vmem>>, vector<1x32x96xf32>
    %128 = vector.shape_cast %127 : vector<1x32x96xf32> to vector<32x96xf32>
    %cst_45 = arith.constant dense<0.000000e+00> : vector<16x96xf32>
    %129 = tpu.matmul %120, %128, %cst_45 {dimension_numbers = #tpu.dot_dimension_numbers<[1], [0], [0], [1], [0, 0, 1, 1], [], []>} : vector<16x32xf32>, vector<32x96xf32>, vector<16x96xf32> -> vector<16x96xf32>
    %130 = vector.extract_strided_slice %126 {offsets = [0, 0], sizes = [16, 32], strides = [1, 1]} : vector<16x96xf32> to vector<16x32xf32>
    %131 = vector.extract_strided_slice %129 {offsets = [0, 0], sizes = [16, 32], strides = [1, 1]} : vector<16x96xf32> to vector<16x32xf32>
    %132 = arith.addf %130, %131 : vector<16x32xf32>
    %133 = arith.negf %132 : vector<16x32xf32>
    %134 = math.exp %133 : vector<16x32xf32>
    %cst_46 = arith.constant 1.000000e+00 : f32
    %135 = vector.broadcast %cst_46 : f32 to vector<16x32xf32>
    %136 = arith.addf %135, %134 : vector<16x32xf32>
    %137 = arith.divf %135, %136 : vector<16x32xf32>
    %138 = vector.extract_strided_slice %126 {offsets = [0, 32], sizes = [16, 32], strides = [1, 1]} : vector<16x96xf32> to vector<16x32xf32>
    %139 = vector.extract_strided_slice %129 {offsets = [0, 32], sizes = [16, 32], strides = [1, 1]} : vector<16x96xf32> to vector<16x32xf32>
    %140 = arith.addf %138, %139 : vector<16x32xf32>
    %141 = arith.negf %140 : vector<16x32xf32>
    %142 = math.exp %141 : vector<16x32xf32>
    %cst_47 = arith.constant 1.000000e+00 : f32
    %143 = vector.broadcast %cst_47 : f32 to vector<16x32xf32>
    %144 = arith.addf %143, %142 : vector<16x32xf32>
    %145 = arith.divf %143, %144 : vector<16x32xf32>
    %146 = vector.extract_strided_slice %126 {offsets = [0, 64], sizes = [16, 32], strides = [1, 1]} : vector<16x96xf32> to vector<16x32xf32>
    %147 = vector.extract_strided_slice %129 {offsets = [0, 64], sizes = [16, 32], strides = [1, 1]} : vector<16x96xf32> to vector<16x32xf32>
    %148 = vector.broadcast %3 : vector<1x32xf32> to vector<16x32xf32>
    %149 = arith.addf %147, %148 : vector<16x32xf32>
    %150 = arith.mulf %137, %149 : vector<16x32xf32>
    %151 = arith.addf %146, %150 : vector<16x32xf32>
    %152 = math.tanh %151 : vector<16x32xf32>
    %cst_48 = arith.constant 1.000000e+00 : f32
    %153 = vector.broadcast %cst_48 : f32 to vector<16x32xf32>
    %154 = arith.subf %153, %145 : vector<16x32xf32>
    %155 = arith.mulf %154, %152 : vector<16x32xf32>
    %156 = arith.mulf %145, %120 : vector<16x32xf32>
    %157 = arith.addf %155, %156 : vector<16x32xf32>
    %158 = arith.index_cast %124 : i32 to index
    %c0_49 = arith.constant 0 : index
    %159 = vector.load %arg13[%158, %c0_49] : memref<128x32xf32, #tpu.memory_space<vmem>>, vector<16x32xf32>
    tpu.vector_store %arg13[%158, %c0_49], %157 {strides = array<i32>} : memref<128x32xf32, #tpu.memory_space<vmem>>, vector<16x32xf32>,
    %c4_i32 = arith.constant 4 : i32
    %c16_i32_50 = arith.constant 16 : i32
    %160 = arith.muli %c4_i32, %c16_i32_50 : i32
    %161 = tpu.assume_multiple %160, 16 : i32
    %162 = arith.index_cast %161 : i32 to index
    %c0_51 = arith.constant 0 : index
    %163 = vector.load %arg12[%162, %c0_51] : memref<128x96xf32, #tpu.memory_space<vmem>>, vector<16x96xf32>
    %c0_52 = arith.constant 0 : index
    %c0_53 = arith.constant 0 : index
    %c0_54 = arith.constant 0 : index
    %164 = vector.load %arg5[%c0_52, %c0_53, %c0_54] : memref<2x32x96xf32, #tpu.memory_space<vmem>>, vector<1x32x96xf32>
    %165 = vector.shape_cast %164 : vector<1x32x96xf32> to vector<32x96xf32>
    %cst_55 = arith.constant dense<0.000000e+00> : vector<16x96xf32>
    %166 = tpu.matmul %157, %165, %cst_55 {dimension_numbers = #tpu.dot_dimension_numbers<[1], [0], [0], [1], [0, 0, 1, 1], [], []>} : vector<16x32xf32>, vector<32x96xf32>, vector<16x96xf32> -> vector<16x96xf32>
    %167 = vector.extract_strided_slice %163 {offsets = [0, 0], sizes = [16, 32], strides = [1, 1]} : vector<16x96xf32> to vector<16x32xf32>
    %168 = vector.extract_strided_slice %166 {offsets = [0, 0], sizes = [16, 32], strides = [1, 1]} : vector<16x96xf32> to vector<16x32xf32>
    %169 = arith.addf %167, %168 : vector<16x32xf32>
    %170 = arith.negf %169 : vector<16x32xf32>
    %171 = math.exp %170 : vector<16x32xf32>
    %cst_56 = arith.constant 1.000000e+00 : f32
    %172 = vector.broadcast %cst_56 : f32 to vector<16x32xf32>
    %173 = arith.addf %172, %171 : vector<16x32xf32>
    %174 = arith.divf %172, %173 : vector<16x32xf32>
    %175 = vector.extract_strided_slice %163 {offsets = [0, 32], sizes = [16, 32], strides = [1, 1]} : vector<16x96xf32> to vector<16x32xf32>
    %176 = vector.extract_strided_slice %166 {offsets = [0, 32], sizes = [16, 32], strides = [1, 1]} : vector<16x96xf32> to vector<16x32xf32>
    %177 = arith.addf %175, %176 : vector<16x32xf32>
    %178 = arith.negf %177 : vector<16x32xf32>
    %179 = math.exp %178 : vector<16x32xf32>
    %cst_57 = arith.constant 1.000000e+00 : f32
    %180 = vector.broadcast %cst_57 : f32 to vector<16x32xf32>
    %181 = arith.addf %180, %179 : vector<16x32xf32>
    %182 = arith.divf %180, %181 : vector<16x32xf32>
    %183 = vector.extract_strided_slice %163 {offsets = [0, 64], sizes = [16, 32], strides = [1, 1]} : vector<16x96xf32> to vector<16x32xf32>
    %184 = vector.extract_strided_slice %166 {offsets = [0, 64], sizes = [16, 32], strides = [1, 1]} : vector<16x96xf32> to vector<16x32xf32>
    %185 = vector.broadcast %3 : vector<1x32xf32> to vector<16x32xf32>
    %186 = arith.addf %184, %185 : vector<16x32xf32>
    %187 = arith.mulf %174, %186 : vector<16x32xf32>
    %188 = arith.addf %183, %187 : vector<16x32xf32>
    %189 = math.tanh %188 : vector<16x32xf32>
    %cst_58 = arith.constant 1.000000e+00 : f32
    %190 = vector.broadcast %cst_58 : f32 to vector<16x32xf32>
    %191 = arith.subf %190, %182 : vector<16x32xf32>
    %192 = arith.mulf %191, %189 : vector<16x32xf32>
    %193 = arith.mulf %182, %157 : vector<16x32xf32>
    %194 = arith.addf %192, %193 : vector<16x32xf32>
    %195 = arith.index_cast %161 : i32 to index
    %c0_59 = arith.constant 0 : index
    %196 = vector.load %arg13[%195, %c0_59] : memref<128x32xf32, #tpu.memory_space<vmem>>, vector<16x32xf32>
    tpu.vector_store %arg13[%195, %c0_59], %194 {strides = array<i32>} : memref<128x32xf32, #tpu.memory_space<vmem>>, vector<16x32xf32>,
    %c5_i32 = arith.constant 5 : i32
    %c16_i32_60 = arith.constant 16 : i32
    %197 = arith.muli %c5_i32, %c16_i32_60 : i32
    %198 = tpu.assume_multiple %197, 16 : i32
    %199 = arith.index_cast %198 : i32 to index
    %c0_61 = arith.constant 0 : index
    %200 = vector.load %arg12[%199, %c0_61] : memref<128x96xf32, #tpu.memory_space<vmem>>, vector<16x96xf32>
    %c0_62 = arith.constant 0 : index
    %c0_63 = arith.constant 0 : index
    %c0_64 = arith.constant 0 : index
    %201 = vector.load %arg5[%c0_62, %c0_63, %c0_64] : memref<2x32x96xf32, #tpu.memory_space<vmem>>, vector<1x32x96xf32>
    %202 = vector.shape_cast %201 : vector<1x32x96xf32> to vector<32x96xf32>
    %cst_65 = arith.constant dense<0.000000e+00> : vector<16x96xf32>
    %203 = tpu.matmul %194, %202, %cst_65 {dimension_numbers = #tpu.dot_dimension_numbers<[1], [0], [0], [1], [0, 0, 1, 1], [], []>} : vector<16x32xf32>, vector<32x96xf32>, vector<16x96xf32> -> vector<16x96xf32>
    %204 = vector.extract_strided_slice %200 {offsets = [0, 0], sizes = [16, 32], strides = [1, 1]} : vector<16x96xf32> to vector<16x32xf32>
    %205 = vector.extract_strided_slice %203 {offsets = [0, 0], sizes = [16, 32], strides = [1, 1]} : vector<16x96xf32> to vector<16x32xf32>
    %206 = arith.addf %204, %205 : vector<16x32xf32>
    %207 = arith.negf %206 : vector<16x32xf32>
    %208 = math.exp %207 : vector<16x32xf32>
    %cst_66 = arith.constant 1.000000e+00 : f32
    %209 = vector.broadcast %cst_66 : f32 to vector<16x32xf32>
    %210 = arith.addf %209, %208 : vector<16x32xf32>
    %211 = arith.divf %209, %210 : vector<16x32xf32>
    %212 = vector.extract_strided_slice %200 {offsets = [0, 32], sizes = [16, 32], strides = [1, 1]} : vector<16x96xf32> to vector<16x32xf32>
    %213 = vector.extract_strided_slice %203 {offsets = [0, 32], sizes = [16, 32], strides = [1, 1]} : vector<16x96xf32> to vector<16x32xf32>
    %214 = arith.addf %212, %213 : vector<16x32xf32>
    %215 = arith.negf %214 : vector<16x32xf32>
    %216 = math.exp %215 : vector<16x32xf32>
    %cst_67 = arith.constant 1.000000e+00 : f32
    %217 = vector.broadcast %cst_67 : f32 to vector<16x32xf32>
    %218 = arith.addf %217, %216 : vector<16x32xf32>
    %219 = arith.divf %217, %218 : vector<16x32xf32>
    %220 = vector.extract_strided_slice %200 {offsets = [0, 64], sizes = [16, 32], strides = [1, 1]} : vector<16x96xf32> to vector<16x32xf32>
    %221 = vector.extract_strided_slice %203 {offsets = [0, 64], sizes = [16, 32], strides = [1, 1]} : vector<16x96xf32> to vector<16x32xf32>
    %222 = vector.broadcast %3 : vector<1x32xf32> to vector<16x32xf32>
    %223 = arith.addf %221, %222 : vector<16x32xf32>
    %224 = arith.mulf %211, %223 : vector<16x32xf32>
    %225 = arith.addf %220, %224 : vector<16x32xf32>
    %226 = math.tanh %225 : vector<16x32xf32>
    %cst_68 = arith.constant 1.000000e+00 : f32
    %227 = vector.broadcast %cst_68 : f32 to vector<16x32xf32>
    %228 = arith.subf %227, %219 : vector<16x32xf32>
    %229 = arith.mulf %228, %226 : vector<16x32xf32>
    %230 = arith.mulf %219, %194 : vector<16x32xf32>
    %231 = arith.addf %229, %230 : vector<16x32xf32>
    %232 = arith.index_cast %198 : i32 to index
    %c0_69 = arith.constant 0 : index
    %233 = vector.load %arg13[%232, %c0_69] : memref<128x32xf32, #tpu.memory_space<vmem>>, vector<16x32xf32>
    tpu.vector_store %arg13[%232, %c0_69], %231 {strides = array<i32>} : memref<128x32xf32, #tpu.memory_space<vmem>>, vector<16x32xf32>,
    %c6_i32 = arith.constant 6 : i32
    %c16_i32_70 = arith.constant 16 : i32
    %234 = arith.muli %c6_i32, %c16_i32_70 : i32
    %235 = tpu.assume_multiple %234, 16 : i32
    %236 = arith.index_cast %235 : i32 to index
    %c0_71 = arith.constant 0 : index
    %237 = vector.load %arg12[%236, %c0_71] : memref<128x96xf32, #tpu.memory_space<vmem>>, vector<16x96xf32>
    %c0_72 = arith.constant 0 : index
    %c0_73 = arith.constant 0 : index
    %c0_74 = arith.constant 0 : index
    %238 = vector.load %arg5[%c0_72, %c0_73, %c0_74] : memref<2x32x96xf32, #tpu.memory_space<vmem>>, vector<1x32x96xf32>
    %239 = vector.shape_cast %238 : vector<1x32x96xf32> to vector<32x96xf32>
    %cst_75 = arith.constant dense<0.000000e+00> : vector<16x96xf32>
    %240 = tpu.matmul %231, %239, %cst_75 {dimension_numbers = #tpu.dot_dimension_numbers<[1], [0], [0], [1], [0, 0, 1, 1], [], []>} : vector<16x32xf32>, vector<32x96xf32>, vector<16x96xf32> -> vector<16x96xf32>
    %241 = vector.extract_strided_slice %237 {offsets = [0, 0], sizes = [16, 32], strides = [1, 1]} : vector<16x96xf32> to vector<16x32xf32>
    %242 = vector.extract_strided_slice %240 {offsets = [0, 0], sizes = [16, 32], strides = [1, 1]} : vector<16x96xf32> to vector<16x32xf32>
    %243 = arith.addf %241, %242 : vector<16x32xf32>
    %244 = arith.negf %243 : vector<16x32xf32>
    %245 = math.exp %244 : vector<16x32xf32>
    %cst_76 = arith.constant 1.000000e+00 : f32
    %246 = vector.broadcast %cst_76 : f32 to vector<16x32xf32>
    %247 = arith.addf %246, %245 : vector<16x32xf32>
    %248 = arith.divf %246, %247 : vector<16x32xf32>
    %249 = vector.extract_strided_slice %237 {offsets = [0, 32], sizes = [16, 32], strides = [1, 1]} : vector<16x96xf32> to vector<16x32xf32>
    %250 = vector.extract_strided_slice %240 {offsets = [0, 32], sizes = [16, 32], strides = [1, 1]} : vector<16x96xf32> to vector<16x32xf32>
    %251 = arith.addf %249, %250 : vector<16x32xf32>
    %252 = arith.negf %251 : vector<16x32xf32>
    %253 = math.exp %252 : vector<16x32xf32>
    %cst_77 = arith.constant 1.000000e+00 : f32
    %254 = vector.broadcast %cst_77 : f32 to vector<16x32xf32>
    %255 = arith.addf %254, %253 : vector<16x32xf32>
    %256 = arith.divf %254, %255 : vector<16x32xf32>
    %257 = vector.extract_strided_slice %237 {offsets = [0, 64], sizes = [16, 32], strides = [1, 1]} : vector<16x96xf32> to vector<16x32xf32>
    %258 = vector.extract_strided_slice %240 {offsets = [0, 64], sizes = [16, 32], strides = [1, 1]} : vector<16x96xf32> to vector<16x32xf32>
    %259 = vector.broadcast %3 : vector<1x32xf32> to vector<16x32xf32>
    %260 = arith.addf %258, %259 : vector<16x32xf32>
    %261 = arith.mulf %248, %260 : vector<16x32xf32>
    %262 = arith.addf %257, %261 : vector<16x32xf32>
    %263 = math.tanh %262 : vector<16x32xf32>
    %cst_78 = arith.constant 1.000000e+00 : f32
    %264 = vector.broadcast %cst_78 : f32 to vector<16x32xf32>
    %265 = arith.subf %264, %256 : vector<16x32xf32>
    %266 = arith.mulf %265, %263 : vector<16x32xf32>
    %267 = arith.mulf %256, %231 : vector<16x32xf32>
    %268 = arith.addf %266, %267 : vector<16x32xf32>
    %269 = arith.index_cast %235 : i32 to index
    %c0_79 = arith.constant 0 : index
    %270 = vector.load %arg13[%269, %c0_79] : memref<128x32xf32, #tpu.memory_space<vmem>>, vector<16x32xf32>
    tpu.vector_store %arg13[%269, %c0_79], %268 {strides = array<i32>} : memref<128x32xf32, #tpu.memory_space<vmem>>, vector<16x32xf32>,
    %c7_i32 = arith.constant 7 : i32
    %c16_i32_80 = arith.constant 16 : i32
    %271 = arith.muli %c7_i32, %c16_i32_80 : i32
    %272 = tpu.assume_multiple %271, 16 : i32
    %273 = arith.index_cast %272 : i32 to index
    %c0_81 = arith.constant 0 : index
    %274 = vector.load %arg12[%273, %c0_81] : memref<128x96xf32, #tpu.memory_space<vmem>>, vector<16x96xf32>
    %c0_82 = arith.constant 0 : index
    %c0_83 = arith.constant 0 : index
    %c0_84 = arith.constant 0 : index
    %275 = vector.load %arg5[%c0_82, %c0_83, %c0_84] : memref<2x32x96xf32, #tpu.memory_space<vmem>>, vector<1x32x96xf32>
    %276 = vector.shape_cast %275 : vector<1x32x96xf32> to vector<32x96xf32>
    %cst_85 = arith.constant dense<0.000000e+00> : vector<16x96xf32>
    %277 = tpu.matmul %268, %276, %cst_85 {dimension_numbers = #tpu.dot_dimension_numbers<[1], [0], [0], [1], [0, 0, 1, 1], [], []>} : vector<16x32xf32>, vector<32x96xf32>, vector<16x96xf32> -> vector<16x96xf32>
    %278 = vector.extract_strided_slice %274 {offsets = [0, 0], sizes = [16, 32], strides = [1, 1]} : vector<16x96xf32> to vector<16x32xf32>
    %279 = vector.extract_strided_slice %277 {offsets = [0, 0], sizes = [16, 32], strides = [1, 1]} : vector<16x96xf32> to vector<16x32xf32>
    %280 = arith.addf %278, %279 : vector<16x32xf32>
    %281 = arith.negf %280 : vector<16x32xf32>
    %282 = math.exp %281 : vector<16x32xf32>
    %cst_86 = arith.constant 1.000000e+00 : f32
    %283 = vector.broadcast %cst_86 : f32 to vector<16x32xf32>
    %284 = arith.addf %283, %282 : vector<16x32xf32>
    %285 = arith.divf %283, %284 : vector<16x32xf32>
    %286 = vector.extract_strided_slice %274 {offsets = [0, 32], sizes = [16, 32], strides = [1, 1]} : vector<16x96xf32> to vector<16x32xf32>
    %287 = vector.extract_strided_slice %277 {offsets = [0, 32], sizes = [16, 32], strides = [1, 1]} : vector<16x96xf32> to vector<16x32xf32>
    %288 = arith.addf %286, %287 : vector<16x32xf32>
    %289 = arith.negf %288 : vector<16x32xf32>
    %290 = math.exp %289 : vector<16x32xf32>
    %cst_87 = arith.constant 1.000000e+00 : f32
    %291 = vector.broadcast %cst_87 : f32 to vector<16x32xf32>
    %292 = arith.addf %291, %290 : vector<16x32xf32>
    %293 = arith.divf %291, %292 : vector<16x32xf32>
    %294 = vector.extract_strided_slice %274 {offsets = [0, 64], sizes = [16, 32], strides = [1, 1]} : vector<16x96xf32> to vector<16x32xf32>
    %295 = vector.extract_strided_slice %277 {offsets = [0, 64], sizes = [16, 32], strides = [1, 1]} : vector<16x96xf32> to vector<16x32xf32>
    %296 = vector.broadcast %3 : vector<1x32xf32> to vector<16x32xf32>
    %297 = arith.addf %295, %296 : vector<16x32xf32>
    %298 = arith.mulf %285, %297 : vector<16x32xf32>
    %299 = arith.addf %294, %298 : vector<16x32xf32>
    %300 = math.tanh %299 : vector<16x32xf32>
    %cst_88 = arith.constant 1.000000e+00 : f32
    %301 = vector.broadcast %cst_88 : f32 to vector<16x32xf32>
    %302 = arith.subf %301, %293 : vector<16x32xf32>
    %303 = arith.mulf %302, %300 : vector<16x32xf32>
    %304 = arith.mulf %293, %268 : vector<16x32xf32>
    %305 = arith.addf %303, %304 : vector<16x32xf32>
    %306 = arith.index_cast %272 : i32 to index
    %c0_89 = arith.constant 0 : index
    %307 = vector.load %arg13[%306, %c0_89] : memref<128x32xf32, #tpu.memory_space<vmem>>, vector<16x32xf32>
    tpu.vector_store %arg13[%306, %c0_89], %305 {strides = array<i32>} : memref<128x32xf32, #tpu.memory_space<vmem>>, vector<16x32xf32>,
    %c8_i32 = arith.constant 8 : i32
    %c0_90 = arith.constant 0 : index
    %c0_91 = arith.constant 0 : index
    %c0_92 = arith.constant 0 : index
    %308 = vector.load %arg11[%c0_90, %c0_91, %c0_92] : memref<2x16x32xf32, #tpu.memory_space<vmem>>, vector<1x16x32xf32>
    %309 = vector.shape_cast %308 : vector<1x16x32xf32> to vector<16x32xf32>
    %310 = vector.shape_cast %305 : vector<16x32xf32> to vector<1x16x32xf32>
    tpu.vector_store %arg11[%c0_90, %c0_91, %c0_92], %310 {strides = array<i32>} : memref<2x16x32xf32, #tpu.memory_space<vmem>>, vector<1x16x32xf32>,
    %c1 = arith.constant 1 : index
    %c0_93 = arith.constant 0 : index
    %311 = vector.load %arg6[%c1, %c0_93] : memref<2x96xf32, #tpu.memory_space<vmem>>, vector<1x96xf32>
    %c1_94 = arith.constant 1 : index
    %c0_95 = arith.constant 0 : index
    %312 = vector.load %arg7[%c1_94, %c0_95] : memref<2x32xf32, #tpu.memory_space<vmem>>, vector<1x32xf32>
    %c0_96 = arith.constant 0 : index
    %c0_97 = arith.constant 0 : index
    %313 = vector.load %arg13[%c0_96, %c0_97] : memref<128x32xf32, #tpu.memory_space<vmem>>, vector<128x32xf32>
    %c0_98 = arith.constant 0 : index
    %c0_99 = arith.constant 0 : index
    %c0_100 = arith.constant 0 : index
    %314 = vector.load %arg4[%c0_98, %c0_99, %c0_100] : memref<1x32x96xf32, #tpu.memory_space<vmem>>, vector<1x32x96xf32>
    %315 = vector.shape_cast %314 : vector<1x32x96xf32> to vector<32x96xf32>
    %cst_101 = arith.constant dense<0.000000e+00> : vector<128x96xf32>
    %316 = tpu.matmul %313, %315, %cst_101 {dimension_numbers = #tpu.dot_dimension_numbers<[1], [0], [0], [1], [0, 0, 1, 1], [], []>} : vector<128x32xf32>, vector<32x96xf32>, vector<128x96xf32> -> vector<128x96xf32>
    %317 = vector.broadcast %311 : vector<1x96xf32> to vector<128x96xf32>
    %318 = arith.addf %316, %317 : vector<128x96xf32>
    %c0_102 = arith.constant 0 : index
    %c0_103 = arith.constant 0 : index
    %319 = vector.load %arg12[%c0_102, %c0_103] : memref<128x96xf32, #tpu.memory_space<vmem>>, vector<128x96xf32>
    tpu.vector_store %arg12[%c0_102, %c0_103], %318 {strides = array<i32>} : memref<128x96xf32, #tpu.memory_space<vmem>>, vector<128x96xf32>,
    %c1_104 = arith.constant 1 : index
    %c0_105 = arith.constant 0 : index
    %c0_106 = arith.constant 0 : index
    %320 = vector.load %arg2[%c1_104, %c0_105, %c0_106] : memref<2x16x32xf32, #tpu.memory_space<vmem>>, vector<1x16x32xf32>
    %321 = vector.shape_cast %320 : vector<1x16x32xf32> to vector<16x32xf32>
    %c0_i32_107 = arith.constant 0 : i32
    %c16_i32_108 = arith.constant 16 : i32
    %322 = arith.muli %c0_i32_107, %c16_i32_108 : i32
    %323 = tpu.assume_multiple %322, 16 : i32
    %324 = arith.index_cast %323 : i32 to index
    %c0_109 = arith.constant 0 : index
    %325 = vector.load %arg12[%324, %c0_109] : memref<128x96xf32, #tpu.memory_space<vmem>>, vector<16x96xf32>
    %c1_110 = arith.constant 1 : index
    %c0_111 = arith.constant 0 : index
    %c0_112 = arith.constant 0 : index
    %326 = vector.load %arg5[%c1_110, %c0_111, %c0_112] : memref<2x32x96xf32, #tpu.memory_space<vmem>>, vector<1x32x96xf32>
    %327 = vector.shape_cast %326 : vector<1x32x96xf32> to vector<32x96xf32>
    %cst_113 = arith.constant dense<0.000000e+00> : vector<16x96xf32>
    %328 = tpu.matmul %321, %327, %cst_113 {dimension_numbers = #tpu.dot_dimension_numbers<[1], [0], [0], [1], [0, 0, 1, 1], [], []>} : vector<16x32xf32>, vector<32x96xf32>, vector<16x96xf32> -> vector<16x96xf32>
    %329 = vector.extract_strided_slice %325 {offsets = [0, 0], sizes = [16, 32], strides = [1, 1]} : vector<16x96xf32> to vector<16x32xf32>
    %330 = vector.extract_strided_slice %328 {offsets = [0, 0], sizes = [16, 32], strides = [1, 1]} : vector<16x96xf32> to vector<16x32xf32>
    %331 = arith.addf %329, %330 : vector<16x32xf32>
    %332 = arith.negf %331 : vector<16x32xf32>
    %333 = math.exp %332 : vector<16x32xf32>
    %cst_114 = arith.constant 1.000000e+00 : f32
    %334 = vector.broadcast %cst_114 : f32 to vector<16x32xf32>
    %335 = arith.addf %334, %333 : vector<16x32xf32>
    %336 = arith.divf %334, %335 : vector<16x32xf32>
    %337 = vector.extract_strided_slice %325 {offsets = [0, 32], sizes = [16, 32], strides = [1, 1]} : vector<16x96xf32> to vector<16x32xf32>
    %338 = vector.extract_strided_slice %328 {offsets = [0, 32], sizes = [16, 32], strides = [1, 1]} : vector<16x96xf32> to vector<16x32xf32>
    %339 = arith.addf %337, %338 : vector<16x32xf32>
    %340 = arith.negf %339 : vector<16x32xf32>
    %341 = math.exp %340 : vector<16x32xf32>
    %cst_115 = arith.constant 1.000000e+00 : f32
    %342 = vector.broadcast %cst_115 : f32 to vector<16x32xf32>
    %343 = arith.addf %342, %341 : vector<16x32xf32>
    %344 = arith.divf %342, %343 : vector<16x32xf32>
    %345 = vector.extract_strided_slice %325 {offsets = [0, 64], sizes = [16, 32], strides = [1, 1]} : vector<16x96xf32> to vector<16x32xf32>
    %346 = vector.extract_strided_slice %328 {offsets = [0, 64], sizes = [16, 32], strides = [1, 1]} : vector<16x96xf32> to vector<16x32xf32>
    %347 = vector.broadcast %312 : vector<1x32xf32> to vector<16x32xf32>
    %348 = arith.addf %346, %347 : vector<16x32xf32>
    %349 = arith.mulf %336, %348 : vector<16x32xf32>
    %350 = arith.addf %345, %349 : vector<16x32xf32>
    %351 = math.tanh %350 : vector<16x32xf32>
    %cst_116 = arith.constant 1.000000e+00 : f32
    %352 = vector.broadcast %cst_116 : f32 to vector<16x32xf32>
    %353 = arith.subf %352, %344 : vector<16x32xf32>
    %354 = arith.mulf %353, %351 : vector<16x32xf32>
    %355 = arith.mulf %344, %321 : vector<16x32xf32>
    %356 = arith.addf %354, %355 : vector<16x32xf32>
    %357 = arith.index_cast %323 : i32 to index
    %c0_117 = arith.constant 0 : index
    %358 = vector.load %arg13[%357, %c0_117] : memref<128x32xf32, #tpu.memory_space<vmem>>, vector<16x32xf32>
    tpu.vector_store %arg13[%357, %c0_117], %356 {strides = array<i32>} : memref<128x32xf32, #tpu.memory_space<vmem>>, vector<16x32xf32>,
    %c1_i32_118 = arith.constant 1 : i32
    %c16_i32_119 = arith.constant 16 : i32
    %359 = arith.muli %c1_i32_118, %c16_i32_119 : i32
    %360 = tpu.assume_multiple %359, 16 : i32
    %361 = arith.index_cast %360 : i32 to index
    %c0_120 = arith.constant 0 : index
    %362 = vector.load %arg12[%361, %c0_120] : memref<128x96xf32, #tpu.memory_space<vmem>>, vector<16x96xf32>
    %c1_121 = arith.constant 1 : index
    %c0_122 = arith.constant 0 : index
    %c0_123 = arith.constant 0 : index
    %363 = vector.load %arg5[%c1_121, %c0_122, %c0_123] : memref<2x32x96xf32, #tpu.memory_space<vmem>>, vector<1x32x96xf32>
    %364 = vector.shape_cast %363 : vector<1x32x96xf32> to vector<32x96xf32>
    %cst_124 = arith.constant dense<0.000000e+00> : vector<16x96xf32>
    %365 = tpu.matmul %356, %364, %cst_124 {dimension_numbers = #tpu.dot_dimension_numbers<[1], [0], [0], [1], [0, 0, 1, 1], [], []>} : vector<16x32xf32>, vector<32x96xf32>, vector<16x96xf32> -> vector<16x96xf32>
    %366 = vector.extract_strided_slice %362 {offsets = [0, 0], sizes = [16, 32], strides = [1, 1]} : vector<16x96xf32> to vector<16x32xf32>
    %367 = vector.extract_strided_slice %365 {offsets = [0, 0], sizes = [16, 32], strides = [1, 1]} : vector<16x96xf32> to vector<16x32xf32>
    %368 = arith.addf %366, %367 : vector<16x32xf32>
    %369 = arith.negf %368 : vector<16x32xf32>
    %370 = math.exp %369 : vector<16x32xf32>
    %cst_125 = arith.constant 1.000000e+00 : f32
    %371 = vector.broadcast %cst_125 : f32 to vector<16x32xf32>
    %372 = arith.addf %371, %370 : vector<16x32xf32>
    %373 = arith.divf %371, %372 : vector<16x32xf32>
    %374 = vector.extract_strided_slice %362 {offsets = [0, 32], sizes = [16, 32], strides = [1, 1]} : vector<16x96xf32> to vector<16x32xf32>
    %375 = vector.extract_strided_slice %365 {offsets = [0, 32], sizes = [16, 32], strides = [1, 1]} : vector<16x96xf32> to vector<16x32xf32>
    %376 = arith.addf %374, %375 : vector<16x32xf32>
    %377 = arith.negf %376 : vector<16x32xf32>
    %378 = math.exp %377 : vector<16x32xf32>
    %cst_126 = arith.constant 1.000000e+00 : f32
    %379 = vector.broadcast %cst_126 : f32 to vector<16x32xf32>
    %380 = arith.addf %379, %378 : vector<16x32xf32>
    %381 = arith.divf %379, %380 : vector<16x32xf32>
    %382 = vector.extract_strided_slice %362 {offsets = [0, 64], sizes = [16, 32], strides = [1, 1]} : vector<16x96xf32> to vector<16x32xf32>
    %383 = vector.extract_strided_slice %365 {offsets = [0, 64], sizes = [16, 32], strides = [1, 1]} : vector<16x96xf32> to vector<16x32xf32>
    %384 = vector.broadcast %312 : vector<1x32xf32> to vector<16x32xf32>
    %385 = arith.addf %383, %384 : vector<16x32xf32>
    %386 = arith.mulf %373, %385 : vector<16x32xf32>
    %387 = arith.addf %382, %386 : vector<16x32xf32>
    %388 = math.tanh %387 : vector<16x32xf32>
    %cst_127 = arith.constant 1.000000e+00 : f32
    %389 = vector.broadcast %cst_127 : f32 to vector<16x32xf32>
    %390 = arith.subf %389, %381 : vector<16x32xf32>
    %391 = arith.mulf %390, %388 : vector<16x32xf32>
    %392 = arith.mulf %381, %356 : vector<16x32xf32>
    %393 = arith.addf %391, %392 : vector<16x32xf32>
    %394 = arith.index_cast %360 : i32 to index
    %c0_128 = arith.constant 0 : index
    %395 = vector.load %arg13[%394, %c0_128] : memref<128x32xf32, #tpu.memory_space<vmem>>, vector<16x32xf32>
    tpu.vector_store %arg13[%394, %c0_128], %393 {strides = array<i32>} : memref<128x32xf32, #tpu.memory_space<vmem>>, vector<16x32xf32>,
    %c2_i32_129 = arith.constant 2 : i32
    %c16_i32_130 = arith.constant 16 : i32
    %396 = arith.muli %c2_i32_129, %c16_i32_130 : i32
    %397 = tpu.assume_multiple %396, 16 : i32
    %398 = arith.index_cast %397 : i32 to index
    %c0_131 = arith.constant 0 : index
    %399 = vector.load %arg12[%398, %c0_131] : memref<128x96xf32, #tpu.memory_space<vmem>>, vector<16x96xf32>
    %c1_132 = arith.constant 1 : index
    %c0_133 = arith.constant 0 : index
    %c0_134 = arith.constant 0 : index
    %400 = vector.load %arg5[%c1_132, %c0_133, %c0_134] : memref<2x32x96xf32, #tpu.memory_space<vmem>>, vector<1x32x96xf32>
    %401 = vector.shape_cast %400 : vector<1x32x96xf32> to vector<32x96xf32>
    %cst_135 = arith.constant dense<0.000000e+00> : vector<16x96xf32>
    %402 = tpu.matmul %393, %401, %cst_135 {dimension_numbers = #tpu.dot_dimension_numbers<[1], [0], [0], [1], [0, 0, 1, 1], [], []>} : vector<16x32xf32>, vector<32x96xf32>, vector<16x96xf32> -> vector<16x96xf32>
    %403 = vector.extract_strided_slice %399 {offsets = [0, 0], sizes = [16, 32], strides = [1, 1]} : vector<16x96xf32> to vector<16x32xf32>
    %404 = vector.extract_strided_slice %402 {offsets = [0, 0], sizes = [16, 32], strides = [1, 1]} : vector<16x96xf32> to vector<16x32xf32>
    %405 = arith.addf %403, %404 : vector<16x32xf32>
    %406 = arith.negf %405 : vector<16x32xf32>
    %407 = math.exp %406 : vector<16x32xf32>
    %cst_136 = arith.constant 1.000000e+00 : f32
    %408 = vector.broadcast %cst_136 : f32 to vector<16x32xf32>
    %409 = arith.addf %408, %407 : vector<16x32xf32>
    %410 = arith.divf %408, %409 : vector<16x32xf32>
    %411 = vector.extract_strided_slice %399 {offsets = [0, 32], sizes = [16, 32], strides = [1, 1]} : vector<16x96xf32> to vector<16x32xf32>
    %412 = vector.extract_strided_slice %402 {offsets = [0, 32], sizes = [16, 32], strides = [1, 1]} : vector<16x96xf32> to vector<16x32xf32>
    %413 = arith.addf %411, %412 : vector<16x32xf32>
    %414 = arith.negf %413 : vector<16x32xf32>
    %415 = math.exp %414 : vector<16x32xf32>
    %cst_137 = arith.constant 1.000000e+00 : f32
    %416 = vector.broadcast %cst_137 : f32 to vector<16x32xf32>
    %417 = arith.addf %416, %415 : vector<16x32xf32>
    %418 = arith.divf %416, %417 : vector<16x32xf32>
    %419 = vector.extract_strided_slice %399 {offsets = [0, 64], sizes = [16, 32], strides = [1, 1]} : vector<16x96xf32> to vector<16x32xf32>
    %420 = vector.extract_strided_slice %402 {offsets = [0, 64], sizes = [16, 32], strides = [1, 1]} : vector<16x96xf32> to vector<16x32xf32>
    %421 = vector.broadcast %312 : vector<1x32xf32> to vector<16x32xf32>
    %422 = arith.addf %420, %421 : vector<16x32xf32>
    %423 = arith.mulf %410, %422 : vector<16x32xf32>
    %424 = arith.addf %419, %423 : vector<16x32xf32>
    %425 = math.tanh %424 : vector<16x32xf32>
    %cst_138 = arith.constant 1.000000e+00 : f32
    %426 = vector.broadcast %cst_138 : f32 to vector<16x32xf32>
    %427 = arith.subf %426, %418 : vector<16x32xf32>
    %428 = arith.mulf %427, %425 : vector<16x32xf32>
    %429 = arith.mulf %418, %393 : vector<16x32xf32>
    %430 = arith.addf %428, %429 : vector<16x32xf32>
    %431 = arith.index_cast %397 : i32 to index
    %c0_139 = arith.constant 0 : index
    %432 = vector.load %arg13[%431, %c0_139] : memref<128x32xf32, #tpu.memory_space<vmem>>, vector<16x32xf32>
    tpu.vector_store %arg13[%431, %c0_139], %430 {strides = array<i32>} : memref<128x32xf32, #tpu.memory_space<vmem>>, vector<16x32xf32>,
    %c3_i32_140 = arith.constant 3 : i32
    %c16_i32_141 = arith.constant 16 : i32
    %433 = arith.muli %c3_i32_140, %c16_i32_141 : i32
    %434 = tpu.assume_multiple %433, 16 : i32
    %435 = arith.index_cast %434 : i32 to index
    %c0_142 = arith.constant 0 : index
    %436 = vector.load %arg12[%435, %c0_142] : memref<128x96xf32, #tpu.memory_space<vmem>>, vector<16x96xf32>
    %c1_143 = arith.constant 1 : index
    %c0_144 = arith.constant 0 : index
    %c0_145 = arith.constant 0 : index
    %437 = vector.load %arg5[%c1_143, %c0_144, %c0_145] : memref<2x32x96xf32, #tpu.memory_space<vmem>>, vector<1x32x96xf32>
    %438 = vector.shape_cast %437 : vector<1x32x96xf32> to vector<32x96xf32>
    %cst_146 = arith.constant dense<0.000000e+00> : vector<16x96xf32>
    %439 = tpu.matmul %430, %438, %cst_146 {dimension_numbers = #tpu.dot_dimension_numbers<[1], [0], [0], [1], [0, 0, 1, 1], [], []>} : vector<16x32xf32>, vector<32x96xf32>, vector<16x96xf32> -> vector<16x96xf32>
    %440 = vector.extract_strided_slice %436 {offsets = [0, 0], sizes = [16, 32], strides = [1, 1]} : vector<16x96xf32> to vector<16x32xf32>
    %441 = vector.extract_strided_slice %439 {offsets = [0, 0], sizes = [16, 32], strides = [1, 1]} : vector<16x96xf32> to vector<16x32xf32>
    %442 = arith.addf %440, %441 : vector<16x32xf32>
    %443 = arith.negf %442 : vector<16x32xf32>
    %444 = math.exp %443 : vector<16x32xf32>
    %cst_147 = arith.constant 1.000000e+00 : f32
    %445 = vector.broadcast %cst_147 : f32 to vector<16x32xf32>
    %446 = arith.addf %445, %444 : vector<16x32xf32>
    %447 = arith.divf %445, %446 : vector<16x32xf32>
    %448 = vector.extract_strided_slice %436 {offsets = [0, 32], sizes = [16, 32], strides = [1, 1]} : vector<16x96xf32> to vector<16x32xf32>
    %449 = vector.extract_strided_slice %439 {offsets = [0, 32], sizes = [16, 32], strides = [1, 1]} : vector<16x96xf32> to vector<16x32xf32>
    %450 = arith.addf %448, %449 : vector<16x32xf32>
    %451 = arith.negf %450 : vector<16x32xf32>
    %452 = math.exp %451 : vector<16x32xf32>
    %cst_148 = arith.constant 1.000000e+00 : f32
    %453 = vector.broadcast %cst_148 : f32 to vector<16x32xf32>
    %454 = arith.addf %453, %452 : vector<16x32xf32>
    %455 = arith.divf %453, %454 : vector<16x32xf32>
    %456 = vector.extract_strided_slice %436 {offsets = [0, 64], sizes = [16, 32], strides = [1, 1]} : vector<16x96xf32> to vector<16x32xf32>
    %457 = vector.extract_strided_slice %439 {offsets = [0, 64], sizes = [16, 32], strides = [1, 1]} : vector<16x96xf32> to vector<16x32xf32>
    %458 = vector.broadcast %312 : vector<1x32xf32> to vector<16x32xf32>
    %459 = arith.addf %457, %458 : vector<16x32xf32>
    %460 = arith.mulf %447, %459 : vector<16x32xf32>
    %461 = arith.addf %456, %460 : vector<16x32xf32>
    %462 = math.tanh %461 : vector<16x32xf32>
    %cst_149 = arith.constant 1.000000e+00 : f32
    %463 = vector.broadcast %cst_149 : f32 to vector<16x32xf32>
    %464 = arith.subf %463, %455 : vector<16x32xf32>
    %465 = arith.mulf %464, %462 : vector<16x32xf32>
    %466 = arith.mulf %455, %430 : vector<16x32xf32>
    %467 = arith.addf %465, %466 : vector<16x32xf32>
    %468 = arith.index_cast %434 : i32 to index
    %c0_150 = arith.constant 0 : index
    %469 = vector.load %arg13[%468, %c0_150] : memref<128x32xf32, #tpu.memory_space<vmem>>, vector<16x32xf32>
    tpu.vector_store %arg13[%468, %c0_150], %467 {strides = array<i32>} : memref<128x32xf32, #tpu.memory_space<vmem>>, vector<16x32xf32>,
    %c4_i32_151 = arith.constant 4 : i32
    %c16_i32_152 = arith.constant 16 : i32
    %470 = arith.muli %c4_i32_151, %c16_i32_152 : i32
    %471 = tpu.assume_multiple %470, 16 : i32
    %472 = arith.index_cast %471 : i32 to index
    %c0_153 = arith.constant 0 : index
    %473 = vector.load %arg12[%472, %c0_153] : memref<128x96xf32, #tpu.memory_space<vmem>>, vector<16x96xf32>
    %c1_154 = arith.constant 1 : index
    %c0_155 = arith.constant 0 : index
    %c0_156 = arith.constant 0 : index
    %474 = vector.load %arg5[%c1_154, %c0_155, %c0_156] : memref<2x32x96xf32, #tpu.memory_space<vmem>>, vector<1x32x96xf32>
    %475 = vector.shape_cast %474 : vector<1x32x96xf32> to vector<32x96xf32>
    %cst_157 = arith.constant dense<0.000000e+00> : vector<16x96xf32>
    %476 = tpu.matmul %467, %475, %cst_157 {dimension_numbers = #tpu.dot_dimension_numbers<[1], [0], [0], [1], [0, 0, 1, 1], [], []>} : vector<16x32xf32>, vector<32x96xf32>, vector<16x96xf32> -> vector<16x96xf32>
    %477 = vector.extract_strided_slice %473 {offsets = [0, 0], sizes = [16, 32], strides = [1, 1]} : vector<16x96xf32> to vector<16x32xf32>
    %478 = vector.extract_strided_slice %476 {offsets = [0, 0], sizes = [16, 32], strides = [1, 1]} : vector<16x96xf32> to vector<16x32xf32>
    %479 = arith.addf %477, %478 : vector<16x32xf32>
    %480 = arith.negf %479 : vector<16x32xf32>
    %481 = math.exp %480 : vector<16x32xf32>
    %cst_158 = arith.constant 1.000000e+00 : f32
    %482 = vector.broadcast %cst_158 : f32 to vector<16x32xf32>
    %483 = arith.addf %482, %481 : vector<16x32xf32>
    %484 = arith.divf %482, %483 : vector<16x32xf32>
    %485 = vector.extract_strided_slice %473 {offsets = [0, 32], sizes = [16, 32], strides = [1, 1]} : vector<16x96xf32> to vector<16x32xf32>
    %486 = vector.extract_strided_slice %476 {offsets = [0, 32], sizes = [16, 32], strides = [1, 1]} : vector<16x96xf32> to vector<16x32xf32>
    %487 = arith.addf %485, %486 : vector<16x32xf32>
    %488 = arith.negf %487 : vector<16x32xf32>
    %489 = math.exp %488 : vector<16x32xf32>
    %cst_159 = arith.constant 1.000000e+00 : f32
    %490 = vector.broadcast %cst_159 : f32 to vector<16x32xf32>
    %491 = arith.addf %490, %489 : vector<16x32xf32>
    %492 = arith.divf %490, %491 : vector<16x32xf32>
    %493 = vector.extract_strided_slice %473 {offsets = [0, 64], sizes = [16, 32], strides = [1, 1]} : vector<16x96xf32> to vector<16x32xf32>
    %494 = vector.extract_strided_slice %476 {offsets = [0, 64], sizes = [16, 32], strides = [1, 1]} : vector<16x96xf32> to vector<16x32xf32>
    %495 = vector.broadcast %312 : vector<1x32xf32> to vector<16x32xf32>
    %496 = arith.addf %494, %495 : vector<16x32xf32>
    %497 = arith.mulf %484, %496 : vector<16x32xf32>
    %498 = arith.addf %493, %497 : vector<16x32xf32>
    %499 = math.tanh %498 : vector<16x32xf32>
    %cst_160 = arith.constant 1.000000e+00 : f32
    %500 = vector.broadcast %cst_160 : f32 to vector<16x32xf32>
    %501 = arith.subf %500, %492 : vector<16x32xf32>
    %502 = arith.mulf %501, %499 : vector<16x32xf32>
    %503 = arith.mulf %492, %467 : vector<16x32xf32>
    %504 = arith.addf %502, %503 : vector<16x32xf32>
    %505 = arith.index_cast %471 : i32 to index
    %c0_161 = arith.constant 0 : index
    %506 = vector.load %arg13[%505, %c0_161] : memref<128x32xf32, #tpu.memory_space<vmem>>, vector<16x32xf32>
    tpu.vector_store %arg13[%505, %c0_161], %504 {strides = array<i32>} : memref<128x32xf32, #tpu.memory_space<vmem>>, vector<16x32xf32>,
    %c5_i32_162 = arith.constant 5 : i32
    %c16_i32_163 = arith.constant 16 : i32
    %507 = arith.muli %c5_i32_162, %c16_i32_163 : i32
    %508 = tpu.assume_multiple %507, 16 : i32
    %509 = arith.index_cast %508 : i32 to index
    %c0_164 = arith.constant 0 : index
    %510 = vector.load %arg12[%509, %c0_164] : memref<128x96xf32, #tpu.memory_space<vmem>>, vector<16x96xf32>
    %c1_165 = arith.constant 1 : index
    %c0_166 = arith.constant 0 : index
    %c0_167 = arith.constant 0 : index
    %511 = vector.load %arg5[%c1_165, %c0_166, %c0_167] : memref<2x32x96xf32, #tpu.memory_space<vmem>>, vector<1x32x96xf32>
    %512 = vector.shape_cast %511 : vector<1x32x96xf32> to vector<32x96xf32>
    %cst_168 = arith.constant dense<0.000000e+00> : vector<16x96xf32>
    %513 = tpu.matmul %504, %512, %cst_168 {dimension_numbers = #tpu.dot_dimension_numbers<[1], [0], [0], [1], [0, 0, 1, 1], [], []>} : vector<16x32xf32>, vector<32x96xf32>, vector<16x96xf32> -> vector<16x96xf32>
    %514 = vector.extract_strided_slice %510 {offsets = [0, 0], sizes = [16, 32], strides = [1, 1]} : vector<16x96xf32> to vector<16x32xf32>
    %515 = vector.extract_strided_slice %513 {offsets = [0, 0], sizes = [16, 32], strides = [1, 1]} : vector<16x96xf32> to vector<16x32xf32>
    %516 = arith.addf %514, %515 : vector<16x32xf32>
    %517 = arith.negf %516 : vector<16x32xf32>
    %518 = math.exp %517 : vector<16x32xf32>
    %cst_169 = arith.constant 1.000000e+00 : f32
    %519 = vector.broadcast %cst_169 : f32 to vector<16x32xf32>
    %520 = arith.addf %519, %518 : vector<16x32xf32>
    %521 = arith.divf %519, %520 : vector<16x32xf32>
    %522 = vector.extract_strided_slice %510 {offsets = [0, 32], sizes = [16, 32], strides = [1, 1]} : vector<16x96xf32> to vector<16x32xf32>
    %523 = vector.extract_strided_slice %513 {offsets = [0, 32], sizes = [16, 32], strides = [1, 1]} : vector<16x96xf32> to vector<16x32xf32>
    %524 = arith.addf %522, %523 : vector<16x32xf32>
    %525 = arith.negf %524 : vector<16x32xf32>
    %526 = math.exp %525 : vector<16x32xf32>
    %cst_170 = arith.constant 1.000000e+00 : f32
    %527 = vector.broadcast %cst_170 : f32 to vector<16x32xf32>
    %528 = arith.addf %527, %526 : vector<16x32xf32>
    %529 = arith.divf %527, %528 : vector<16x32xf32>
    %530 = vector.extract_strided_slice %510 {offsets = [0, 64], sizes = [16, 32], strides = [1, 1]} : vector<16x96xf32> to vector<16x32xf32>
    %531 = vector.extract_strided_slice %513 {offsets = [0, 64], sizes = [16, 32], strides = [1, 1]} : vector<16x96xf32> to vector<16x32xf32>
    %532 = vector.broadcast %312 : vector<1x32xf32> to vector<16x32xf32>
    %533 = arith.addf %531, %532 : vector<16x32xf32>
    %534 = arith.mulf %521, %533 : vector<16x32xf32>
    %535 = arith.addf %530, %534 : vector<16x32xf32>
    %536 = math.tanh %535 : vector<16x32xf32>
    %cst_171 = arith.constant 1.000000e+00 : f32
    %537 = vector.broadcast %cst_171 : f32 to vector<16x32xf32>
    %538 = arith.subf %537, %529 : vector<16x32xf32>
    %539 = arith.mulf %538, %536 : vector<16x32xf32>
    %540 = arith.mulf %529, %504 : vector<16x32xf32>
    %541 = arith.addf %539, %540 : vector<16x32xf32>
    %542 = arith.index_cast %508 : i32 to index
    %c0_172 = arith.constant 0 : index
    %543 = vector.load %arg13[%542, %c0_172] : memref<128x32xf32, #tpu.memory_space<vmem>>, vector<16x32xf32>
    tpu.vector_store %arg13[%542, %c0_172], %541 {strides = array<i32>} : memref<128x32xf32, #tpu.memory_space<vmem>>, vector<16x32xf32>,
    %c6_i32_173 = arith.constant 6 : i32
    %c16_i32_174 = arith.constant 16 : i32
    %544 = arith.muli %c6_i32_173, %c16_i32_174 : i32
    %545 = tpu.assume_multiple %544, 16 : i32
    %546 = arith.index_cast %545 : i32 to index
    %c0_175 = arith.constant 0 : index
    %547 = vector.load %arg12[%546, %c0_175] : memref<128x96xf32, #tpu.memory_space<vmem>>, vector<16x96xf32>
    %c1_176 = arith.constant 1 : index
    %c0_177 = arith.constant 0 : index
    %c0_178 = arith.constant 0 : index
    %548 = vector.load %arg5[%c1_176, %c0_177, %c0_178] : memref<2x32x96xf32, #tpu.memory_space<vmem>>, vector<1x32x96xf32>
    %549 = vector.shape_cast %548 : vector<1x32x96xf32> to vector<32x96xf32>
    %cst_179 = arith.constant dense<0.000000e+00> : vector<16x96xf32>
    %550 = tpu.matmul %541, %549, %cst_179 {dimension_numbers = #tpu.dot_dimension_numbers<[1], [0], [0], [1], [0, 0, 1, 1], [], []>} : vector<16x32xf32>, vector<32x96xf32>, vector<16x96xf32> -> vector<16x96xf32>
    %551 = vector.extract_strided_slice %547 {offsets = [0, 0], sizes = [16, 32], strides = [1, 1]} : vector<16x96xf32> to vector<16x32xf32>
    %552 = vector.extract_strided_slice %550 {offsets = [0, 0], sizes = [16, 32], strides = [1, 1]} : vector<16x96xf32> to vector<16x32xf32>
    %553 = arith.addf %551, %552 : vector<16x32xf32>
    %554 = arith.negf %553 : vector<16x32xf32>
    %555 = math.exp %554 : vector<16x32xf32>
    %cst_180 = arith.constant 1.000000e+00 : f32
    %556 = vector.broadcast %cst_180 : f32 to vector<16x32xf32>
    %557 = arith.addf %556, %555 : vector<16x32xf32>
    %558 = arith.divf %556, %557 : vector<16x32xf32>
    %559 = vector.extract_strided_slice %547 {offsets = [0, 32], sizes = [16, 32], strides = [1, 1]} : vector<16x96xf32> to vector<16x32xf32>
    %560 = vector.extract_strided_slice %550 {offsets = [0, 32], sizes = [16, 32], strides = [1, 1]} : vector<16x96xf32> to vector<16x32xf32>
    %561 = arith.addf %559, %560 : vector<16x32xf32>
    %562 = arith.negf %561 : vector<16x32xf32>
    %563 = math.exp %562 : vector<16x32xf32>
    %cst_181 = arith.constant 1.000000e+00 : f32
    %564 = vector.broadcast %cst_181 : f32 to vector<16x32xf32>
    %565 = arith.addf %564, %563 : vector<16x32xf32>
    %566 = arith.divf %564, %565 : vector<16x32xf32>
    %567 = vector.extract_strided_slice %547 {offsets = [0, 64], sizes = [16, 32], strides = [1, 1]} : vector<16x96xf32> to vector<16x32xf32>
    %568 = vector.extract_strided_slice %550 {offsets = [0, 64], sizes = [16, 32], strides = [1, 1]} : vector<16x96xf32> to vector<16x32xf32>
    %569 = vector.broadcast %312 : vector<1x32xf32> to vector<16x32xf32>
    %570 = arith.addf %568, %569 : vector<16x32xf32>
    %571 = arith.mulf %558, %570 : vector<16x32xf32>
    %572 = arith.addf %567, %571 : vector<16x32xf32>
    %573 = math.tanh %572 : vector<16x32xf32>
    %cst_182 = arith.constant 1.000000e+00 : f32
    %574 = vector.broadcast %cst_182 : f32 to vector<16x32xf32>
    %575 = arith.subf %574, %566 : vector<16x32xf32>
    %576 = arith.mulf %575, %573 : vector<16x32xf32>
    %577 = arith.mulf %566, %541 : vector<16x32xf32>
    %578 = arith.addf %576, %577 : vector<16x32xf32>
    %579 = arith.index_cast %545 : i32 to index
    %c0_183 = arith.constant 0 : index
    %580 = vector.load %arg13[%579, %c0_183] : memref<128x32xf32, #tpu.memory_space<vmem>>, vector<16x32xf32>
    tpu.vector_store %arg13[%579, %c0_183], %578 {strides = array<i32>} : memref<128x32xf32, #tpu.memory_space<vmem>>, vector<16x32xf32>,
    %c7_i32_184 = arith.constant 7 : i32
    %c16_i32_185 = arith.constant 16 : i32
    %581 = arith.muli %c7_i32_184, %c16_i32_185 : i32
    %582 = tpu.assume_multiple %581, 16 : i32
    %583 = arith.index_cast %582 : i32 to index
    %c0_186 = arith.constant 0 : index
    %584 = vector.load %arg12[%583, %c0_186] : memref<128x96xf32, #tpu.memory_space<vmem>>, vector<16x96xf32>
    %c1_187 = arith.constant 1 : index
    %c0_188 = arith.constant 0 : index
    %c0_189 = arith.constant 0 : index
    %585 = vector.load %arg5[%c1_187, %c0_188, %c0_189] : memref<2x32x96xf32, #tpu.memory_space<vmem>>, vector<1x32x96xf32>
    %586 = vector.shape_cast %585 : vector<1x32x96xf32> to vector<32x96xf32>
    %cst_190 = arith.constant dense<0.000000e+00> : vector<16x96xf32>
    %587 = tpu.matmul %578, %586, %cst_190 {dimension_numbers = #tpu.dot_dimension_numbers<[1], [0], [0], [1], [0, 0, 1, 1], [], []>} : vector<16x32xf32>, vector<32x96xf32>, vector<16x96xf32> -> vector<16x96xf32>
    %588 = vector.extract_strided_slice %584 {offsets = [0, 0], sizes = [16, 32], strides = [1, 1]} : vector<16x96xf32> to vector<16x32xf32>
    %589 = vector.extract_strided_slice %587 {offsets = [0, 0], sizes = [16, 32], strides = [1, 1]} : vector<16x96xf32> to vector<16x32xf32>
    %590 = arith.addf %588, %589 : vector<16x32xf32>
    %591 = arith.negf %590 : vector<16x32xf32>
    %592 = math.exp %591 : vector<16x32xf32>
    %cst_191 = arith.constant 1.000000e+00 : f32
    %593 = vector.broadcast %cst_191 : f32 to vector<16x32xf32>
    %594 = arith.addf %593, %592 : vector<16x32xf32>
    %595 = arith.divf %593, %594 : vector<16x32xf32>
    %596 = vector.extract_strided_slice %584 {offsets = [0, 32], sizes = [16, 32], strides = [1, 1]} : vector<16x96xf32> to vector<16x32xf32>
    %597 = vector.extract_strided_slice %587 {offsets = [0, 32], sizes = [16, 32], strides = [1, 1]} : vector<16x96xf32> to vector<16x32xf32>
    %598 = arith.addf %596, %597 : vector<16x32xf32>
    %599 = arith.negf %598 : vector<16x32xf32>
    %600 = math.exp %599 : vector<16x32xf32>
    %cst_192 = arith.constant 1.000000e+00 : f32
    %601 = vector.broadcast %cst_192 : f32 to vector<16x32xf32>
    %602 = arith.addf %601, %600 : vector<16x32xf32>
    %603 = arith.divf %601, %602 : vector<16x32xf32>
    %604 = vector.extract_strided_slice %584 {offsets = [0, 64], sizes = [16, 32], strides = [1, 1]} : vector<16x96xf32> to vector<16x32xf32>
    %605 = vector.extract_strided_slice %587 {offsets = [0, 64], sizes = [16, 32], strides = [1, 1]} : vector<16x96xf32> to vector<16x32xf32>
    %606 = vector.broadcast %312 : vector<1x32xf32> to vector<16x32xf32>
    %607 = arith.addf %605, %606 : vector<16x32xf32>
    %608 = arith.mulf %595, %607 : vector<16x32xf32>
    %609 = arith.addf %604, %608 : vector<16x32xf32>
    %610 = math.tanh %609 : vector<16x32xf32>
    %cst_193 = arith.constant 1.000000e+00 : f32
    %611 = vector.broadcast %cst_193 : f32 to vector<16x32xf32>
    %612 = arith.subf %611, %603 : vector<16x32xf32>
    %613 = arith.mulf %612, %610 : vector<16x32xf32>
    %614 = arith.mulf %603, %578 : vector<16x32xf32>
    %615 = arith.addf %613, %614 : vector<16x32xf32>
    %616 = arith.index_cast %582 : i32 to index
    %c0_194 = arith.constant 0 : index
    %617 = vector.load %arg13[%616, %c0_194] : memref<128x32xf32, #tpu.memory_space<vmem>>, vector<16x32xf32>
    tpu.vector_store %arg13[%616, %c0_194], %615 {strides = array<i32>} : memref<128x32xf32, #tpu.memory_space<vmem>>, vector<16x32xf32>,
    %c8_i32_195 = arith.constant 8 : i32
    %c1_196 = arith.constant 1 : index
    %c0_197 = arith.constant 0 : index
    %c0_198 = arith.constant 0 : index
    %618 = vector.load %arg11[%c1_196, %c0_197, %c0_198] : memref<2x16x32xf32, #tpu.memory_space<vmem>>, vector<1x16x32xf32>
    %619 = vector.shape_cast %618 : vector<1x16x32xf32> to vector<16x32xf32>
    %620 = vector.shape_cast %615 : vector<16x32xf32> to vector<1x16x32xf32>
    tpu.vector_store %arg11[%c1_196, %c0_197, %c0_198], %620 {strides = array<i32>} : memref<2x16x32xf32, #tpu.memory_space<vmem>>, vector<1x16x32xf32>,
    %c0_199 = arith.constant 0 : index
    %c0_200 = arith.constant 0 : index
    %621 = vector.load %arg13[%c0_199, %c0_200] : memref<128x32xf32, #tpu.memory_space<vmem>>, vector<128x32xf32>
    %c0_201 = arith.constant 0 : index
    %c0_202 = arith.constant 0 : index
    %622 = vector.load %arg8[%c0_201, %c0_202] : memref<32x1xf32, #tpu.memory_space<vmem>>, vector<32x1xf32>
    %cst_203 = arith.constant dense<0.000000e+00> : vector<128x1xf32>
    %623 = tpu.matmul %621, %622, %cst_203 {dimension_numbers = #tpu.dot_dimension_numbers<[1], [0], [0], [1], [0, 0, 1, 1], [], []>} : vector<128x32xf32>, vector<32x1xf32>, vector<128x1xf32> -> vector<128x1xf32>
    %c0_204 = arith.constant 0 : index
    %c0_205 = arith.constant 0 : index
    %624 = memref.load %arg9[%c0_204, %c0_205] : memref<1x1xf32, #tpu.memory_space<smem>>
    %625 = vector.broadcast %624 : f32 to vector<128x1xf32>
    %626 = arith.addf %623, %625 : vector<128x1xf32>
    %c0_206 = arith.constant 0 : index
    %c0_207 = arith.constant 0 : index
    %c0_208 = arith.constant 0 : index
    %627 = vector.load %arg10[%c0_206, %c0_207, %c0_208] : memref<1x128x1xf32, #tpu.memory_space<vmem>>, vector<1x128x1xf32>
    %628 = vector.shape_cast %627 : vector<1x128x1xf32> to vector<128x1xf32>
    %629 = vector.shape_cast %626 : vector<128x1xf32> to vector<1x128x1xf32>
    tpu.vector_store %arg10[%c0_206, %c0_207, %c0_208], %629 {strides = array<i32>} : memref<1x128x1xf32, #tpu.memory_space<vmem>>, vector<1x128x1xf32>,
    return
  }
  func.func @transform_0(%arg0: i32) -> (i32, i32) {
    %c0_i32 = arith.constant 0 : i32
    %c0_i32_0 = arith.constant 0 : i32
    return %arg0, %c0_i32 : i32, i32
  }
  func.func @transform_1(%arg0: i32) -> (i32, i32, i32) {
    %c0_i32 = arith.constant 0 : i32
    %c0_i32_0 = arith.constant 0 : i32
    %c0_i32_1 = arith.constant 0 : i32
    return %arg0, %c0_i32, %c0_i32_0 : i32, i32, i32
  }
  func.func @transform_2(%arg0: i32) -> (i32, i32) {
    %c0_i32 = arith.constant 0 : i32
    %c0_i32_0 = arith.constant 0 : i32
    %c0_i32_1 = arith.constant 0 : i32
    return %c0_i32, %c0_i32_0 : i32, i32
  }
  func.func @transform_3(%arg0: i32) -> (i32, i32, i32) {
    %c0_i32 = arith.constant 0 : i32
    %c0_i32_0 = arith.constant 0 : i32
    %c0_i32_1 = arith.constant 0 : i32
    %c0_i32_2 = arith.constant 0 : i32
    return %c0_i32, %c0_i32_0, %c0_i32_1 : i32, i32, i32
  }
  func.func @transform_4(%arg0: i32) -> (i32, i32, i32) {
    %c0_i32 = arith.constant 0 : i32
    %c0_i32_0 = arith.constant 0 : i32
    %c0_i32_1 = arith.constant 0 : i32
    %c0_i32_2 = arith.constant 0 : i32
    return %c0_i32, %c0_i32_0, %c0_i32_1 : i32, i32, i32
  }
  func.func @transform_5(%arg0: i32) -> (i32, i32) {
    %c0_i32 = arith.constant 0 : i32
    %c0_i32_0 = arith.constant 0 : i32
    %c0_i32_1 = arith.constant 0 : i32
    return %c0_i32, %c0_i32_0 : i32, i32
  }
  func.func @transform_6(%arg0: i32) -> (i32, i32) {
    %c0_i32 = arith.constant 0 : i32
    %c0_i32_0 = arith.constant 0 : i32
    %c0_i32_1 = arith.constant 0 : i32
    return %c0_i32, %c0_i32_0 : i32, i32
  }
  func.func @transform_7(%arg0: i32) -> (i32, i32) {
    %c0_i32 = arith.constant 0 : i32
    %c0_i32_0 = arith.constant 0 : i32
    %c0_i32_1 = arith.constant 0 : i32
    return %c0_i32, %c0_i32_0 : i32, i32
  }
  func.func @transform_8(%arg0: i32) -> (i32, i32) {
    %c0_i32 = arith.constant 0 : i32
    %c0_i32_0 = arith.constant 0 : i32
    %c0_i32_1 = arith.constant 0 : i32
    return %c0_i32, %c0_i32_0 : i32, i32
  }
  func.func @transform_9(%arg0: i32) -> (i32, i32, i32) {
    %c0_i32 = arith.constant 0 : i32
    %c0_i32_0 = arith.constant 0 : i32
    %c0_i32_1 = arith.constant 0 : i32
    return %arg0, %c0_i32, %c0_i32_0 : i32, i32, i32
  }
  func.func @transform_10(%arg0: i32) -> (i32, i32, i32) {
    %c0_i32 = arith.constant 0 : i32
    %c0_i32_0 = arith.constant 0 : i32
    %c0_i32_1 = arith.constant 0 : i32
    return %arg0, %c0_i32, %c0_i32_0 : i32, i32, i32
  }
}

</mosaic_0001>

<bundles_post_ra>
// kernel: tpu_custom_call.1
= control target key start
LH: loop header
LB: loop body
LE: loop exit
PB: predicated region body
PF: predicated region fallthrough
CT: control target
= control target key end

     0   :  { %vm202_vm0 = vcmask 261120   ;;  %v4009_v6 = vmov 0   ;;  %s4010_s27 = smov 64   ;;  %s4817_s0 = inlined_call_operand.vmem [shape: f32[128,1], index: 0, kind: input, shape index: {}]   ;;  %s4818_s1 = inlined_call_operand.vmem [shape: f32[2,16,32], index: 1, kind: input, shape index: {}]   ;;  %s4819_s2 = inlined_call_operand.vmem [shape: f32[1,96], index: 2, kind: input, shape index: {}]   ;;  %s4820_s3 = inlined_call_operand.vmem [shape: f32[1,32,96], index: 3, kind: input, shape index: {}]   ;;  %s4821_s4 = inlined_call_operand.vmem [shape: f32[2,32,96], index: 4, kind: input, shape index: {}]   ;;  %s4822_s5 = inlined_call_operand.vmem [shape: f32[2,96], index: 5, kind: input, shape index: {}]   ;;  %s4823_s6 = inlined_call_operand.vmem [shape: f32[2,32], index: 6, kind: input, shape index: {}]   ;;  %s4824_s7 = inlined_call_operand.vmem [shape: f32[32,1], index: 7, kind: input, shape index: {}]   ;;  %s4825_s8 = inlined_call_operand.<no memory space> [shape: f32[1,1], index: 8, kind: input, shape index: {}]   ;;  %s4826_s9 = inlined_call_operand.vmem [shape: f32[1,128,1], index: 9, kind: output, shape index: {0}]   ;;  %s4827_s10 = inlined_call_operand.hbm [shape: f32[2,16,32], index: 10, kind: output, shape index: {1}]  }
   0x1   :  { %v198_v0 = vld [vmem:[%s4821_s4] sm:$0xff]  ;;  %v199_v1 = vld [vmem:[%s4821_s4 + $0x8] sm:$0xff]  ;;  %v200_v2 = vld [vmem:[%s4821_s4 + $0x10] sm:$0xff]  ;;  %3790 = vset.pattern.permute.xlu1 %v4009_v6  ;;  %3789 = vset.pattern.permute.xlu0 %v4009_v6 }
   0x2   :  { %v4080_v3 = vpack.c.bf16 %v199_v1, %v198_v0  ;;  %v201_v4 = vld [vmem:[%s4821_s4 + $0x18] sm:$0xff]  ;;  %v4088_v5 = vld [vmem:[%s4818_s1] sm:$0xff]  ;;  %v37_v9 = vld [vmem:[%s4817_s0 + $0x8] sm:$0xff] }
   0x3   :  { %v4090_v7 = vpack.c.bf16 %v201_v4, %v200_v2  ;;  %3402 = vmatprep.mubr.msk.f32.mxu0 %vm202_vm0, %v4088_v5  ;;  %v3129_v8 = vld [vmem:[%s4823_s6] ss:$0 sm:$0xff] }
   0x4   :  { %3635 = vmatprep.subr.bf16.mxu0 %v4080_v3  ;;  %303 = vrot.lane.b32.xlu0 %v3129_v8, %s4010_s27 }
   0x5   :  { %17 = vsyncpa [#allocation6], 0  ;;  %3637 = vmatpush3.bf16.msra.mxu0 %v4080_v3  ;;  %62 = vperm.xlu1 %3790, %v37_v9   ;;  %v36_v10 = vld [vmem:[%s4817_s0] sm:$0xff]  ;;  %v195_v11 = vld [vmem:[%s4818_s1 + $0x8] sm:$0xff]  ;;  %vm177_vm1 = vcmask 785408   ;;  %s4011_s16 = smov 32  }
   0x6   :  { %3639 = vmatprep.subr.bf16.mxu0 %v4090_v7  ;;  %3643 = vmatprep.subr.bf16.mxu1 %v4080_v3  ;;  %v4127_v13 = vld [vmem:[%s4819_s2] ss:$0 sm:$0xff]  ;;  %s4012_s17 = smov 96   ;;  %v38_v58 = vld [vmem:[%s4817_s0 + $0x10] sm:$0xff]  ;;  %v39_v60 = vld [vmem:[%s4817_s0 + $0x18] sm:$0xff]  ;;  %vm3086_vm2 = vcmask 7168  }
   0x7   :  { %3645 = vmatpush3.bf16.msra.mxu1 %v4080_v3  ;;  %v4132_v14 = vld [vmem:[%s4822_s5] ss:$0 sm:$0xff] }
   0x8   :  { %57 = vperm.xlu0 %3789, %v36_v10   ;;  %3647 = vmatprep.subr.bf16.mxu1 %v4090_v7 }
   0x9   :  { %3641 = vmatpush3.bf16.msra.mxu0 %v4090_v7 }
   0xa   :  { %3651 = vmatprep.subr.bf16.mxu0 %v4080_v3 }
   0xb   :  { %3649 = vmatpush3.bf16.msra.mxu1 %v4090_v7 }
   0xc   :  { %3403 = vmatmul.mubr.msk.f32.vlgmr.msra.gmra.mrb[0].mxu0 %vm202_vm0, %v195_v11  ;;  %3659 = vmatprep.subr.bf16.mxu1 %v4080_v3 }
   0xd   :  { %3653 = vmatpush3.bf16.msra.mxu0 %v4080_v3 }
   0xe   :  { %3655 = vmatprep.subr.bf16.mxu0 %v4090_v7 }
  0x11   :  { %3657 = vmatpush3.bf16.msra.mxu0 %v4090_v7 }
  0x12   :  { %3667 = vmatprep.subr.bf16.mxu0 %v4080_v3 }
  0x76   :  { %v4122_v12 = vpop.permute.xlu0 %303 }
  0x84   :  { %v63_v15 = vpop.permute.xlu1 %62 }
  0x85   :  { %v142_v16 = vmul.f32 %v4127_v13, %v63_v15 }
  0x87   :  { %v162_v17 = vadd.f32 %v4132_v14, %v142_v16  ;;  %v58_v18 = vpop.permute.xlu0 %57 }
  0x88   :  { %v141_v19 = vmul.f32 %v4127_v13, %v58_v18 }
  0x89   :  { %179 = vst.msk [vmem:[#allocation2 + $0x8] sm:$0xff] %vm177_vm1, %v162_v17 }
  0x8a   :  { %v161_v20 = vadd.f32 %v4132_v14, %v141_v19 }
  0x8c   :  { %178 = vst.msk [vmem:[#allocation2] sm:$0xff] %vm177_vm1, %v161_v20 }
  0x90   :  { %v197_v27 = vld [vmem:[#allocation2 + $0x8] sm:$0xff] }
  0x93   :  { %v196_v25 = vld [vmem:[#allocation2] sm:$0xff] }
  0xdf   :  { %v3404_v21 = vpop.f32.mrb[0].mxu0 }
  0xe0   :  { %v275_v22 = vpop.f32.mrb[1].mxu0  ;;  %v307_v24 = vadd.f32 %v3404_v21, %v4122_v12  ;;  %v285_v28 = vadd.f32 %v3404_v21, %v197_v27 }
  0xe1   :  { %v306_v23 = vadd.f32 %v4122_v12, %v275_v22  ;;  %v284_v26 = vadd.f32 %v275_v22, %v196_v25 }
  0xe2   :  { %v3128_v30 = vmul.f32 -1.442695, %v285_v28 }
  0xe3   :  { %310 = vrot.lane.b32.xlu1 %v306_v23, %s4010_s27  ;;  %v3127_v29 = vmul.f32 -1.442695, %v284_v26 }
  0xe5   :  { %3791 = vpow2.f32 %v3127_v29 }
  0xe6   :  { %3793 = vpow2.f32 %v3128_v30 }
  0xe7   :  { %312 = vrot.lane.b32.xlu1 %v307_v24, %s4010_s27 }
  0xef   :  { %v3792_v31 = vpop.eup %3791 }
  0xf0   :  { %v292_v32 = vadd.f32 1.0, %v3792_v31  ;;  %v3794_v33 = vpop.eup %3793 }
  0xf1   :  { %v293_v34 = vadd.f32 1.0, %v3794_v33 }
  0xf2   :  { %3795 = vrcp.f32 %v292_v32 }
  0xf3   :  { %3797 = vrcp.f32 %v293_v34 }
  0xfc   :  { %v3796_v35 = vpop.eup %3795 }
  0xfd   :  { %v3798_v38 = vpop.eup %3797  ;;  %v330_v48 = vsub.f32 1.0, %v3796_v35 }
  0xfe   :  { %v331_v54 = vsub.f32 1.0, %v3798_v38 }
 0x155   :  { %v311_v36 = vpop.permute.xlu1 %310 }
 0x156   :  { %v316_v37 = vmul.f32 %v3796_v35, %v311_v36 }
 0x158   :  { %320 = vrot.lane.b32.xlu0 %v316_v37, %s4010_s27 }
 0x159   :  { %v313_v39 = vpop.permute.xlu1 %312 }
 0x15a   :  { %v317_v40 = vmul.f32 %v3798_v38, %v313_v39 }
 0x15c   :  { %322 = vrot.lane.b32.xlu1 %v317_v40, %s4010_s27 }
 0x160   :  { %342 = vrot.lane.b32.xlu1 %v4088_v5, %s4011_s16 }
 0x164   :  { %344 = vrot.lane.b32.xlu1 %v195_v11, %s4011_s16 }
 0x1ca   :  { %v321_v41 = vpop.permute.xlu0 %320 }
 0x1cb   :  { %v326_v42 = vadd.f32 %v321_v41, %v196_v25 }
 0x1cd   :  { %3799 = vtanh.f32 %v326_v42 }
 0x1ce   :  { %v323_v43 = vpop.permute.xlu1 %322 }
 0x1cf   :  { %v327_v44 = vadd.f32 %v323_v43, %v197_v27 }
 0x1d1   :  { %3801 = vtanh.f32 %v327_v44 }
 0x1d2   :  { %v343_v47 = vpop.permute.xlu1 %342 }
 0x1d3   :  { %v348_v50 = vmul.f32 %v3796_v35, %v343_v47  ;;  %v40_v47 = vld [vmem:[%s4817_s0 + $0x20] sm:$0xff] }
 0x1d6   :  { %v345_v52 = vpop.permute.xlu1 %344 }
 0x1d7   :  { %v3800_v45 = vpop.eup %3799  ;;  %v349_v56 = vmul.f32 %v3798_v38, %v345_v52 }
 0x1d8   :  { %334 = vrot.lane.b32.xlu0 %v3800_v45, %s4012_s17 }
 0x1db   :  { %v3802_v46 = vpop.eup %3801 }
 0x1dc   :  { %336 = vrot.lane.b32.xlu0 %v3802_v46, %s4012_s17  ;;  %v41_v46 = vld [vmem:[%s4817_s0 + $0x28] sm:$0xff] }
 0x24a   :  { %v335_v49 = vpop.permute.xlu0 %334 }
 0x24b   :  { %v340_v51 = vmul.f32 %v335_v49, %v330_v48 }
 0x24d   :  { %v4151_v53 = vadd.f32 %v348_v50, %v340_v51 }
 0x24e   :  { %v337_v55 = vpop.permute.xlu0 %336 }
 0x24f   :  { %v341_v57 = vmul.f32 %v337_v55, %v331_v54  ;;  %354 = vrot.lane.b32.xlu0 %v4151_v53, %s4012_s17 }
 0x251   :  { %v4158_v59 = vadd.f32 %v349_v56, %v341_v57 }
 0x253   :  { %67 = vperm.xlu0 %3789, %v38_v58   ;;  %356 = vrot.lane.b32.xlu1 %v4158_v59, %s4012_s17 }
 0x257   :  { %72 = vperm.xlu1 %3790, %v39_v60  }
 0x2c1   :  { %v355_v61 = vpop.permute.xlu0 %354 }
 0x2c2   :  { %360 = vst.msk [vmem:[#allocation3] sm:$0xff] %vm202_vm0, %v355_v61  ;;  %3413 = vmatprep.mubr.msk.f32.mxu1 %vm202_vm0, %v355_v61 }
 0x2c5   :  { %v357_v62 = vpop.permute.xlu1 %356 }
 0x2c6   :  { %361 = vst.msk [vmem:[#allocation3 + $0x8] sm:$0xff] %vm202_vm0, %v357_v62  ;;  %3414 = vmatmul.mubr.msk.f32.vlgmr.msra.gmra.mrb[0].mxu1 %vm202_vm0, %v357_v62 }
 0x2c7   :  { %3661 = vmatpush3.bf16.msra.mxu1 %v4080_v3 }
 0x2c8   :  { %3663 = vmatprep.subr.bf16.mxu1 %v4090_v7 }
 0x2cb   :  { %3665 = vmatpush3.bf16.msra.mxu1 %v4090_v7 }
 0x2cc   :  { %3675 = vmatprep.subr.bf16.mxu1 %v4080_v3 }
 0x2d2   :  { %v68_v63 = vpop.permute.xlu0 %67 }
 0x2d3   :  { %v143_v0 = vmul.f32 %v4127_v13, %v68_v63 }
 0x2d5   :  { %v163_v1 = vadd.f32 %v4132_v14, %v143_v0 }
 0x2d6   :  { %v73_v2 = vpop.permute.xlu1 %72 }
 0x2d7   :  { %180 = vst.msk [vmem:[#allocation2 + $0x10] sm:$0xff] %vm177_vm1, %v163_v1  ;;  %v144_v4 = vmul.f32 %v4127_v13, %v73_v2 }
 0x2d9   :  { %v164_v5 = vadd.f32 %v4132_v14, %v144_v4 }
 0x2db   :  { %181 = vst.msk [vmem:[#allocation2 + $0x18] sm:$0xff] %vm177_vm1, %v164_v5 }
 0x2de   :  { %v363_v16 = vld [vmem:[#allocation2 + $0x10] sm:$0xff] }
 0x2e2   :  { %v364_v11 = vld [vmem:[#allocation2 + $0x18] sm:$0xff] }
 0x399   :  { %v3415_v6 = vpop.f32.mrb[0].mxu1 }
 0x39a   :  { %v463_v8 = vadd.f32 %v3415_v6, %v4122_v12  ;;  %v439_v9 = vpop.f32.mrb[1].mxu1  ;;  %v449_v15 = vadd.f32 %v3415_v6, %v364_v11 }
 0x39b   :  { %v462_v10 = vadd.f32 %v439_v9, %v4122_v12  ;;  %v448_v17 = vadd.f32 %v439_v9, %v363_v16 }
 0x39c   :  { %468 = vrot.lane.b32.xlu1 %v463_v8, %s4010_s27  ;;  %v3133_v18 = vmul.f32 -1.442695, %v449_v15 }
 0x39d   :  { %466 = vrot.lane.b32.xlu0 %v462_v10, %s4010_s27  ;;  %v3132_v19 = vmul.f32 -1.442695, %v448_v17 }
 0x39e   :  { %3803 = vpow2.f32 %v3133_v18 }
 0x39f   :  { %3805 = vpow2.f32 %v3132_v19 }
 0x3a8   :  { %v3804_v20 = vpop.eup %3803 }
 0x3a9   :  { %v3806_v21 = vpop.eup %3805  ;;  %v457_v22 = vadd.f32 1.0, %v3804_v20 }
 0x3aa   :  { %v456_v23 = vadd.f32 1.0, %v3806_v21 }
 0x3ab   :  { %3807 = vrcp.f32 %v457_v22 }
 0x3ac   :  { %3809 = vrcp.f32 %v456_v23 }
 0x3b5   :  { %v3808_v24 = vpop.eup %3807 }
 0x3b6   :  { %v3810_v26 = vpop.eup %3809  ;;  %v487_v36 = vsub.f32 1.0, %v3808_v24  ;;  %v499_v39 = vmul.f32 %v3808_v24, %v4158_v59 }
 0x3b7   :  { %v486_v38 = vsub.f32 1.0, %v3810_v26  ;;  %v498_v42 = vmul.f32 %v3810_v26, %v4151_v53 }
 0x40e   :  { %v469_v25 = vpop.permute.xlu1 %468 }
 0x40f   :  { %v473_v27 = vmul.f32 %v3808_v24, %v469_v25  ;;  %v467_v28 = vpop.permute.xlu0 %466 }
 0x410   :  { %v472_v29 = vmul.f32 %v3810_v26, %v467_v28 }
 0x411   :  { %478 = vrot.lane.b32.xlu1 %v473_v27, %s4010_s27 }
 0x412   :  { %476 = vrot.lane.b32.xlu0 %v472_v29, %s4010_s27 }
 0x483   :  { %v479_v30 = vpop.permute.xlu1 %478 }
 0x484   :  { %v483_v31 = vadd.f32 %v479_v30, %v364_v11  ;;  %v477_v32 = vpop.permute.xlu0 %476 }
 0x485   :  { %v482_v33 = vadd.f32 %v477_v32, %v363_v16 }
 0x486   :  { %3811 = vtanh.f32 %v483_v31 }
 0x487   :  { %3813 = vtanh.f32 %v482_v33  ;;  %v43_v33 = vld [vmem:[%s4817_s0 + $0x38] sm:$0xff] }
 0x490   :  { %v3812_v34 = vpop.eup %3811 }
 0x491   :  { %v3814_v35 = vpop.eup %3813  ;;  %492 = vrot.lane.b32.xlu1 %v3812_v34, %s4012_s17  ;;  %v42_v34 = vld [vmem:[%s4817_s0 + $0x30] sm:$0xff] }
 0x492   :  { %490 = vrot.lane.b32.xlu0 %v3814_v35, %s4012_s17 }
 0x503   :  { %v493_v37 = vpop.permute.xlu1 %492 }
 0x504   :  { %v497_v40 = vmul.f32 %v493_v37, %v487_v36  ;;  %v491_v41 = vpop.permute.xlu0 %490 }
 0x505   :  { %v496_v43 = vmul.f32 %v491_v41, %v486_v38 }
 0x506   :  { %v4189_v44 = vadd.f32 %v499_v39, %v497_v40 }
 0x507   :  { %v4191_v45 = vadd.f32 %v498_v42, %v496_v43 }
 0x508   :  { %506 = vrot.lane.b32.xlu1 %v4189_v44, %s4012_s17 }
 0x509   :  { %504 = vrot.lane.b32.xlu0 %v4191_v45, %s4012_s17 }
 0x50c   :  { %82 = vperm.xlu1 %3790, %v41_v46  }
 0x50d   :  { %77 = vperm.xlu0 %3789, %v40_v47  }
 0x57a   :  { %v507_v48 = vpop.permute.xlu1 %506 }
 0x57b   :  { %512 = vst.msk [vmem:[#allocation3 + $0x18] sm:$0xff] %vm202_vm0, %v507_v48  ;;  %v505_v49 = vpop.permute.xlu0 %504 }
 0x57c   :  { %511 = vst.msk [vmem:[#allocation3 + $0x10] sm:$0xff] %vm202_vm0, %v505_v49  ;;  %3424 = vmatprep.mubr.msk.f32.mxu0 %vm202_vm0, %v505_v49 }
 0x57d   :  { %3425 = vmatmul.mubr.msk.f32.vlgmr.msra.gmra.mrb[2].mxu0 %vm202_vm0, %v507_v48 }
 0x57e   :  { %3669 = vmatpush3.bf16.msra.mxu0 %v4080_v3 }
 0x57f   :  { %3671 = vmatprep.subr.bf16.mxu0 %v4090_v7 }
 0x582   :  { %3673 = vmatpush3.bf16.msra.mxu0 %v4090_v7 }
 0x583   :  { %3683 = vmatprep.subr.bf16.mxu0 %v4080_v3 }
 0x58b   :  { %v83_v50 = vpop.permute.xlu1 %82 }
 0x58c   :  { %v146_v51 = vmul.f32 %v4127_v13, %v83_v50  ;;  %v78_v52 = vpop.permute.xlu0 %77 }
 0x58d   :  { %v145_v53 = vmul.f32 %v4127_v13, %v78_v52 }
 0x58e   :  { %v166_v54 = vadd.f32 %v4132_v14, %v146_v51 }
 0x58f   :  { %v165_v55 = vadd.f32 %v4132_v14, %v145_v53 }
 0x590   :  { %183 = vst.msk [vmem:[#allocation2 + $0x28] sm:$0xff] %vm177_vm1, %v166_v54 }
 0x591   :  { %182 = vst.msk [vmem:[#allocation2 + $0x20] sm:$0xff] %vm177_vm1, %v165_v55 }
 0x597   :  { %v515_v60 = vld [vmem:[#allocation2 + $0x28] sm:$0xff] }
 0x598   :  { %v514_v62 = vld [vmem:[#allocation2 + $0x20] sm:$0xff] }
 0x650   :  { %v3426_v56 = vpop.f32.mrb[2].mxu0 }
 0x651   :  { %v614_v57 = vadd.f32 %v3426_v56, %v4122_v12  ;;  %v590_v58 = vpop.f32.mrb[3].mxu0  ;;  %v600_v61 = vadd.f32 %v3426_v56, %v515_v60 }
 0x652   :  { %v613_v59 = vadd.f32 %v590_v58, %v4122_v12  ;;  %v599_v63 = vadd.f32 %v590_v58, %v514_v62 }
 0x653   :  { %619 = vrot.lane.b32.xlu1 %v614_v57, %s4010_s27  ;;  %v3137_v0 = vmul.f32 -1.442695, %v600_v61 }
 0x654   :  { %617 = vrot.lane.b32.xlu0 %v613_v59, %s4010_s27  ;;  %v3136_v1 = vmul.f32 -1.442695, %v599_v63 }
 0x655   :  { %3815 = vpow2.f32 %v3137_v0 }
 0x656   :  { %3817 = vpow2.f32 %v3136_v1 }
 0x65f   :  { %v3816_v2 = vpop.eup %3815 }
 0x660   :  { %v3818_v4 = vpop.eup %3817  ;;  %v608_v5 = vadd.f32 1.0, %v3816_v2 }
 0x661   :  { %v607_v6 = vadd.f32 1.0, %v3818_v4 }
 0x662   :  { %3819 = vrcp.f32 %v608_v5 }
 0x663   :  { %3821 = vrcp.f32 %v607_v6 }
 0x66c   :  { %v3820_v8 = vpop.eup %3819 }
 0x66d   :  { %v3822_v10 = vpop.eup %3821  ;;  %v638_v23 = vsub.f32 1.0, %v3820_v8  ;;  %v650_v26 = vmul.f32 %v3820_v8, %v4189_v44 }
 0x66e   :  { %v637_v25 = vsub.f32 1.0, %v3822_v10  ;;  %v649_v29 = vmul.f32 %v3822_v10, %v4191_v45 }
 0x6c5   :  { %v620_v9 = vpop.permute.xlu1 %619 }
 0x6c6   :  { %v624_v11 = vmul.f32 %v3820_v8, %v620_v9  ;;  %v618_v15 = vpop.permute.xlu0 %617 }
 0x6c7   :  { %v623_v16 = vmul.f32 %v3822_v10, %v618_v15 }
 0x6c8   :  { %629 = vrot.lane.b32.xlu1 %v624_v11, %s4010_s27 }
 0x6c9   :  { %627 = vrot.lane.b32.xlu0 %v623_v16, %s4010_s27 }
 0x73a   :  { %v630_v17 = vpop.permute.xlu1 %629 }
 0x73b   :  { %v634_v18 = vadd.f32 %v630_v17, %v515_v60  ;;  %v628_v19 = vpop.permute.xlu0 %627 }
 0x73c   :  { %v633_v20 = vadd.f32 %v628_v19, %v514_v62 }
 0x73d   :  { %3823 = vtanh.f32 %v634_v18 }
 0x73e   :  { %3825 = vtanh.f32 %v633_v20  ;;  %v45_v20 = vld [vmem:[%s4817_s0 + $0x48] sm:$0xff] }
 0x747   :  { %v3824_v21 = vpop.eup %3823 }
 0x748   :  { %v3826_v22 = vpop.eup %3825  ;;  %643 = vrot.lane.b32.xlu1 %v3824_v21, %s4012_s17  ;;  %v44_v21 = vld [vmem:[%s4817_s0 + $0x40] sm:$0xff] }
 0x749   :  { %641 = vrot.lane.b32.xlu0 %v3826_v22, %s4012_s17 }
 0x7ba   :  { %v644_v24 = vpop.permute.xlu1 %643 }
 0x7bb   :  { %v648_v27 = vmul.f32 %v644_v24, %v638_v23  ;;  %v642_v28 = vpop.permute.xlu0 %641 }
 0x7bc   :  { %v647_v30 = vmul.f32 %v642_v28, %v637_v25 }
 0x7bd   :  { %v4227_v31 = vadd.f32 %v650_v26, %v648_v27 }
 0x7be   :  { %v4229_v32 = vadd.f32 %v649_v29, %v647_v30 }
 0x7bf   :  { %657 = vrot.lane.b32.xlu1 %v4227_v31, %s4012_s17 }
 0x7c0   :  { %655 = vrot.lane.b32.xlu0 %v4229_v32, %s4012_s17 }
 0x7c3   :  { %92 = vperm.xlu1 %3790, %v43_v33  }
 0x7c4   :  { %87 = vperm.xlu0 %3789, %v42_v34  }
 0x831   :  { %v658_v35 = vpop.permute.xlu1 %657 }
 0x832   :  { %663 = vst.msk [vmem:[#allocation3 + $0x28] sm:$0xff] %vm202_vm0, %v658_v35  ;;  %v656_v36 = vpop.permute.xlu0 %655 }
 0x833   :  { %662 = vst.msk [vmem:[#allocation3 + $0x20] sm:$0xff] %vm202_vm0, %v656_v36  ;;  %3435 = vmatprep.mubr.msk.f32.mxu1 %vm202_vm0, %v656_v36 }
 0x834   :  { %3436 = vmatmul.mubr.msk.f32.vlgmr.msra.gmra.mrb[2].mxu1 %vm202_vm0, %v658_v35 }
 0x835   :  { %3677 = vmatpush3.bf16.msra.mxu1 %v4080_v3 }
 0x836   :  { %3679 = vmatprep.subr.bf16.mxu1 %v4090_v7 }
 0x839   :  { %3681 = vmatpush3.bf16.msra.mxu1 %v4090_v7 }
 0x842   :  { %v93_v37 = vpop.permute.xlu1 %92 }
 0x843   :  { %v148_v38 = vmul.f32 %v4127_v13, %v93_v37  ;;  %v88_v39 = vpop.permute.xlu0 %87 }
 0x844   :  { %v147_v40 = vmul.f32 %v4127_v13, %v88_v39 }
 0x845   :  { %v168_v41 = vadd.f32 %v4132_v14, %v148_v38 }
 0x846   :  { %v167_v42 = vadd.f32 %v4132_v14, %v147_v40 }
 0x847   :  { %185 = vst.msk [vmem:[#allocation2 + $0x38] sm:$0xff] %vm177_vm1, %v168_v41 }
 0x848   :  { %184 = vst.msk [vmem:[#allocation2 + $0x30] sm:$0xff] %vm177_vm1, %v167_v42 }
 0x84e   :  { %v666_v47 = vld [vmem:[#allocation2 + $0x38] sm:$0xff] }
 0x84f   :  { %v665_v49 = vld [vmem:[#allocation2 + $0x30] sm:$0xff] }
 0x907   :  { %v3437_v43 = vpop.f32.mrb[2].mxu1 }
 0x908   :  { %v765_v44 = vadd.f32 %v3437_v43, %v4122_v12  ;;  %v741_v45 = vpop.f32.mrb[3].mxu1  ;;  %v751_v48 = vadd.f32 %v3437_v43, %v666_v47 }
 0x909   :  { %v764_v46 = vadd.f32 %v741_v45, %v4122_v12  ;;  %v750_v50 = vadd.f32 %v741_v45, %v665_v49 }
 0x90a   :  { %770 = vrot.lane.b32.xlu1 %v765_v44, %s4010_s27  ;;  %v3141_v51 = vmul.f32 -1.442695, %v751_v48 }
 0x90b   :  { %768 = vrot.lane.b32.xlu0 %v764_v46, %s4010_s27  ;;  %v3140_v52 = vmul.f32 -1.442695, %v750_v50 }
 0x90c   :  { %3827 = vpow2.f32 %v3141_v51 }
 0x90d   :  { %3829 = vpow2.f32 %v3140_v52 }
 0x916   :  { %v3828_v53 = vpop.eup %3827 }
 0x917   :  { %v3830_v54 = vpop.eup %3829  ;;  %v759_v55 = vadd.f32 1.0, %v3828_v53 }
 0x918   :  { %v758_v56 = vadd.f32 1.0, %v3830_v54 }
 0x919   :  { %3831 = vrcp.f32 %v759_v55 }
 0x91a   :  { %3833 = vrcp.f32 %v758_v56 }
 0x923   :  { %v3832_v57 = vpop.eup %3831 }
 0x924   :  { %v3834_v59 = vpop.eup %3833  ;;  %v789_v6 = vsub.f32 1.0, %v3832_v57  ;;  %v801_v10 = vmul.f32 %v3832_v57, %v4227_v31 }
 0x925   :  { %v788_v9 = vsub.f32 1.0, %v3834_v59  ;;  %v800_v16 = vmul.f32 %v3834_v59, %v4229_v32 }
 0x97c   :  { %v771_v58 = vpop.permute.xlu1 %770 }
 0x97d   :  { %v775_v60 = vmul.f32 %v3832_v57, %v771_v58  ;;  %v769_v61 = vpop.permute.xlu0 %768 }
 0x97e   :  { %v774_v62 = vmul.f32 %v3834_v59, %v769_v61 }
 0x97f   :  { %780 = vrot.lane.b32.xlu1 %v775_v60, %s4010_s27 }
 0x980   :  { %778 = vrot.lane.b32.xlu0 %v774_v62, %s4010_s27 }
 0x9f1   :  { %v781_v63 = vpop.permute.xlu1 %780 }
 0x9f2   :  { %v785_v0 = vadd.f32 %v781_v63, %v666_v47  ;;  %v779_v1 = vpop.permute.xlu0 %778 }
 0x9f3   :  { %v784_v2 = vadd.f32 %v779_v1, %v665_v49  ;;  %v46_v1 = vld [vmem:[%s4817_s0 + $0x50] sm:$0xff] }
 0x9f4   :  { %3835 = vtanh.f32 %v785_v0  ;;  %v47_v0 = vld [vmem:[%s4817_s0 + $0x58] sm:$0xff] }
 0x9f5   :  { %3837 = vtanh.f32 %v784_v2 }
 0x9fe   :  { %v3836_v4 = vpop.eup %3835 }
 0x9ff   :  { %v3838_v5 = vpop.eup %3837  ;;  %794 = vrot.lane.b32.xlu1 %v3836_v4, %s4012_s17 }
 0xa00   :  { %792 = vrot.lane.b32.xlu0 %v3838_v5, %s4012_s17 }
 0xa71   :  { %v795_v8 = vpop.permute.xlu1 %794 }
 0xa72   :  { %v799_v11 = vmul.f32 %v795_v8, %v789_v6  ;;  %v793_v15 = vpop.permute.xlu0 %792 }
 0xa73   :  { %v798_v17 = vmul.f32 %v793_v15, %v788_v9 }
 0xa74   :  { %v4264_v18 = vadd.f32 %v801_v10, %v799_v11 }
 0xa75   :  { %v4266_v19 = vadd.f32 %v800_v16, %v798_v17 }
 0xa76   :  { %808 = vrot.lane.b32.xlu1 %v4264_v18, %s4012_s17 }
 0xa77   :  { %806 = vrot.lane.b32.xlu0 %v4266_v19, %s4012_s17 }
 0xa7a   :  { %102 = vperm.xlu1 %3790, %v45_v20  }
 0xa7b   :  { %97 = vperm.xlu0 %3789, %v44_v21  }
 0xae8   :  { %v809_v22 = vpop.permute.xlu1 %808 }
 0xae9   :  { %814 = vst.msk [vmem:[#allocation3 + $0x38] sm:$0xff] %vm202_vm0, %v809_v22  ;;  %v807_v23 = vpop.permute.xlu0 %806 }
 0xaea   :  { %813 = vst.msk [vmem:[#allocation3 + $0x30] sm:$0xff] %vm202_vm0, %v807_v23  ;;  %3446 = vmatprep.mubr.msk.f32.mxu0 %vm202_vm0, %v807_v23 }
 0xaeb   :  { %3447 = vmatmul.mubr.msk.f32.vlgmr.msra.gmra.mrb[4].mxu0 %vm202_vm0, %v809_v22 }
 0xaec   :  { %3685 = vmatpush3.bf16.msra.mxu0 %v4080_v3 }
 0xaed   :  { %3687 = vmatprep.subr.bf16.mxu0 %v4090_v7 }
 0xaf0   :  { %3689 = vmatpush3.bf16.msra.mxu0 %v4090_v7 }
 0xaf9   :  { %v103_v24 = vpop.permute.xlu1 %102 }
 0xafa   :  { %v150_v25 = vmul.f32 %v4127_v13, %v103_v24  ;;  %v98_v26 = vpop.permute.xlu0 %97 }
 0xafb   :  { %v149_v27 = vmul.f32 %v4127_v13, %v98_v26 }
 0xafc   :  { %v170_v28 = vadd.f32 %v4132_v14, %v150_v25 }
 0xafd   :  { %v169_v29 = vadd.f32 %v4132_v14, %v149_v27 }
 0xafe   :  { %187 = vst.msk [vmem:[#allocation2 + $0x48] sm:$0xff] %vm177_vm1, %v170_v28 }
 0xaff   :  { %186 = vst.msk [vmem:[#allocation2 + $0x40] sm:$0xff] %vm177_vm1, %v169_v29 }
 0xb05   :  { %v817_v32 = vld [vmem:[#allocation2 + $0x48] sm:$0xff] }
 0xb06   :  { %v816_v34 = vld [vmem:[#allocation2 + $0x40] sm:$0xff] }
 0xbbe   :  { %v3448_v30 = vpop.f32.mrb[4].mxu0 }
 0xbbf   :  { %v916_v3 = vadd.f32 %v3448_v30, %v4122_v12  ;;  %v892_v31 = vpop.f32.mrb[5].mxu0  ;;  %v902_v33 = vadd.f32 %v3448_v30, %v817_v32 }
 0xbc0   :  { %v915_v7 = vadd.f32 %v892_v31, %v4122_v12  ;;  %v901_v35 = vadd.f32 %v892_v31, %v816_v34 }
 0xbc1   :  { %921 = vrot.lane.b32.xlu1 %v916_v3, %s4010_s27  ;;  %v3145_v36 = vmul.f32 -1.442695, %v902_v33 }
 0xbc2   :  { %919 = vrot.lane.b32.xlu0 %v915_v7, %s4010_s27  ;;  %v3144_v37 = vmul.f32 -1.442695, %v901_v35 }
 0xbc3   :  { %3839 = vpow2.f32 %v3145_v36 }
 0xbc4   :  { %3841 = vpow2.f32 %v3144_v37 }
 0xbcd   :  { %v3840_v38 = vpop.eup %3839 }
 0xbce   :  { %v3842_v39 = vpop.eup %3841  ;;  %v910_v40 = vadd.f32 1.0, %v3840_v38 }
 0xbcf   :  { %v909_v41 = vadd.f32 1.0, %v3842_v39  ;;  %v1439_v39 = vld [vmem:[%s4820_s3] sm:$0xff] }
 0xbd0   :  { %3843 = vrcp.f32 %v910_v40  ;;  %v1440_v40 = vld [vmem:[%s4820_s3 + $0x8] sm:$0xff] }
 0xbd1   :  { %3845 = vrcp.f32 %v909_v41  ;;  %v4339_v41 = vpack.c.bf16 %v1440_v40, %v1439_v39 }
 0xbd3   :  { %3699 = vmatprep.subr.bf16.mxu0 %v4339_v41 }
 0xbda   :  { %v3844_v42 = vpop.eup %3843 }
 0xbdb   :  { %v3846_v44 = vpop.eup %3845  ;;  %v940_v54 = vsub.f32 1.0, %v3844_v42  ;;  %v952_v57 = vmul.f32 %v3844_v42, %v4264_v18 }
 0xbdc   :  { %v939_v56 = vsub.f32 1.0, %v3846_v44  ;;  %v951_v60 = vmul.f32 %v3846_v44, %v4266_v19 }
 0xc33   :  { %v922_v43 = vpop.permute.xlu1 %921 }
 0xc34   :  { %v926_v45 = vmul.f32 %v3844_v42, %v922_v43  ;;  %v920_v46 = vpop.permute.xlu0 %919 }
 0xc35   :  { %v925_v47 = vmul.f32 %v3846_v44, %v920_v46 }
 0xc36   :  { %931 = vrot.lane.b32.xlu1 %v926_v45, %s4010_s27 }
 0xc37   :  { %929 = vrot.lane.b32.xlu0 %v925_v47, %s4010_s27 }
 0xca8   :  { %v932_v48 = vpop.permute.xlu1 %931 }
 0xca9   :  { %v936_v49 = vadd.f32 %v932_v48, %v817_v32  ;;  %v930_v50 = vpop.permute.xlu0 %929 }
 0xcaa   :  { %v935_v51 = vadd.f32 %v930_v50, %v816_v34 }
 0xcab   :  { %3847 = vtanh.f32 %v936_v49 }
 0xcac   :  { %3849 = vtanh.f32 %v935_v51 }
 0xcb5   :  { %v3848_v52 = vpop.eup %3847 }
 0xcb6   :  { %v3850_v53 = vpop.eup %3849  ;;  %945 = vrot.lane.b32.xlu1 %v3848_v52, %s4012_s17  ;;  %v49_v52 = vld [vmem:[%s4817_s0 + $0x68] sm:$0xff] }
 0xcb7   :  { %943 = vrot.lane.b32.xlu0 %v3850_v53, %s4012_s17  ;;  %v48_v53 = vld [vmem:[%s4817_s0 + $0x60] sm:$0xff] }
 0xd28   :  { %v946_v55 = vpop.permute.xlu1 %945 }
 0xd29   :  { %v950_v58 = vmul.f32 %v946_v55, %v940_v54  ;;  %v944_v59 = vpop.permute.xlu0 %943  ;;  %v1441_v54 = vld [vmem:[%s4820_s3 + $0x10] sm:$0xff]  ;;  %v1442_v55 = vld [vmem:[%s4820_s3 + $0x18] sm:$0xff] }
 0xd2a   :  { %v949_v61 = vmul.f32 %v944_v59, %v939_v56  ;;  %v1423_v59 = vld [vmem:[#allocation3] sm:$0xff] }
 0xd2b   :  { %v4301_v62 = vadd.f32 %v952_v57, %v950_v58  ;;  %v4365_v58 = vpack.c.bf16 %v1442_v55, %v1441_v54  ;;  %v1271_v54 = vld [vmem:[%s4821_s4] sm:$0xff]  ;;  %v1272_v55 = vld [vmem:[%s4821_s4 + $0x8] sm:$0xff] }
 0xd2c   :  { %v4303_v63 = vadd.f32 %v951_v60, %v949_v61  ;;  %v1424_v60 = vld [vmem:[#allocation3 + $0x8] sm:$0xff]  ;;  %v1425_v61 = vld [vmem:[#allocation3 + $0x10] sm:$0xff] }
 0xd2d   :  { %959 = vrot.lane.b32.xlu1 %v4301_v62, %s4012_s17 }
 0xd2e   :  { %957 = vrot.lane.b32.xlu0 %v4303_v63, %s4012_s17 }
 0xd31   :  { %112 = vperm.xlu1 %3790, %v47_v0  }
 0xd32   :  { %107 = vperm.xlu0 %3789, %v46_v1  }
 0xd9f   :  { %v960_v2 = vpop.permute.xlu1 %959 }
 0xda0   :  { %965 = vst.msk [vmem:[#allocation3 + $0x48] sm:$0xff] %vm202_vm0, %v960_v2  ;;  %v958_v4 = vpop.permute.xlu0 %957 }
 0xda1   :  { %964 = vst.msk [vmem:[#allocation3 + $0x40] sm:$0xff] %vm202_vm0, %v958_v4  ;;  %3457 = vmatprep.mubr.msk.f32.mxu1 %vm202_vm0, %v958_v4 }
 0xda2   :  { %3458 = vmatmul.mubr.msk.f32.vlgmr.msra.gmra.mrb[4].mxu1 %vm202_vm0, %v960_v2  ;;  %v1428_v2 = vld [vmem:[#allocation3 + $0x28] sm:$0xff] }
 0xdb0   :  { %v113_v5 = vpop.permute.xlu1 %112 }
 0xdb1   :  { %v152_v6 = vmul.f32 %v4127_v13, %v113_v5  ;;  %v108_v8 = vpop.permute.xlu0 %107 }
 0xdb2   :  { %v151_v9 = vmul.f32 %v4127_v13, %v108_v8 }
 0xdb3   :  { %v172_v10 = vadd.f32 %v4132_v14, %v152_v6  ;;  %v1429_v6 = vld [vmem:[#allocation3 + $0x30] sm:$0xff] }
 0xdb4   :  { %v171_v11 = vadd.f32 %v4132_v14, %v151_v9 }
 0xdb5   :  { %189 = vst.msk [vmem:[#allocation2 + $0x58] sm:$0xff] %vm177_vm1, %v172_v10  ;;  %v1430_v10 = vld [vmem:[#allocation3 + $0x38] sm:$0xff] }
 0xdb6   :  { %188 = vst.msk [vmem:[#allocation2 + $0x50] sm:$0xff] %vm177_vm1, %v171_v11 }
 0xdbc   :  { %v968_v19 = vld [vmem:[#allocation2 + $0x58] sm:$0xff] }
 0xdbd   :  { %v967_v21 = vld [vmem:[#allocation2 + $0x50] sm:$0xff] }
 0xe75   :  { %v3459_v15 = vpop.f32.mrb[4].mxu1 }
 0xe76   :  { %v1067_v16 = vadd.f32 %v3459_v15, %v4122_v12  ;;  %v1043_v17 = vpop.f32.mrb[5].mxu1  ;;  %v1053_v20 = vadd.f32 %v3459_v15, %v968_v19 }
 0xe77   :  { %v1066_v18 = vadd.f32 %v1043_v17, %v4122_v12  ;;  %v1052_v22 = vadd.f32 %v1043_v17, %v967_v21 }
 0xe78   :  { %1072 = vrot.lane.b32.xlu1 %v1067_v16, %s4010_s27  ;;  %v3149_v23 = vmul.f32 -1.442695, %v1053_v20 }
 0xe79   :  { %1070 = vrot.lane.b32.xlu0 %v1066_v18, %s4010_s27  ;;  %v3148_v24 = vmul.f32 -1.442695, %v1052_v22 }
 0xe7a   :  { %3851 = vpow2.f32 %v3149_v23 }
 0xe7b   :  { %3853 = vpow2.f32 %v3148_v24 }
 0xe84   :  { %v3852_v25 = vpop.eup %3851 }
 0xe85   :  { %v3854_v26 = vpop.eup %3853  ;;  %v1061_v27 = vadd.f32 1.0, %v3852_v25 }
 0xe86   :  { %v1060_v28 = vadd.f32 1.0, %v3854_v26 }
 0xe87   :  { %3855 = vrcp.f32 %v1061_v27 }
 0xe88   :  { %3857 = vrcp.f32 %v1060_v28 }
 0xe91   :  { %v3856_v29 = vpop.eup %3855 }
 0xe92   :  { %v3858_v3 = vpop.eup %3857  ;;  %v1091_v42 = vsub.f32 1.0, %v3856_v29  ;;  %v1103_v45 = vmul.f32 %v3856_v29, %v4301_v62  ;;  %v1426_v62 = vld [vmem:[#allocation3 + $0x18] sm:$0xff] }
 0xe93   :  { %v1090_v44 = vsub.f32 1.0, %v3858_v3  ;;  %v1102_v48 = vmul.f32 %v3858_v3, %v4303_v63  ;;  %v1427_v63 = vld [vmem:[#allocation3 + $0x20] sm:$0xff] }
 0xeea   :  { %v1073_v30 = vpop.permute.xlu1 %1072 }
 0xeeb   :  { %v1077_v31 = vmul.f32 %v3856_v29, %v1073_v30  ;;  %v1071_v7 = vpop.permute.xlu0 %1070 }
 0xeec   :  { %v1076_v32 = vmul.f32 %v3858_v3, %v1071_v7 }
 0xeed   :  { %1082 = vrot.lane.b32.xlu1 %v1077_v31, %s4010_s27 }
 0xeee   :  { %1080 = vrot.lane.b32.xlu0 %v1076_v32, %s4010_s27 }
 0xf5f   :  { %v1083_v33 = vpop.permute.xlu1 %1082 }
 0xf60   :  { %v1087_v34 = vadd.f32 %v1083_v33, %v968_v19  ;;  %v1081_v35 = vpop.permute.xlu0 %1080 }
 0xf61   :  { %v1086_v36 = vadd.f32 %v1081_v35, %v967_v21 }
 0xf62   :  { %3859 = vtanh.f32 %v1087_v34 }
 0xf63   :  { %3861 = vtanh.f32 %v1086_v36 }
 0xf6c   :  { %v3860_v37 = vpop.eup %3859 }
 0xf6d   :  { %v3862_v38 = vpop.eup %3861  ;;  %1096 = vrot.lane.b32.xlu1 %v3860_v37, %s4012_s17 }
 0xf6e   :  { %1094 = vrot.lane.b32.xlu0 %v3862_v38, %s4012_s17 }
 0xfdf   :  { %v1097_v43 = vpop.permute.xlu1 %1096 }
 0xfe0   :  { %v1101_v46 = vmul.f32 %v1097_v43, %v1091_v42  ;;  %v1095_v47 = vpop.permute.xlu0 %1094 }
 0xfe1   :  { %v1100_v49 = vmul.f32 %v1095_v47, %v1090_v44 }
 0xfe2   :  { %v4344_v50 = vadd.f32 %v1103_v45, %v1101_v46 }
 0xfe3   :  { %v4346_v51 = vadd.f32 %v1102_v48, %v1100_v49 }
 0xfe4   :  { %1110 = vrot.lane.b32.xlu1 %v4344_v50, %s4012_s17 }
 0xfe5   :  { %1108 = vrot.lane.b32.xlu0 %v4346_v51, %s4012_s17 }
 0xfe8   :  { %122 = vperm.xlu1 %3790, %v49_v52  }
 0xfe9   :  { %117 = vperm.xlu0 %3789, %v48_v53  }
0x1056   :  { %v1111_v56 = vpop.permute.xlu1 %1110 }
0x1057   :  { %1116 = vst.msk [vmem:[#allocation3 + $0x58] sm:$0xff] %vm202_vm0, %v1111_v56  ;;  %v1109_v57 = vpop.permute.xlu0 %1108 }
0x1058   :  { %1115 = vst.msk [vmem:[#allocation3 + $0x50] sm:$0xff] %vm202_vm0, %v1109_v57  ;;  %3468 = vmatprep.mubr.msk.f32.mxu0 %vm202_vm0, %v1109_v57  ;;  %v3690_v57 = vpack.c.bf16 %v1272_v55, %v1271_v54 }
0x1059   :  { %3469 = vmatmul.mubr.msk.f32.vlgmr.msra.gmra.mrb[6].mxu0 %vm202_vm0, %v1111_v56  ;;  %v1273_v56 = vld [vmem:[%s4821_s4 + $0x10] sm:$0xff] }
0x105a   :  { %3701 = vmatpush3.bf16.msra.mxu0 %v4339_v41  ;;  %3490 = vmatprep.mubr.msk.f32.mxu0 %vm202_vm0, %v1423_v59  ;;  %v1274_v59 = vld [vmem:[%s4821_s4 + $0x18] sm:$0xff] }
0x105b   :  { %3703 = vmatprep.subr.bf16.mxu0 %v4365_v58  ;;  %3691 = vmatprep.subr.bf16.mxu1 %v3690_v57 }
0x105c   :  { %3693 = vmatpush3.bf16.msra.mxu1 %v3690_v57 }
0x105e   :  { %3705 = vmatpush3.bf16.msra.mxu0 %v4365_v58 }
0x1061   :  { %3491 = vmatmul.mubr.msk.f32.vlgmr.msra.gmra.mrb[8].mxu0 %vm202_vm0, %v1424_v60  ;;  %v3694_v60 = vpack.c.bf16 %v1274_v59, %v1273_v56 }
0x1062   :  { %3493 = vmatprep.mubr.msk.f32.mxu0 %vm202_vm0, %v1425_v61 }
0x1063   :  { %3695 = vmatprep.subr.bf16.mxu1 %v3694_v60 }
0x1064   :  { %3697 = vmatpush3.bf16.msra.mxu1 %v3694_v60 }
0x1065   :  { %3494 = vmatmul.mubr.msk.f32.gmra.mrb[10].mxu0 %vm202_vm0, %v1426_v62  ;;  %3778 = vmatprep.subr.bf16.mxu1 %v4339_v41 }
0x1066   :  { %3496 = vmatprep.mubr.msk.f32.mxu0 %vm202_vm0, %v1427_v63 }
0x1067   :  { %v123_v0 = vpop.permute.xlu1 %122 }
0x1068   :  { %v154_v1 = vmul.f32 %v4127_v13, %v123_v0  ;;  %v118_v4 = vpop.permute.xlu0 %117 }
0x1069   :  { %3497 = vmatmul.mubr.msk.f32.gmra.mrb[12].mxu0 %vm202_vm0, %v1428_v2  ;;  %v153_v5 = vmul.f32 %v4127_v13, %v118_v4 }
0x106a   :  { %v174_v8 = vadd.f32 %v4132_v14, %v154_v1  ;;  %3499 = vmatprep.mubr.msk.f32.mxu0 %vm202_vm0, %v1429_v6 }
0x106b   :  { %v173_v9 = vadd.f32 %v4132_v14, %v153_v5  ;;  %v4394_v14 = vld [vmem:[%s4822_s5 + $0x1] ss:$0 sm:$0xff] }
0x106c   :  { %191 = vst.msk [vmem:[#allocation2 + $0x68] sm:$0xff] %vm177_vm1, %v174_v8 }
0x106d   :  { %190 = vst.msk [vmem:[#allocation2 + $0x60] sm:$0xff] %vm177_vm1, %v173_v9  ;;  %3500 = vmatmul.mubr.msk.f32.gmra.mrb[14].mxu0 %vm202_vm0, %v1430_v10 }
0x1073   :  { %v1119_v7 = vld [vmem:[#allocation2 + $0x68] sm:$0xff] }
0x1074   :  { %v1118_v33 = vld [vmem:[#allocation2 + $0x60] sm:$0xff] }
0x112c   :  { %v3470_v11 = vpop.f32.mrb[6].mxu0 }
0x112d   :  { %v1218_v15 = vadd.f32 %v3470_v11, %v4122_v12  ;;  %v1194_v16 = vpop.f32.mrb[7].mxu0  ;;  %v1204_v32 = vadd.f32 %v3470_v11, %v1119_v7  ;;  %v51_v11 = vld [vmem:[%s4817_s0 + $0x78] sm:$0xff] }
0x112e   :  { %v1217_v13 = vadd.f32 %v1194_v16, %v4122_v12  ;;  %v1203_v34 = vadd.f32 %v1194_v16, %v1118_v33  ;;  %v1431_v16 = vld [vmem:[#allocation3 + $0x40] sm:$0xff] }
0x112f   :  { %1223 = vrot.lane.b32.xlu1 %v1218_v15, %s4010_s27  ;;  %v3153_v35 = vmul.f32 -1.442695, %v1204_v32 }
0x1130   :  { %1221 = vrot.lane.b32.xlu0 %v1217_v13, %s4010_s27  ;;  %v3152_v36 = vmul.f32 -1.442695, %v1203_v34  ;;  %v1432_v13 = vld [vmem:[#allocation3 + $0x48] sm:$0xff] }
0x1131   :  { %3863 = vpow2.f32 %v3153_v35 }
0x1132   :  { %3865 = vpow2.f32 %v3152_v36 }
0x1134   :  { %v3492_v17 = vpop.f32.mrb[8].mxu0 }
0x1135   :  { %v1567_v18 = vadd.f32 %v3492_v17, %v4394_v14  ;;  %v1561_v19 = vpop.f32.mrb[9].mxu0  ;;  %v1433_v17 = vld [vmem:[#allocation3 + $0x50] sm:$0xff] }
0x1136   :  { %v1562_v20 = vadd.f32 %v4394_v14, %v1561_v19 }
0x1137   :  { %1641 = vst.msk [vmem:[#allocation2 + $0x8] sm:$0xff] %vm177_vm1, %v1567_v18  ;;  %v1434_v18 = vld [vmem:[#allocation3 + $0x58] sm:$0xff] }
0x1138   :  { %1640 = vst.msk [vmem:[#allocation2] sm:$0xff] %vm177_vm1, %v1562_v20  ;;  %v3495_v21 = vpop.f32.mrb[10].mxu0 }
0x1139   :  { %v1577_v22 = vadd.f32 %v3495_v21, %v4394_v14  ;;  %v1571_v23 = vpop.f32.mrb[11].mxu0 }
0x113a   :  { %v1572_v24 = vadd.f32 %v4394_v14, %v1571_v23 }
0x113b   :  { %1643 = vst.msk [vmem:[#allocation2 + $0x18] sm:$0xff] %vm177_vm1, %v1577_v22  ;;  %v3864_v37 = vpop.eup %3863 }
0x113c   :  { %1642 = vst.msk [vmem:[#allocation2 + $0x10] sm:$0xff] %vm177_vm1, %v1572_v24  ;;  %v3498_v25 = vpop.f32.mrb[12].mxu0  ;;  %v3866_v38 = vpop.eup %3865  ;;  %v1212_v39 = vadd.f32 1.0, %v3864_v37  ;;  %v3984_v24 = vld [vmem:[%s4822_s5] ss:$0 sm:$0xff] }
0x113d   :  { %v1587_v26 = vadd.f32 %v3498_v25, %v4394_v14  ;;  %v1581_v27 = vpop.f32.mrb[13].mxu0  ;;  %v1211_v40 = vadd.f32 1.0, %v3866_v38 }
0x113e   :  { %v1582_v28 = vadd.f32 %v4394_v14, %v1581_v27  ;;  %3867 = vrcp.f32 %v1212_v39 }
0x113f   :  { %1645 = vst.msk [vmem:[#allocation2 + $0x28] sm:$0xff] %vm177_vm1, %v1587_v26  ;;  %3869 = vrcp.f32 %v1211_v40 }
0x1140   :  { %1644 = vst.msk [vmem:[#allocation2 + $0x20] sm:$0xff] %vm177_vm1, %v1582_v28  ;;  %v3501_v29 = vpop.f32.mrb[14].mxu0 }
0x1141   :  { %v1597_v30 = vadd.f32 %v3501_v29, %v4394_v14  ;;  %v1591_v3 = vpop.f32.mrb[15].mxu0 }
0x1142   :  { %v1592_v31 = vadd.f32 %v4394_v14, %v1591_v3 }
0x1143   :  { %1647 = vst.msk [vmem:[#allocation2 + $0x38] sm:$0xff] %vm177_vm1, %v1597_v30 }
0x1144   :  { %1646 = vst.msk [vmem:[#allocation2 + $0x30] sm:$0xff] %vm177_vm1, %v1592_v31 }
0x1148   :  { %v3868_v42 = vpop.eup %3867 }
0x1149   :  { %v3870_v44 = vpop.eup %3869  ;;  %v1242_v63 = vsub.f32 1.0, %v3868_v42  ;;  %v1254_v2 = vmul.f32 %v3868_v42, %v4344_v50  ;;  %v50_v50 = vld [vmem:[%s4817_s0 + $0x70] sm:$0xff] }
0x114a   :  { %v1241_v1 = vsub.f32 1.0, %v3870_v44  ;;  %v1253_v6 = vmul.f32 %v3870_v44, %v4346_v51 }
0x11a1   :  { %v1224_v43 = vpop.permute.xlu1 %1223 }
0x11a2   :  { %v1228_v45 = vmul.f32 %v3868_v42, %v1224_v43  ;;  %v1222_v46 = vpop.permute.xlu0 %1221 }
0x11a3   :  { %v1227_v47 = vmul.f32 %v3870_v44, %v1222_v46 }
0x11a4   :  { %1233 = vrot.lane.b32.xlu1 %v1228_v45, %s4010_s27 }
0x11a5   :  { %1231 = vrot.lane.b32.xlu0 %v1227_v47, %s4010_s27 }
0x1216   :  { %v1234_v48 = vpop.permute.xlu1 %1233 }
0x1217   :  { %v1238_v49 = vadd.f32 %v1234_v48, %v1119_v7  ;;  %v1232_v52 = vpop.permute.xlu0 %1231 }
0x1218   :  { %v1237_v53 = vadd.f32 %v1232_v52, %v1118_v33 }
0x1219   :  { %3871 = vtanh.f32 %v1238_v49 }
0x121a   :  { %3873 = vtanh.f32 %v1237_v53 }
0x1223   :  { %v3872_v61 = vpop.eup %3871 }
0x1224   :  { %v3874_v62 = vpop.eup %3873  ;;  %1247 = vrot.lane.b32.xlu1 %v3872_v61, %s4012_s17 }
0x1225   :  { %1245 = vrot.lane.b32.xlu0 %v3874_v62, %s4012_s17 }
0x1296   :  { %v1248_v0 = vpop.permute.xlu1 %1247 }
0x1297   :  { %v1252_v4 = vmul.f32 %v1248_v0, %v1242_v63  ;;  %v1246_v5 = vpop.permute.xlu0 %1245  ;;  %v3177_v0 = vld [vmem:[%s4821_s4 + $0x20] sm:$0xff] }
0x1298   :  { %v1251_v8 = vmul.f32 %v1246_v5, %v1241_v1  ;;  %v3178_v1 = vld [vmem:[%s4821_s4 + $0x28] sm:$0xff] }
0x1299   :  { %v4431_v9 = vadd.f32 %v1254_v2, %v1252_v4  ;;  %v4490_v2 = vpack.c.bf16 %v3178_v1, %v3177_v0 }
0x129a   :  { %v4433_v10 = vadd.f32 %v1253_v6, %v1251_v8  ;;  %v3179_v6 = vld [vmem:[%s4821_s4 + $0x30] sm:$0xff]  ;;  %v3180_v8 = vld [vmem:[%s4821_s4 + $0x38] sm:$0xff] }
0x129b   :  { %1261 = vrot.lane.b32.xlu1 %v4431_v9, %s4012_s17  ;;  %3739 = vmatprep.subr.bf16.mxu0 %v4490_v2 }
0x129c   :  { %1259 = vrot.lane.b32.xlu0 %v4433_v10, %s4012_s17  ;;  %3741 = vmatpush3.bf16.msra.mxu0 %v4490_v2 }
0x129f   :  { %132 = vperm.xlu1 %3790, %v51_v11   ;;  %v4504_v11 = vpack.c.bf16 %v3180_v8, %v3179_v6 }
0x12a0   :  { %127 = vperm.xlu0 %3789, %v50_v50  }
0x12a1   :  { %3743 = vmatprep.subr.bf16.mxu0 %v4504_v11 }
0x12a2   :  { %3745 = vmatpush3.bf16.msra.mxu0 %v4504_v11 }
0x12a3   :  { %3755 = vmatprep.subr.bf16.mxu0 %v4490_v2 }
0x130d   :  { %v1262_v51 = vpop.permute.xlu1 %1261 }
0x130e   :  { %1267 = vst.msk [vmem:[#allocation3 + $0x68] sm:$0xff] %vm202_vm0, %v1262_v51  ;;  %v1260_v15 = vpop.permute.xlu0 %1259 }
0x130f   :  { %1266 = vst.msk [vmem:[#allocation3 + $0x60] sm:$0xff] %vm202_vm0, %v1260_v15  ;;  %3479 = vmatprep.mubr.msk.f32.mxu1 %vm202_vm0, %v1260_v15 }
0x1310   :  { %3480 = vmatmul.mubr.msk.f32.vlgmr.msra.gmra.mrb[6].mxu1 %vm202_vm0, %v1262_v51 }
0x1311   :  { %3780 = vmatpush3.bf16.msra.mxu1 %v4339_v41  ;;  %3502 = vmatprep.mubr.msk.f32.mxu1 %vm202_vm0, %v1431_v16  ;;  %v3983_v41 = vld [vmem:[%s4819_s2] ss:$0 sm:$0xff] }
0x1312   :  { %3779 = vmatprep.subr.bf16.mxu1 %v4365_v58 }
0x1315   :  { %3781 = vmatpush3.bf16.msra.mxu1 %v4365_v58  ;;  %v1436_v22 = vld [vmem:[#allocation3 + $0x68] sm:$0xff] }
0x1316   :  { %v1435_v19 = vld [vmem:[#allocation3 + $0x60] sm:$0xff]  ;;  %3707 = vmatprep.subr.bf16.mxu1 %v4490_v2 }
0x1318   :  { %3503 = vmatmul.mubr.msk.f32.vlgmr.msra.gmra.mrb[8].mxu1 %vm202_vm0, %v1432_v13 }
0x1319   :  { %3505 = vmatprep.mubr.msk.f32.mxu1 %vm202_vm0, %v1433_v17  ;;  %3709 = vmatpush3.bf16.msra.mxu1 %v4490_v2 }
0x131a   :  { %3711 = vmatprep.subr.bf16.mxu1 %v4504_v11 }
0x131c   :  { %3506 = vmatmul.mubr.msk.f32.gmra.mrb[10].mxu1 %vm202_vm0, %v1434_v18 }
0x131d   :  { %3508 = vmatprep.mubr.msk.f32.mxu1 %vm202_vm0, %v1435_v19  ;;  %3713 = vmatpush3.bf16.msra.mxu1 %v4504_v11 }
0x131e   :  { %v133_v20 = vpop.permute.xlu1 %132  ;;  %3715 = vmatprep.subr.bf16.mxu1 %v4490_v2 }
0x131f   :  { %v156_v21 = vmul.f32 %v3983_v41, %v133_v20  ;;  %v128_v58 = vpop.permute.xlu0 %127 }
0x1320   :  { %3509 = vmatmul.mubr.msk.f32.gmra.mrb[12].mxu1 %vm202_vm0, %v1436_v22  ;;  %v155_v23 = vmul.f32 %v3983_v41, %v128_v58  ;;  %v3175_v58 = vld [vmem:[%s4818_s1 + $0x10] sm:$0xff] }
0x1321   :  { %v176_v25 = vadd.f32 %v3984_v24, %v156_v21  ;;  %v3185_v21 = vld [vmem:[%s4823_s6 + $0x1] ss:$0 sm:$0xff] }
0x1322   :  { %v175_v26 = vadd.f32 %v3984_v24, %v155_v23  ;;  %v3176_v24 = vld [vmem:[%s4818_s1 + $0x18] sm:$0xff] }
0x1323   :  { %193 = vst.msk [vmem:[#allocation2 + $0x78] sm:$0xff] %vm177_vm1, %v176_v25 }
0x1324   :  { %192 = vst.msk [vmem:[#allocation2 + $0x70] sm:$0xff] %vm177_vm1, %v175_v26 }
0x132a   :  { %v1270_v40 = vld [vmem:[#allocation2 + $0x78] sm:$0xff] }
0x132b   :  { %v1269_v43 = vld [vmem:[#allocation2 + $0x70] sm:$0xff] }
0x13e3   :  { %v3481_v27 = vpop.f32.mrb[6].mxu1 }
0x13e4   :  { %v1369_v28 = vadd.f32 %v3481_v27, %v4122_v12  ;;  %v1345_v29 = vpop.f32.mrb[7].mxu1  ;;  %v1355_v42 = vadd.f32 %v3481_v27, %v1270_v40 }
0x13e5   :  { %v1368_v30 = vadd.f32 %v1345_v29, %v4122_v12  ;;  %v1354_v44 = vadd.f32 %v1345_v29, %v1269_v43 }
0x13e6   :  { %1374 = vrot.lane.b32.xlu1 %v1369_v28, %s4010_s27  ;;  %v3157_v45 = vmul.f32 -1.442695, %v1355_v42 }
0x13e7   :  { %1372 = vrot.lane.b32.xlu0 %v1368_v30, %s4010_s27  ;;  %v3156_v46 = vmul.f32 -1.442695, %v1354_v44 }
0x13e8   :  { %3875 = vpow2.f32 %v3157_v45 }
0x13e9   :  { %3877 = vpow2.f32 %v3156_v46 }
0x13eb   :  { %v3504_v3 = vpop.f32.mrb[8].mxu1 }
0x13ec   :  { %v1607_v31 = vadd.f32 %v3504_v3, %v4394_v14  ;;  %v1601_v7 = vpop.f32.mrb[9].mxu1 }
0x13ed   :  { %v1602_v32 = vadd.f32 %v4394_v14, %v1601_v7 }
0x13ee   :  { %1649 = vst.msk [vmem:[#allocation2 + $0x48] sm:$0xff] %vm177_vm1, %v1607_v31 }
0x13ef   :  { %1648 = vst.msk [vmem:[#allocation2 + $0x40] sm:$0xff] %vm177_vm1, %v1602_v32  ;;  %v3507_v33 = vpop.f32.mrb[10].mxu1  ;;  %v1660_v32 = vld [vmem:[#allocation2 + $0x8] sm:$0xff] }
0x13f0   :  { %v1617_v34 = vadd.f32 %v3507_v33, %v4394_v14  ;;  %v1611_v35 = vpop.f32.mrb[11].mxu1 }
0x13f1   :  { %v1612_v12 = vadd.f32 %v4394_v14, %v1611_v35 }
0x13f2   :  { %1651 = vst.msk [vmem:[#allocation2 + $0x58] sm:$0xff] %vm177_vm1, %v1617_v34  ;;  %v3876_v47 = vpop.eup %3875  ;;  %v1659_v34 = vld [vmem:[#allocation2] sm:$0xff] }
0x13f3   :  { %1650 = vst.msk [vmem:[#allocation2 + $0x50] sm:$0xff] %vm177_vm1, %v1612_v12  ;;  %v3510_v36 = vpop.f32.mrb[12].mxu1  ;;  %v3878_v48 = vpop.eup %3877  ;;  %v1363_v49 = vadd.f32 1.0, %v3876_v47 }
0x13f4   :  { %v1627_v37 = vadd.f32 %v3510_v36, %v4394_v14  ;;  %v1621_v38 = vpop.f32.mrb[13].mxu1  ;;  %v1362_v52 = vadd.f32 1.0, %v3878_v48 }
0x13f5   :  { %v1622_v39 = vadd.f32 %v4394_v14, %v1621_v38  ;;  %3879 = vrcp.f32 %v1363_v49 }
0x13f6   :  { %1653 = vst.msk [vmem:[#allocation2 + $0x68] sm:$0xff] %vm177_vm1, %v1627_v37  ;;  %3881 = vrcp.f32 %v1362_v52 }
0x13f7   :  { %1652 = vst.msk [vmem:[#allocation2 + $0x60] sm:$0xff] %vm177_vm1, %v1622_v39 }
0x13ff   :  { %v3880_v53 = vpop.eup %3879 }
0x1400   :  { %v3882_v55 = vpop.eup %3881  ;;  %v1393_v50 = vsub.f32 1.0, %v3880_v53  ;;  %v1405_v16 = vmul.f32 %v3880_v53, %v4431_v9 }
0x1401   :  { %v1392_v15 = vsub.f32 1.0, %v3882_v55  ;;  %v1404_v18 = vmul.f32 %v3882_v55, %v4433_v10 }
0x1458   :  { %v1375_v54 = vpop.permute.xlu1 %1374 }
0x1459   :  { %v1379_v56 = vmul.f32 %v3880_v53, %v1375_v54  ;;  %v1373_v57 = vpop.permute.xlu0 %1372 }
0x145a   :  { %v1378_v59 = vmul.f32 %v3882_v55, %v1373_v57 }
0x145b   :  { %1384 = vrot.lane.b32.xlu1 %v1379_v56, %s4010_s27 }
0x145c   :  { %1382 = vrot.lane.b32.xlu0 %v1378_v59, %s4010_s27 }
0x14cd   :  { %v1385_v60 = vpop.permute.xlu1 %1384 }
0x14ce   :  { %v1389_v61 = vadd.f32 %v1385_v60, %v1270_v40  ;;  %v1383_v62 = vpop.permute.xlu0 %1382 }
0x14cf   :  { %v1388_v63 = vadd.f32 %v1383_v62, %v1269_v43 }
0x14d0   :  { %3883 = vtanh.f32 %v1389_v61 }
0x14d1   :  { %3885 = vtanh.f32 %v1388_v63 }
0x14da   :  { %v3884_v4 = vpop.eup %3883 }
0x14db   :  { %v3886_v5 = vpop.eup %3885  ;;  %1398 = vrot.lane.b32.xlu1 %v3884_v4, %s4012_s17 }
0x14dc   :  { %1396 = vrot.lane.b32.xlu0 %v3886_v5, %s4012_s17 }
0x154d   :  { %v1399_v51 = vpop.permute.xlu1 %1398 }
0x154e   :  { %v1403_v13 = vmul.f32 %v1399_v51, %v1393_v50  ;;  %v1397_v17 = vpop.permute.xlu0 %1396 }
0x154f   :  { %v1402_v19 = vmul.f32 %v1397_v17, %v1392_v15 }
0x1550   :  { %v1407_v20 = vadd.f32 %v1405_v16, %v1403_v13  ;;  %v1826_v13 = vld [vmem:[#allocation2 + $0x18] sm:$0xff] }
0x1551   :  { %v1406_v41 = vadd.f32 %v1404_v18, %v1402_v19  ;;  %v1825_v18 = vld [vmem:[#allocation2 + $0x10] sm:$0xff] }
0x1552   :  { %1412 = vrot.lane.b32.xlu1 %v1407_v20, %s4012_s17 }
0x1553   :  { %1410 = vrot.lane.b32.xlu0 %v1406_v41, %s4012_s17 }
0x1557   :  { %1766 = vrot.lane.b32.xlu0 %v3185_v21, %s4010_s27 }
0x15c4   :  { %v1413_v22 = vpop.permute.xlu1 %1412 }
0x15c5   :  { %1418 = vst.msk [vmem:[#allocation3 + $0x78] sm:$0xff] %vm202_vm0, %v1413_v22  ;;  %1420 = vst.msk [vmem:[#allocation5 + $0x8] sm:$0xff] %vm202_vm0, %v1413_v22  ;;  %v1411_v9 = vpop.permute.xlu0 %1410 }
0x15c6   :  { %1417 = vst.msk [vmem:[#allocation3 + $0x70] sm:$0xff] %vm202_vm0, %v1411_v9  ;;  %1419 = vst.msk [vmem:[#allocation5] sm:$0xff] %vm202_vm0, %v1411_v9 }
0x15c9   :  { %v4540_v29 = vpop.permute.xlu0 %1766 }
0x15cc   :  { %v1438_v23 = vld [vmem:[#allocation3 + $0x78] sm:$0xff] }
0x15cd   :  { %v1437_v10 = vld [vmem:[#allocation3 + $0x70] sm:$0xff] }
0x15ce   :  { %3511 = vmatprep.mubr.msk.f32.mxu1 %vm202_vm0, %v1437_v10 }
0x15cf   :  { %3512 = vmatmul.mubr.msk.f32.gmra.mrb[14].mxu1 %vm202_vm0, %v1438_v23 }
0x15d0   :  { %3522 = vmatprep.mubr.msk.f32.mxu1 %vm202_vm0, %v3175_v58 }
0x15d3   :  { %3523 = vmatmul.mubr.msk.f32.vlgmr.msra.gmra.mrb[16].mxu1 %vm202_vm0, %v3176_v24 }
0x15d4   :  { %3717 = vmatpush3.bf16.msra.mxu1 %v4490_v2 }
0x15d5   :  { %3719 = vmatprep.subr.bf16.mxu1 %v4504_v11 }
0x15d8   :  { %3721 = vmatpush3.bf16.msra.mxu1 %v4504_v11 }
0x15d9   :  { %3723 = vmatprep.subr.bf16.mxu1 %v4490_v2 }
0x16a2   :  { %v3513_v25 = vpop.f32.mrb[14].mxu1 }
0x16a3   :  { %v1637_v26 = vadd.f32 %v3513_v25, %v4394_v14  ;;  %v1631_v27 = vpop.f32.mrb[15].mxu1 }
0x16a4   :  { %v1632_v28 = vadd.f32 %v4394_v14, %v1631_v27 }
0x16a5   :  { %1655 = vst.msk [vmem:[#allocation2 + $0x78] sm:$0xff] %vm177_vm1, %v1637_v26 }
0x16a6   :  { %1654 = vst.msk [vmem:[#allocation2 + $0x70] sm:$0xff] %vm177_vm1, %v1632_v28  ;;  %v3524_v30 = vpop.f32.mrb[16].mxu1 }
0x16a7   :  { %v1738_v3 = vpop.f32.mrb[17].mxu1  ;;  %v1770_v31 = vadd.f32 %v3524_v30, %v4540_v29  ;;  %v1748_v33 = vadd.f32 %v3524_v30, %v1660_v32 }
0x16a8   :  { %v1769_v7 = vadd.f32 %v4540_v29, %v1738_v3  ;;  %v1747_v14 = vadd.f32 %v1738_v3, %v1659_v34 }
0x16a9   :  { %1775 = vrot.lane.b32.xlu0 %v1770_v31, %s4010_s27  ;;  %v3184_v35 = vmul.f32 -1.442695, %v1748_v33 }
0x16aa   :  { %1773 = vrot.lane.b32.xlu1 %v1769_v7, %s4010_s27  ;;  %v3183_v12 = vmul.f32 -1.442695, %v1747_v14 }
0x16ab   :  { %3887 = vpow2.f32 %v3184_v35 }
0x16ac   :  { %3889 = vpow2.f32 %v3183_v12 }
0x16b5   :  { %v3888_v36 = vpop.eup %3887 }
0x16b6   :  { %v3890_v37 = vpop.eup %3889  ;;  %v1756_v38 = vadd.f32 1.0, %v3888_v36 }
0x16b7   :  { %v1755_v39 = vadd.f32 1.0, %v3890_v37 }
0x16b8   :  { %3891 = vrcp.f32 %v1756_v38 }
0x16b9   :  { %3893 = vrcp.f32 %v1755_v39 }
0x16c2   :  { %v3892_v40 = vpop.eup %3891 }
0x16c3   :  { %v3894_v43 = vpop.eup %3893  ;;  %v1794_v63 = vsub.f32 1.0, %v3892_v40 }
0x16c4   :  { %v1793_v56 = vsub.f32 1.0, %v3894_v43 }
0x171b   :  { %v1776_v42 = vpop.permute.xlu0 %1775 }
0x171c   :  { %v1780_v44 = vmul.f32 %v3892_v40, %v1776_v42  ;;  %v1774_v45 = vpop.permute.xlu1 %1773 }
0x171d   :  { %v1779_v46 = vmul.f32 %v3894_v43, %v1774_v45 }
0x171e   :  { %1785 = vrot.lane.b32.xlu0 %v1780_v44, %s4010_s27 }
0x171f   :  { %1783 = vrot.lane.b32.xlu1 %v1779_v46, %s4010_s27 }
0x1722   :  { %1805 = vrot.lane.b32.xlu0 %v3175_v58, %s4011_s16 }
0x1726   :  { %1807 = vrot.lane.b32.xlu0 %v3176_v24, %s4011_s16 }
0x1790   :  { %v1786_v47 = vpop.permute.xlu0 %1785 }
0x1791   :  { %v1784_v48 = vpop.permute.xlu1 %1783  ;;  %v1790_v52 = vadd.f32 %v1786_v47, %v1660_v32 }
0x1792   :  { %v1789_v49 = vadd.f32 %v1784_v48, %v1659_v34  ;;  %v1975_v48 = vld [vmem:[#allocation2 + $0x28] sm:$0xff] }
0x1794   :  { %3895 = vtanh.f32 %v1789_v49  ;;  %v1806_v55 = vpop.permute.xlu0 %1805 }
0x1795   :  { %3897 = vtanh.f32 %v1790_v52  ;;  %v1811_v59 = vmul.f32 %v3894_v43, %v1806_v55  ;;  %v1974_v52 = vld [vmem:[#allocation2 + $0x20] sm:$0xff] }
0x1798   :  { %v1808_v61 = vpop.permute.xlu0 %1807 }
0x1799   :  { %v1812_v1 = vmul.f32 %v3892_v40, %v1808_v61 }
0x179e   :  { %v3896_v53 = vpop.eup %3895 }
0x179f   :  { %1797 = vrot.lane.b32.xlu1 %v3896_v53, %s4012_s17  ;;  %v3898_v54 = vpop.eup %3897 }
0x17a3   :  { %1799 = vrot.lane.b32.xlu1 %v3898_v54, %s4012_s17 }
0x1811   :  { %v1798_v57 = vpop.permute.xlu1 %1797 }
0x1812   :  { %v1803_v60 = vmul.f32 %v1798_v57, %v1793_v56 }
0x1814   :  { %v1813_v62 = vadd.f32 %v1811_v59, %v1803_v60 }
0x1815   :  { %v1800_v0 = vpop.permute.xlu1 %1799 }
0x1816   :  { %v1804_v4 = vmul.f32 %v1800_v0, %v1794_v63  ;;  %1817 = vrot.lane.b32.xlu1 %v1813_v62, %s4012_s17 }
0x1818   :  { %v1814_v5 = vadd.f32 %v1812_v1, %v1804_v4 }
0x181a   :  { %1819 = vrot.lane.b32.xlu0 %v1814_v5, %s4012_s17 }
0x1888   :  { %v1818_v6 = vpop.permute.xlu1 %1817 }
0x1889   :  { %1823 = vst.msk [vmem:[#allocation3] sm:$0xff] %vm202_vm0, %v1818_v6  ;;  %3533 = vmatprep.mubr.msk.f32.mxu1 %vm202_vm0, %v1818_v6 }
0x188c   :  { %v1820_v8 = vpop.permute.xlu0 %1819 }
0x188d   :  { %1824 = vst.msk [vmem:[#allocation3 + $0x8] sm:$0xff] %vm202_vm0, %v1820_v8  ;;  %3534 = vmatmul.mubr.msk.f32.vlgmr.msra.gmra.mrb[18].mxu1 %vm202_vm0, %v1820_v8 }
0x188e   :  { %3725 = vmatpush3.bf16.msra.mxu1 %v4490_v2 }
0x188f   :  { %3727 = vmatprep.subr.bf16.mxu1 %v4504_v11 }
0x1892   :  { %3729 = vmatpush3.bf16.msra.mxu1 %v4504_v11 }
0x1893   :  { %3731 = vmatprep.subr.bf16.mxu1 %v4490_v2 }
0x1960   :  { %v3535_v50 = vpop.f32.mrb[18].mxu1 }
0x1961   :  { %v1925_v51 = vadd.f32 %v3535_v50, %v4540_v29  ;;  %v1901_v15 = vpop.f32.mrb[19].mxu1  ;;  %v1911_v17 = vadd.f32 %v3535_v50, %v1826_v13 }
0x1962   :  { %v1924_v16 = vadd.f32 %v1901_v15, %v4540_v29  ;;  %v1910_v19 = vadd.f32 %v1901_v15, %v1825_v18 }
0x1963   :  { %1930 = vrot.lane.b32.xlu0 %v1925_v51, %s4010_s27  ;;  %v3193_v20 = vmul.f32 -1.442695, %v1911_v17 }
0x1964   :  { %1928 = vrot.lane.b32.xlu1 %v1924_v16, %s4010_s27  ;;  %v3192_v41 = vmul.f32 -1.442695, %v1910_v19 }
0x1965   :  { %3899 = vpow2.f32 %v3193_v20 }
0x1966   :  { %3901 = vpow2.f32 %v3192_v41 }
0x196f   :  { %v3900_v21 = vpop.eup %3899 }
0x1970   :  { %v3902_v22 = vpop.eup %3901  ;;  %v1919_v9 = vadd.f32 1.0, %v3900_v21 }
0x1971   :  { %v1918_v10 = vadd.f32 1.0, %v3902_v22 }
0x1972   :  { %3903 = vrcp.f32 %v1919_v9 }
0x1973   :  { %3905 = vrcp.f32 %v1918_v10 }
0x197c   :  { %v3904_v58 = vpop.eup %3903 }
0x197d   :  { %v3906_v24 = vpop.eup %3905  ;;  %v1949_v33 = vsub.f32 1.0, %v3904_v58  ;;  %v1961_v35 = vmul.f32 %v3904_v58, %v1814_v5 }
0x197e   :  { %v1948_v14 = vsub.f32 1.0, %v3906_v24  ;;  %v1960_v37 = vmul.f32 %v3906_v24, %v1813_v62 }
0x19d5   :  { %v1931_v23 = vpop.permute.xlu0 %1930 }
0x19d6   :  { %v1935_v25 = vmul.f32 %v3904_v58, %v1931_v23  ;;  %v1929_v26 = vpop.permute.xlu1 %1928 }
0x19d7   :  { %v1934_v27 = vmul.f32 %v3906_v24, %v1929_v26 }
0x19d8   :  { %1940 = vrot.lane.b32.xlu0 %v1935_v25, %s4010_s27 }
0x19d9   :  { %1938 = vrot.lane.b32.xlu1 %v1934_v27, %s4010_s27  ;;  %v2124_v27 = vld [vmem:[#allocation2 + $0x38] sm:$0xff] }
0x1a4a   :  { %v1941_v28 = vpop.permute.xlu0 %1940 }
0x1a4b   :  { %v1945_v30 = vadd.f32 %v1941_v28, %v1826_v13  ;;  %v1939_v3 = vpop.permute.xlu1 %1938 }
0x1a4c   :  { %v1944_v31 = vadd.f32 %v1939_v3, %v1825_v18 }
0x1a4d   :  { %3907 = vtanh.f32 %v1945_v30  ;;  %v2123_v30 = vld [vmem:[#allocation2 + $0x30] sm:$0xff] }
0x1a4e   :  { %3909 = vtanh.f32 %v1944_v31 }
0x1a57   :  { %v3908_v7 = vpop.eup %3907 }
0x1a58   :  { %v3910_v32 = vpop.eup %3909  ;;  %1954 = vrot.lane.b32.xlu0 %v3908_v7, %s4012_s17 }
0x1a59   :  { %1952 = vrot.lane.b32.xlu1 %v3910_v32, %s4012_s17 }
0x1aca   :  { %v1955_v34 = vpop.permute.xlu0 %1954 }
0x1acb   :  { %v1959_v12 = vmul.f32 %v1955_v34, %v1949_v33  ;;  %v1953_v36 = vpop.permute.xlu1 %1952 }
0x1acc   :  { %v1958_v38 = vmul.f32 %v1953_v36, %v1948_v14 }
0x1acd   :  { %v1963_v39 = vadd.f32 %v1961_v35, %v1959_v12 }
0x1ace   :  { %v1962_v40 = vadd.f32 %v1960_v37, %v1958_v38 }
0x1acf   :  { %1968 = vrot.lane.b32.xlu0 %v1963_v39, %s4012_s17 }
0x1ad0   :  { %1966 = vrot.lane.b32.xlu1 %v1962_v40, %s4012_s17 }
0x1b41   :  { %v1969_v42 = vpop.permute.xlu0 %1968 }
0x1b42   :  { %1973 = vst.msk [vmem:[#allocation3 + $0x18] sm:$0xff] %vm202_vm0, %v1969_v42  ;;  %v1967_v43 = vpop.permute.xlu1 %1966 }
0x1b43   :  { %1972 = vst.msk [vmem:[#allocation3 + $0x10] sm:$0xff] %vm202_vm0, %v1967_v43  ;;  %3544 = vmatprep.mubr.msk.f32.mxu1 %vm202_vm0, %v1967_v43 }
0x1b44   :  { %3545 = vmatmul.mubr.msk.f32.vlgmr.msra.gmra.mrb[20].mxu1 %vm202_vm0, %v1969_v42 }
0x1b45   :  { %3733 = vmatpush3.bf16.msra.mxu1 %v4490_v2 }
0x1b46   :  { %3735 = vmatprep.subr.bf16.mxu1 %v4504_v11 }
0x1b49   :  { %3737 = vmatpush3.bf16.msra.mxu1 %v4504_v11 }
0x1b4a   :  { %3747 = vmatprep.subr.bf16.mxu1 %v4490_v2 }
0x1c17   :  { %v3546_v44 = vpop.f32.mrb[20].mxu1 }
0x1c18   :  { %v2074_v45 = vadd.f32 %v3546_v44, %v4540_v29  ;;  %v2050_v46 = vpop.f32.mrb[21].mxu1  ;;  %v2060_v49 = vadd.f32 %v3546_v44, %v1975_v48 }
0x1c19   :  { %v2073_v47 = vadd.f32 %v2050_v46, %v4540_v29  ;;  %v2059_v53 = vadd.f32 %v2050_v46, %v1974_v52 }
0x1c1a   :  { %2079 = vrot.lane.b32.xlu0 %v2074_v45, %s4010_s27  ;;  %v3201_v54 = vmul.f32 -1.442695, %v2060_v49 }
0x1c1b   :  { %2077 = vrot.lane.b32.xlu1 %v2073_v47, %s4010_s27  ;;  %v3200_v55 = vmul.f32 -1.442695, %v2059_v53 }
0x1c1c   :  { %3911 = vpow2.f32 %v3201_v54 }
0x1c1d   :  { %3913 = vpow2.f32 %v3200_v55 }
0x1c26   :  { %v3912_v56 = vpop.eup %3911 }
0x1c27   :  { %v3914_v57 = vpop.eup %3913  ;;  %v2068_v59 = vadd.f32 1.0, %v3912_v56 }
0x1c28   :  { %v2067_v60 = vadd.f32 1.0, %v3914_v57 }
0x1c29   :  { %3915 = vrcp.f32 %v2068_v59 }
0x1c2a   :  { %3917 = vrcp.f32 %v2067_v60 }
0x1c33   :  { %v3916_v61 = vpop.eup %3915 }
0x1c34   :  { %v3918_v63 = vpop.eup %3917  ;;  %v2098_v16 = vsub.f32 1.0, %v3916_v61  ;;  %v2110_v18 = vmul.f32 %v3916_v61, %v1963_v39 }
0x1c35   :  { %v2097_v17 = vsub.f32 1.0, %v3918_v63  ;;  %v2109_v41 = vmul.f32 %v3918_v63, %v1962_v40 }
0x1c8c   :  { %v2080_v62 = vpop.permute.xlu0 %2079 }
0x1c8d   :  { %v2084_v0 = vmul.f32 %v3916_v61, %v2080_v62  ;;  %v2078_v1 = vpop.permute.xlu1 %2077 }
0x1c8e   :  { %v2083_v4 = vmul.f32 %v3918_v63, %v2078_v1 }
0x1c8f   :  { %2089 = vrot.lane.b32.xlu0 %v2084_v0, %s4010_s27 }
0x1c90   :  { %2087 = vrot.lane.b32.xlu1 %v2083_v4, %s4010_s27  ;;  %v2273_v4 = vld [vmem:[#allocation2 + $0x48] sm:$0xff] }
0x1d01   :  { %v2090_v5 = vpop.permute.xlu0 %2089 }
0x1d02   :  { %v2094_v6 = vadd.f32 %v2090_v5, %v1975_v48  ;;  %v2088_v8 = vpop.permute.xlu1 %2087 }
0x1d03   :  { %v2093_v50 = vadd.f32 %v2088_v8, %v1974_v52 }
0x1d04   :  { %3919 = vtanh.f32 %v2094_v6  ;;  %v2272_v6 = vld [vmem:[#allocation2 + $0x40] sm:$0xff] }
0x1d05   :  { %3921 = vtanh.f32 %v2093_v50 }
0x1d0e   :  { %v3920_v51 = vpop.eup %3919 }
0x1d0f   :  { %v3922_v15 = vpop.eup %3921  ;;  %2103 = vrot.lane.b32.xlu0 %v3920_v51, %s4012_s17 }
0x1d10   :  { %2101 = vrot.lane.b32.xlu1 %v3922_v15, %s4012_s17 }
0x1d81   :  { %v2104_v13 = vpop.permute.xlu0 %2103 }
0x1d82   :  { %v2108_v19 = vmul.f32 %v2104_v13, %v2098_v16  ;;  %v2102_v20 = vpop.permute.xlu1 %2101 }
0x1d83   :  { %v2107_v21 = vmul.f32 %v2102_v20, %v2097_v17 }
0x1d84   :  { %v2112_v22 = vadd.f32 %v2110_v18, %v2108_v19 }
0x1d85   :  { %v2111_v9 = vadd.f32 %v2109_v41, %v2107_v21 }
0x1d86   :  { %2117 = vrot.lane.b32.xlu0 %v2112_v22, %s4012_s17 }
0x1d87   :  { %2115 = vrot.lane.b32.xlu1 %v2111_v9, %s4012_s17 }
0x1df8   :  { %v2118_v10 = vpop.permute.xlu0 %2117 }
0x1df9   :  { %2122 = vst.msk [vmem:[#allocation3 + $0x28] sm:$0xff] %vm202_vm0, %v2118_v10  ;;  %v2116_v58 = vpop.permute.xlu1 %2115 }
0x1dfa   :  { %2121 = vst.msk [vmem:[#allocation3 + $0x20] sm:$0xff] %vm202_vm0, %v2116_v58  ;;  %3555 = vmatprep.mubr.msk.f32.mxu1 %vm202_vm0, %v2116_v58 }
0x1dfb   :  { %3556 = vmatmul.mubr.msk.f32.vlgmr.msra.gmra.mrb[22].mxu1 %vm202_vm0, %v2118_v10 }
0x1dfc   :  { %3749 = vmatpush3.bf16.msra.mxu1 %v4490_v2 }
0x1dfd   :  { %3751 = vmatprep.subr.bf16.mxu1 %v4504_v11 }
0x1e00   :  { %3753 = vmatpush3.bf16.msra.mxu1 %v4504_v11 }
0x1ece   :  { %v3557_v23 = vpop.f32.mrb[22].mxu1 }
0x1ecf   :  { %v2223_v24 = vadd.f32 %v3557_v23, %v4540_v29  ;;  %v2199_v25 = vpop.f32.mrb[23].mxu1  ;;  %v2209_v28 = vadd.f32 %v3557_v23, %v2124_v27 }
0x1ed0   :  { %v2222_v26 = vadd.f32 %v2199_v25, %v4540_v29  ;;  %v2208_v3 = vadd.f32 %v2199_v25, %v2123_v30 }
0x1ed1   :  { %2228 = vrot.lane.b32.xlu0 %v2223_v24, %s4010_s27  ;;  %v3209_v31 = vmul.f32 -1.442695, %v2209_v28 }
0x1ed2   :  { %2226 = vrot.lane.b32.xlu1 %v2222_v26, %s4010_s27  ;;  %v3208_v7 = vmul.f32 -1.442695, %v2208_v3 }
0x1ed3   :  { %3923 = vpow2.f32 %v3209_v31 }
0x1ed4   :  { %3925 = vpow2.f32 %v3208_v7 }
0x1edd   :  { %v3924_v32 = vpop.eup %3923 }
0x1ede   :  { %v3926_v33 = vpop.eup %3925  ;;  %v2217_v34 = vadd.f32 1.0, %v3924_v32 }
0x1edf   :  { %v2216_v14 = vadd.f32 1.0, %v3926_v33 }
0x1ee0   :  { %3927 = vrcp.f32 %v2217_v34 }
0x1ee1   :  { %3929 = vrcp.f32 %v2216_v14 }
0x1eea   :  { %v3928_v35 = vpop.eup %3927 }
0x1eeb   :  { %v3930_v36 = vpop.eup %3929  ;;  %v2247_v47 = vsub.f32 1.0, %v3928_v35  ;;  %v2259_v52 = vmul.f32 %v3928_v35, %v2112_v22 }
0x1eec   :  { %v2246_v49 = vsub.f32 1.0, %v3930_v36  ;;  %v2258_v55 = vmul.f32 %v3930_v36, %v2111_v9 }
0x1f43   :  { %v2229_v12 = vpop.permute.xlu0 %2228 }
0x1f44   :  { %v2233_v37 = vmul.f32 %v3928_v35, %v2229_v12  ;;  %v2227_v38 = vpop.permute.xlu1 %2226 }
0x1f45   :  { %v2232_v39 = vmul.f32 %v3930_v36, %v2227_v38  ;;  %v2422_v38 = vld [vmem:[#allocation2 + $0x58] sm:$0xff] }
0x1f46   :  { %2238 = vrot.lane.b32.xlu0 %v2233_v37, %s4010_s27 }
0x1f47   :  { %2236 = vrot.lane.b32.xlu1 %v2232_v39, %s4010_s27 }
0x1fb8   :  { %v2239_v40 = vpop.permute.xlu0 %2238 }
0x1fb9   :  { %v2243_v42 = vadd.f32 %v2239_v40, %v2124_v27  ;;  %v2237_v43 = vpop.permute.xlu1 %2236  ;;  %v2421_v40 = vld [vmem:[#allocation2 + $0x50] sm:$0xff] }
0x1fba   :  { %v2242_v44 = vadd.f32 %v2237_v43, %v2123_v30 }
0x1fbb   :  { %3931 = vtanh.f32 %v2243_v42 }
0x1fbc   :  { %3933 = vtanh.f32 %v2242_v44 }
0x1fc5   :  { %v3932_v45 = vpop.eup %3931 }
0x1fc6   :  { %v3934_v46 = vpop.eup %3933  ;;  %2252 = vrot.lane.b32.xlu0 %v3932_v45, %s4012_s17 }
0x1fc7   :  { %2250 = vrot.lane.b32.xlu1 %v3934_v46, %s4012_s17 }
0x2038   :  { %v2253_v48 = vpop.permute.xlu0 %2252 }
0x2039   :  { %v2257_v53 = vmul.f32 %v2253_v48, %v2247_v47  ;;  %v2251_v54 = vpop.permute.xlu1 %2250 }
0x203a   :  { %v2256_v56 = vmul.f32 %v2251_v54, %v2246_v49 }
0x203b   :  { %v2261_v57 = vadd.f32 %v2259_v52, %v2257_v53 }
0x203c   :  { %v2260_v59 = vadd.f32 %v2258_v55, %v2256_v56 }
0x203d   :  { %2266 = vrot.lane.b32.xlu0 %v2261_v57, %s4012_s17 }
0x203e   :  { %2264 = vrot.lane.b32.xlu1 %v2260_v59, %s4012_s17 }
0x20af   :  { %v2267_v60 = vpop.permute.xlu0 %2266 }
0x20b0   :  { %2271 = vst.msk [vmem:[#allocation3 + $0x38] sm:$0xff] %vm202_vm0, %v2267_v60  ;;  %v2265_v61 = vpop.permute.xlu1 %2264 }
0x20b1   :  { %2270 = vst.msk [vmem:[#allocation3 + $0x30] sm:$0xff] %vm202_vm0, %v2265_v61  ;;  %3566 = vmatprep.mubr.msk.f32.mxu0 %vm202_vm0, %v2265_v61 }
0x20b2   :  { %3567 = vmatmul.mubr.msk.f32.vlgmr.msra.gmra.mrb[16].mxu0 %vm202_vm0, %v2267_v60 }
0x20b3   :  { %3757 = vmatpush3.bf16.msra.mxu0 %v4490_v2 }
0x20b4   :  { %3759 = vmatprep.subr.bf16.mxu0 %v4504_v11 }
0x20b7   :  { %3761 = vmatpush3.bf16.msra.mxu0 %v4504_v11 }
0x2185   :  { %v3568_v62 = vpop.f32.mrb[16].mxu0 }
0x2186   :  { %v2372_v63 = vadd.f32 %v3568_v62, %v4540_v29  ;;  %v2348_v0 = vpop.f32.mrb[17].mxu0  ;;  %v2358_v5 = vadd.f32 %v3568_v62, %v2273_v4 }
0x2187   :  { %v2371_v1 = vadd.f32 %v2348_v0, %v4540_v29  ;;  %v2357_v8 = vadd.f32 %v2348_v0, %v2272_v6  ;;  %v2887_v0 = vld [vmem:[%s4824_s7] sm:$0xff] }
0x2188   :  { %2377 = vrot.lane.b32.xlu0 %v2372_v63, %s4010_s27  ;;  %v3217_v50 = vmul.f32 -1.442695, %v2358_v5 }
0x2189   :  { %2375 = vrot.lane.b32.xlu1 %v2371_v1, %s4010_s27  ;;  %v3216_v2 = vmul.f32 -1.442695, %v2357_v8  ;;  %v2888_v1 = vld [vmem:[%s4824_s7 + $0x8] sm:$0xff] }
0x218a   :  { %3935 = vpow2.f32 %v3217_v50 }
0x218b   :  { %3937 = vpow2.f32 %v3216_v2 }
0x2194   :  { %v3936_v51 = vpop.eup %3935 }
0x2195   :  { %v3938_v15 = vpop.eup %3937  ;;  %v2366_v16 = vadd.f32 1.0, %v3936_v51 }
0x2196   :  { %v2365_v13 = vadd.f32 1.0, %v3938_v15 }
0x2197   :  { %3939 = vrcp.f32 %v2366_v16 }
0x2198   :  { %3941 = vrcp.f32 %v2365_v13 }
0x21a1   :  { %v3940_v17 = vpop.eup %3939 }
0x21a2   :  { %v3942_v19 = vpop.eup %3941  ;;  %v2396_v25 = vsub.f32 1.0, %v3940_v17  ;;  %v2408_v28 = vmul.f32 %v3940_v17, %v2261_v57 }
0x21a3   :  { %v2395_v27 = vsub.f32 1.0, %v3942_v19  ;;  %v2407_v31 = vmul.f32 %v3942_v19, %v2260_v59 }
0x21fa   :  { %v2378_v18 = vpop.permute.xlu0 %2377 }
0x21fb   :  { %v2382_v20 = vmul.f32 %v3940_v17, %v2378_v18  ;;  %v2376_v41 = vpop.permute.xlu1 %2375  ;;  %v2889_v18 = vld [vmem:[%s4824_s7 + $0x10] sm:$0xff] }
0x21fc   :  { %v2381_v21 = vmul.f32 %v3942_v19, %v2376_v41  ;;  %v2890_v19 = vld [vmem:[%s4824_s7 + $0x18] sm:$0xff] }
0x21fd   :  { %2387 = vrot.lane.b32.xlu0 %v2382_v20, %s4010_s27 }
0x21fe   :  { %2385 = vrot.lane.b32.xlu1 %v2381_v21, %s4010_s27  ;;  %v3774_v21 = vpack.c.bf16 %v2890_v19, %v2889_v18 }
0x226f   :  { %v2388_v22 = vpop.permute.xlu0 %2387 }
0x2270   :  { %v2392_v9 = vadd.f32 %v2388_v22, %v2273_v4  ;;  %v2386_v10 = vpop.permute.xlu1 %2385  ;;  %v3770_v4 = vpack.c.bf16 %v2888_v1, %v2887_v0  ;;  %v2871_v22 = vld [vmem:[#allocation3] sm:$0xff] }
0x2271   :  { %v2391_v58 = vadd.f32 %v2386_v10, %v2272_v6  ;;  %v2873_v10 = vld [vmem:[#allocation3 + $0x10] sm:$0xff] }
0x2272   :  { %3943 = vtanh.f32 %v2392_v9  ;;  %3771 = vmatprep.subr.bf16.mxu0 %v3770_v4  ;;  %v2872_v9 = vld [vmem:[#allocation3 + $0x8] sm:$0xff] }
0x2273   :  { %3945 = vtanh.f32 %v2391_v58  ;;  %v2874_v58 = vld [vmem:[#allocation3 + $0x18] sm:$0xff] }
0x227c   :  { %v3944_v23 = vpop.eup %3943 }
0x227d   :  { %v3946_v24 = vpop.eup %3945  ;;  %2401 = vrot.lane.b32.xlu0 %v3944_v23, %s4012_s17  ;;  %v2875_v23 = vld [vmem:[#allocation3 + $0x20] sm:$0xff] }
0x227e   :  { %2399 = vrot.lane.b32.xlu1 %v3946_v24, %s4012_s17  ;;  %v2876_v24 = vld [vmem:[#allocation3 + $0x28] sm:$0xff] }
0x22ef   :  { %v2402_v26 = vpop.permute.xlu0 %2401 }
0x22f0   :  { %v2406_v30 = vmul.f32 %v2402_v26, %v2396_v25  ;;  %v2400_v3 = vpop.permute.xlu1 %2399  ;;  %v2877_v25 = vld [vmem:[#allocation3 + $0x30] sm:$0xff]  ;;  %v2878_v26 = vld [vmem:[#allocation3 + $0x38] sm:$0xff] }
0x22f1   :  { %v2405_v7 = vmul.f32 %v2400_v3, %v2395_v27 }
0x22f2   :  { %v2410_v32 = vadd.f32 %v2408_v28, %v2406_v30 }
0x22f3   :  { %v2409_v33 = vadd.f32 %v2407_v31, %v2405_v7 }
0x22f4   :  { %2415 = vrot.lane.b32.xlu0 %v2410_v32, %s4012_s17 }
0x22f5   :  { %2413 = vrot.lane.b32.xlu1 %v2409_v33, %s4012_s17 }
0x2366   :  { %v2416_v34 = vpop.permute.xlu0 %2415 }
0x2367   :  { %2420 = vst.msk [vmem:[#allocation3 + $0x48] sm:$0xff] %vm202_vm0, %v2416_v34  ;;  %v2414_v14 = vpop.permute.xlu1 %2413 }
0x2368   :  { %2419 = vst.msk [vmem:[#allocation3 + $0x40] sm:$0xff] %vm202_vm0, %v2414_v14  ;;  %3577 = vmatprep.mubr.msk.f32.mxu1 %vm202_vm0, %v2414_v14 }
0x2369   :  { %3578 = vmatmul.mubr.msk.f32.vlgmr.msra.gmra.mrb[24].mxu1 %vm202_vm0, %v2416_v34  ;;  %v4681_v34 = vstv %s4825_s8 }
0x236e   :  { %v2880_v28 = vld [vmem:[#allocation3 + $0x48] sm:$0xff] }
0x236f   :  { %v2879_v27 = vld [vmem:[#allocation3 + $0x40] sm:$0xff] }
0x243c   :  { %v3579_v35 = vpop.f32.mrb[24].mxu1 }
0x243d   :  { %v2521_v12 = vadd.f32 %v3579_v35, %v4540_v29  ;;  %v2497_v36 = vpop.f32.mrb[25].mxu1  ;;  %v2507_v39 = vadd.f32 %v3579_v35, %v2422_v38 }
0x243e   :  { %v2520_v37 = vadd.f32 %v2497_v36, %v4540_v29  ;;  %v2506_v42 = vadd.f32 %v2497_v36, %v2421_v40 }
0x243f   :  { %2526 = vrot.lane.b32.xlu0 %v2521_v12, %s4010_s27  ;;  %v3225_v43 = vmul.f32 -1.442695, %v2507_v39 }
0x2440   :  { %2524 = vrot.lane.b32.xlu1 %v2520_v37, %s4010_s27  ;;  %v3224_v44 = vmul.f32 -1.442695, %v2506_v42 }
0x2441   :  { %3947 = vpow2.f32 %v3225_v43 }
0x2442   :  { %3949 = vpow2.f32 %v3224_v44 }
0x244b   :  { %v3948_v45 = vpop.eup %3947 }
0x244c   :  { %v3950_v46 = vpop.eup %3949  ;;  %v2515_v47 = vadd.f32 1.0, %v3948_v45 }
0x244d   :  { %v2514_v48 = vadd.f32 1.0, %v3950_v46 }
0x244e   :  { %3951 = vrcp.f32 %v2515_v47 }
0x244f   :  { %3953 = vrcp.f32 %v2514_v48 }
0x2458   :  { %v3952_v49 = vpop.eup %3951 }
0x2459   :  { %v3954_v53 = vpop.eup %3953  ;;  %v2545_v5 = vsub.f32 1.0, %v3952_v49  ;;  %v2557_v50 = vmul.f32 %v3952_v49, %v2410_v32 }
0x245a   :  { %v2544_v8 = vsub.f32 1.0, %v3954_v53  ;;  %v2556_v15 = vmul.f32 %v3954_v53, %v2409_v33 }
0x24b1   :  { %v2527_v52 = vpop.permute.xlu0 %2526 }
0x24b2   :  { %v2531_v54 = vmul.f32 %v3952_v49, %v2527_v52  ;;  %v2525_v55 = vpop.permute.xlu1 %2524 }
0x24b3   :  { %v2530_v56 = vmul.f32 %v3954_v53, %v2525_v55 }
0x24b4   :  { %2536 = vrot.lane.b32.xlu0 %v2531_v54, %s4010_s27 }
0x24b5   :  { %2534 = vrot.lane.b32.xlu1 %v2530_v56, %s4010_s27 }
0x2526   :  { %v2537_v57 = vpop.permute.xlu0 %2536 }
0x2527   :  { %v2541_v59 = vadd.f32 %v2537_v57, %v2422_v38  ;;  %v2535_v60 = vpop.permute.xlu1 %2534 }
0x2528   :  { %v2540_v61 = vadd.f32 %v2535_v60, %v2421_v40 }
0x2529   :  { %3955 = vtanh.f32 %v2541_v59 }
0x252a   :  { %3957 = vtanh.f32 %v2540_v61  ;;  %v2571_v61 = vld [vmem:[#allocation2 + $0x68] sm:$0xff] }
0x2533   :  { %v3956_v62 = vpop.eup %3955 }
0x2534   :  { %v3958_v63 = vpop.eup %3957  ;;  %2550 = vrot.lane.b32.xlu0 %v3956_v62, %s4012_s17 }
0x2535   :  { %2548 = vrot.lane.b32.xlu1 %v3958_v63, %s4012_s17  ;;  %v2570_v63 = vld [vmem:[#allocation2 + $0x60] sm:$0xff] }
0x25a6   :  { %v2551_v6 = vpop.permute.xlu0 %2550 }
0x25a7   :  { %v2555_v2 = vmul.f32 %v2551_v6, %v2545_v5  ;;  %v2549_v51 = vpop.permute.xlu1 %2548 }
0x25a8   :  { %v2554_v16 = vmul.f32 %v2549_v51, %v2544_v8 }
0x25a9   :  { %v4644_v13 = vadd.f32 %v2557_v50, %v2555_v2 }
0x25aa   :  { %v4646_v17 = vadd.f32 %v2556_v15, %v2554_v16 }
0x25ab   :  { %2564 = vrot.lane.b32.xlu0 %v4644_v13, %s4012_s17 }
0x25ac   :  { %2562 = vrot.lane.b32.xlu1 %v4646_v17, %s4012_s17 }
0x261d   :  { %v2565_v20 = vpop.permute.xlu0 %2564 }
0x261e   :  { %2569 = vst.msk [vmem:[#allocation3 + $0x58] sm:$0xff] %vm202_vm0, %v2565_v20  ;;  %v2563_v41 = vpop.permute.xlu1 %2562 }
0x261f   :  { %2568 = vst.msk [vmem:[#allocation3 + $0x50] sm:$0xff] %vm202_vm0, %v2563_v41  ;;  %3588 = vmatprep.mubr.msk.f32.mxu0 %vm202_vm0, %v2563_v41 }
0x2620   :  { %3589 = vmatmul.mubr.msk.f32.vlgmr.msra.gmra.mrb[18].mxu0 %vm202_vm0, %v2565_v20 }
0x2621   :  { %3773 = vmatpush3.bf16.msra.mxu0 %v3770_v4  ;;  %3610 = vmatprep.mubr.msk.f32.mxu0 %vm202_vm0, %v2871_v22 }
0x2622   :  { %3775 = vmatprep.subr.bf16.mxu0 %v3774_v21 }
0x2625   :  { %3777 = vmatpush3.bf16.msra.mxu0 %v3774_v21  ;;  %v2882_v3 = vld [vmem:[#allocation3 + $0x58] sm:$0xff] }
0x2626   :  { %v2881_v30 = vld [vmem:[#allocation3 + $0x50] sm:$0xff] }
0x2628   :  { %3611 = vmatmul.mubr.msk.f32.vlgmr.msra.gmra.mrb[20].mxu0 %vm202_vm0, %v2872_v9  ;;  %v3234_v9 = vld [vmem:[%s4821_s4 + $0x20] sm:$0xff] }
0x2629   :  { %3613 = vmatprep.mubr.msk.f32.mxu0 %vm202_vm0, %v2873_v10  ;;  %v3235_v10 = vld [vmem:[%s4821_s4 + $0x28] sm:$0xff] }
0x262c   :  { %3614 = vmatmul.mubr.msk.f32.gmra.mrb[22].mxu0 %vm202_vm0, %v2874_v58  ;;  %v3762_v58 = vpack.c.bf16 %v3235_v10, %v3234_v9 }
0x262d   :  { %3616 = vmatprep.mubr.msk.f32.mxu0 %vm202_vm0, %v2875_v23 }
0x262e   :  { %3763 = vmatprep.subr.bf16.mxu1 %v3762_v58 }
0x262f   :  { %3765 = vmatpush3.bf16.msra.mxu1 %v3762_v58 }
0x2630   :  { %3617 = vmatmul.mubr.msk.f32.gmra.mrb[24].mxu0 %vm202_vm0, %v2876_v24  ;;  %3767 = vmatprep.subr.bf16.mxu1 %v4504_v11 }
0x2631   :  { %3619 = vmatprep.mubr.msk.f32.mxu0 %vm202_vm0, %v2877_v25 }
0x2633   :  { %3769 = vmatpush3.bf16.msra.mxu1 %v4504_v11 }
0x2634   :  { %3620 = vmatmul.mubr.msk.f32.gmra.mrb[26].mxu0 %vm202_vm0, %v2878_v26 }
0x2635   :  { %3622 = vmatprep.mubr.msk.f32.mxu0 %vm202_vm0, %v2879_v27 }
0x2638   :  { %3623 = vmatmul.mubr.msk.f32.gmra.mrb[28].mxu0 %vm202_vm0, %v2880_v28 }
0x2639   :  { %3625 = vmatprep.mubr.msk.f32.mxu0 %vm202_vm0, %v2881_v30 }
0x263c   :  { %3626 = vmatmul.mubr.msk.f32.gmra.mrb[30].mxu0 %vm202_vm0, %v2882_v3 }
0x26f3   :  { %v3590_v31 = vpop.f32.mrb[18].mxu0 }
0x26f4   :  { %v2670_v7 = vadd.f32 %v3590_v31, %v4540_v29  ;;  %v2646_v32 = vpop.f32.mrb[19].mxu0  ;;  %v2656_v62 = vadd.f32 %v3590_v31, %v2571_v61 }
0x26f5   :  { %v2669_v33 = vadd.f32 %v2646_v32, %v4540_v29  ;;  %v2655_v0 = vadd.f32 %v2646_v32, %v2570_v63 }
0x26f6   :  { %2675 = vrot.lane.b32.xlu0 %v2670_v7, %s4010_s27  ;;  %v3233_v1 = vmul.f32 -1.442695, %v2656_v62 }
0x26f7   :  { %2673 = vrot.lane.b32.xlu1 %v2669_v33, %s4010_s27  ;;  %v3232_v4 = vmul.f32 -1.442695, %v2655_v0 }
0x26f8   :  { %3959 = vpow2.f32 %v3233_v1 }
0x26f9   :  { %3961 = vpow2.f32 %v3232_v4 }
0x26fb   :  { %v3612_v14 = vpop.f32.mrb[20].mxu0 }
0x26fc   :  { %v3013_v35 = vadd.f32 %v3612_v14, %v4681_v34  ;;  %v3007_v12 = vpop.f32.mrb[21].mxu0 }
0x26fd   :  { %v3008_v36 = vadd.f32 %v3007_v12, %v4681_v34 }
0x26fe   :  { %3088 = vst.msk [vmem:[%s4826_s9 + $0x8] sm:$0xff] %vm3086_vm2, %v3013_v35 }
0x26ff   :  { %3087 = vst.msk [vmem:[%s4826_s9] sm:$0xff] %vm3086_vm2, %v3008_v36  ;;  %v3615_v37 = vpop.f32.mrb[22].mxu0 }
0x2700   :  { %v3023_v38 = vadd.f32 %v3615_v37, %v4681_v34  ;;  %v3017_v39 = vpop.f32.mrb[23].mxu0 }
0x2701   :  { %v3018_v40 = vadd.f32 %v3017_v39, %v4681_v34 }
0x2702   :  { %3090 = vst.msk [vmem:[%s4826_s9 + $0x18] sm:$0xff] %vm3086_vm2, %v3023_v38  ;;  %v3960_v5 = vpop.eup %3959 }
0x2703   :  { %3089 = vst.msk [vmem:[%s4826_s9 + $0x10] sm:$0xff] %vm3086_vm2, %v3018_v40  ;;  %v3618_v42 = vpop.f32.mrb[24].mxu0  ;;  %v3962_v6 = vpop.eup %3961  ;;  %v2664_v8 = vadd.f32 1.0, %v3960_v5 }
0x2704   :  { %v3033_v43 = vadd.f32 %v3618_v42, %v4681_v34  ;;  %v3027_v44 = vpop.f32.mrb[25].mxu0  ;;  %v2663_v50 = vadd.f32 1.0, %v3962_v6 }
0x2705   :  { %v3028_v45 = vadd.f32 %v3027_v44, %v4681_v34  ;;  %3963 = vrcp.f32 %v2664_v8  ;;  %v2719_v44 = vld [vmem:[#allocation2 + $0x70] sm:$0xff] }
0x2706   :  { %3092 = vst.msk [vmem:[%s4826_s9 + $0x28] sm:$0xff] %vm3086_vm2, %v3033_v43  ;;  %3965 = vrcp.f32 %v2663_v50 }
0x2707   :  { %3091 = vst.msk [vmem:[%s4826_s9 + $0x20] sm:$0xff] %vm3086_vm2, %v3028_v45  ;;  %v3621_v46 = vpop.f32.mrb[26].mxu0 }
0x2708   :  { %v3043_v47 = vadd.f32 %v3621_v46, %v4681_v34  ;;  %v3037_v48 = vpop.f32.mrb[27].mxu0 }
0x2709   :  { %v3038_v49 = vadd.f32 %v3037_v48, %v4681_v34 }
0x270a   :  { %3094 = vst.msk [vmem:[%s4826_s9 + $0x38] sm:$0xff] %vm3086_vm2, %v3043_v47 }
0x270b   :  { %3093 = vst.msk [vmem:[%s4826_s9 + $0x30] sm:$0xff] %vm3086_vm2, %v3038_v49  ;;  %v3624_v52 = vpop.f32.mrb[28].mxu0 }
0x270c   :  { %v3053_v53 = vadd.f32 %v3624_v52, %v4681_v34  ;;  %v3047_v54 = vpop.f32.mrb[29].mxu0 }
0x270d   :  { %v3048_v55 = vadd.f32 %v3047_v54, %v4681_v34 }
0x270e   :  { %3096 = vst.msk [vmem:[%s4826_s9 + $0x48] sm:$0xff] %vm3086_vm2, %v3053_v53 }
0x270f   :  { %3095 = vst.msk [vmem:[%s4826_s9 + $0x40] sm:$0xff] %vm3086_vm2, %v3048_v55  ;;  %v3627_v56 = vpop.f32.mrb[30].mxu0  ;;  %v3964_v2 = vpop.eup %3963 }
0x2710   :  { %v3063_v57 = vadd.f32 %v3627_v56, %v4681_v34  ;;  %v3057_v59 = vpop.f32.mrb[31].mxu0  ;;  %v3966_v15 = vpop.eup %3965  ;;  %v2694_v25 = vsub.f32 1.0, %v3964_v2  ;;  %v2706_v28 = vmul.f32 %v3964_v2, %v4644_v13 }
0x2711   :  { %v3058_v60 = vadd.f32 %v3057_v59, %v4681_v34  ;;  %v2693_v27 = vsub.f32 1.0, %v3966_v15  ;;  %v2705_v31 = vmul.f32 %v3966_v15, %v4646_v17 }
0x2712   :  { %3098 = vst.msk [vmem:[%s4826_s9 + $0x58] sm:$0xff] %vm3086_vm2, %v3063_v57 }
0x2713   :  { %3097 = vst.msk [vmem:[%s4826_s9 + $0x50] sm:$0xff] %vm3086_vm2, %v3058_v60 }
0x2768   :  { %v2676_v51 = vpop.permute.xlu0 %2675 }
0x2769   :  { %v2680_v16 = vmul.f32 %v3964_v2, %v2676_v51  ;;  %v2674_v18 = vpop.permute.xlu1 %2673 }
0x276a   :  { %v2679_v19 = vmul.f32 %v3966_v15, %v2674_v18 }
0x276b   :  { %2685 = vrot.lane.b32.xlu0 %v2680_v16, %s4010_s27 }
0x276c   :  { %2683 = vrot.lane.b32.xlu1 %v2679_v19, %s4010_s27 }
0x27dd   :  { %v2686_v20 = vpop.permute.xlu0 %2685 }
0x27de   :  { %v2690_v41 = vadd.f32 %v2686_v20, %v2571_v61  ;;  %v2684_v21 = vpop.permute.xlu1 %2683 }
0x27df   :  { %v2689_v22 = vadd.f32 %v2684_v21, %v2570_v63 }
0x27e0   :  { %3967 = vtanh.f32 %v2690_v41 }
0x27e1   :  { %3969 = vtanh.f32 %v2689_v22 }
0x27ea   :  { %v3968_v23 = vpop.eup %3967 }
0x27eb   :  { %v3970_v24 = vpop.eup %3969  ;;  %2699 = vrot.lane.b32.xlu0 %v3968_v23, %s4012_s17 }
0x27ec   :  { %2697 = vrot.lane.b32.xlu1 %v3970_v24, %s4012_s17 }
0x285d   :  { %v2700_v26 = vpop.permute.xlu0 %2699 }
0x285e   :  { %v2704_v30 = vmul.f32 %v2700_v26, %v2694_v25  ;;  %v2698_v3 = vpop.permute.xlu1 %2697 }
0x285f   :  { %v2703_v7 = vmul.f32 %v2698_v3, %v2693_v27 }
0x2860   :  { %v2708_v32 = vadd.f32 %v2706_v28, %v2704_v30 }
0x2861   :  { %v4757_v33 = vadd.f32 %v2705_v31, %v2703_v7 }
0x2862   :  { %2713 = vrot.lane.b32.xlu0 %v2708_v32, %s4012_s17 }
0x2863   :  { %2711 = vrot.lane.b32.xlu1 %v4757_v33, %s4012_s17 }
0x28d4   :  { %v2714_v11 = vpop.permute.xlu0 %2713 }
0x28d5   :  { %2718 = vst.msk [vmem:[#allocation3 + $0x68] sm:$0xff] %vm202_vm0, %v2714_v11  ;;  %v2712_v14 = vpop.permute.xlu1 %2711 }
0x28d6   :  { %2717 = vst.msk [vmem:[#allocation3 + $0x60] sm:$0xff] %vm202_vm0, %v2712_v14  ;;  %3599 = vmatprep.mubr.msk.f32.mxu1 %vm202_vm0, %v2712_v14 }
0x28d7   :  { %3600 = vmatmul.mubr.msk.f32.vlgmr.msra.gmra.mrb[26].mxu1 %vm202_vm0, %v2714_v11 }
0x28dc   :  { %v2884_v17 = vld [vmem:[#allocation3 + $0x68] sm:$0xff] }
0x28dd   :  { %v2883_v13 = vld [vmem:[#allocation3 + $0x60] sm:$0xff] }
0x28de   :  { %3628 = vmatprep.mubr.msk.f32.mxu0 %vm202_vm0, %v2883_v13 }
0x28df   :  { %3629 = vmatmul.mubr.msk.f32.gmra.mrb[32].mxu0 %vm202_vm0, %v2884_v17 }
0x29aa   :  { %v3601_v35 = vpop.f32.mrb[26].mxu1 }
0x29ab   :  { %v2819_v12 = vadd.f32 %v3601_v35, %v4540_v29  ;;  %v2795_v36 = vpop.f32.mrb[27].mxu1 }
0x29ac   :  { %v2818_v37 = vadd.f32 %v2795_v36, %v4540_v29  ;;  %v2720_v29 = vld [vmem:[#allocation2 + $0x78] sm:$0xff]  ;;  %v2804_v45 = vadd.f32 %v2795_v36, %v2719_v44 }
0x29ad   :  { %2824 = vrot.lane.b32.xlu0 %v2819_v12, %s4010_s27  ;;  %v2805_v43 = vadd.f32 %v3601_v35, %v2720_v29 }
0x29ae   :  { %2822 = vrot.lane.b32.xlu1 %v2818_v37, %s4010_s27  ;;  %v3240_v47 = vmul.f32 -1.442695, %v2804_v45 }
0x29af   :  { %v3241_v46 = vmul.f32 -1.442695, %v2805_v43 }
0x29b1   :  { %3971 = vpow2.f32 %v3241_v46 }
0x29b2   :  { %v3630_v38 = vpop.f32.mrb[32].mxu0  ;;  %3973 = vpow2.f32 %v3240_v47 }
0x29b3   :  { %v3073_v39 = vadd.f32 %v3630_v38, %v4681_v34  ;;  %v3067_v40 = vpop.f32.mrb[33].mxu0 }
0x29b4   :  { %v3068_v42 = vadd.f32 %v3067_v40, %v4681_v34 }
0x29b5   :  { %3100 = vst.msk [vmem:[%s4826_s9 + $0x68] sm:$0xff] %vm3086_vm2, %v3073_v39 }
0x29b6   :  { %3099 = vst.msk [vmem:[%s4826_s9 + $0x60] sm:$0xff] %vm3086_vm2, %v3068_v42 }
0x29bb   :  { %v3972_v48 = vpop.eup %3971 }
0x29bc   :  { %v3974_v49 = vpop.eup %3973  ;;  %v2813_v52 = vadd.f32 1.0, %v3972_v48 }
0x29bd   :  { %v2812_v53 = vadd.f32 1.0, %v3974_v49 }
0x29be   :  { %3975 = vrcp.f32 %v2813_v52 }
0x29bf   :  { %3977 = vrcp.f32 %v2812_v53 }
0x29c8   :  { %v3976_v54 = vpop.eup %3975 }
0x29c9   :  { %v3978_v56 = vpop.eup %3977  ;;  %v2843_v5 = vsub.f32 1.0, %v3976_v54  ;;  %v2855_v50 = vmul.f32 %v3976_v54, %v2708_v32 }
0x29ca   :  { %v2842_v8 = vsub.f32 1.0, %v3978_v56  ;;  %v2854_v15 = vmul.f32 %v3978_v56, %v4757_v33 }
0x2a1f   :  { %v2825_v55 = vpop.permute.xlu0 %2824 }
0x2a20   :  { %v2829_v57 = vmul.f32 %v3976_v54, %v2825_v55  ;;  %v2823_v59 = vpop.permute.xlu1 %2822 }
0x2a21   :  { %v2828_v60 = vmul.f32 %v3978_v56, %v2823_v59 }
0x2a22   :  { %2834 = vrot.lane.b32.xlu0 %v2829_v57, %s4010_s27 }
0x2a23   :  { %2832 = vrot.lane.b32.xlu1 %v2828_v60, %s4010_s27  ;;  %s4013_s27 = smov [#allocation5]  }
0x2a24   :  { %s3110_s3 = sshll.u32 %s4013_s27, 4  ;;  %s3111_s3 = int_to_ptr.vmem [resolvable:$true] %s3110_s3 }
0x2a25   :  { %p3990_p1 = scmp.lt.s32.totalorder %s3111_s3, %s3111_s3 }
0x2a94   :  { %v2835_v61 = vpop.permute.xlu0 %2834 }
0x2a95   :  { %v2839_v62 = vadd.f32 %v2835_v61, %v2720_v29  ;;  %v2833_v63 = vpop.permute.xlu1 %2832 }
0x2a96   :  { %v2838_v0 = vadd.f32 %v2833_v63, %v2719_v44 }
0x2a97   :  { %3979 = vtanh.f32 %v2839_v62 }
0x2a98   :  { %3981 = vtanh.f32 %v2838_v0 }
0x2aa1   :  { %v3980_v1 = vpop.eup %3979 }
0x2aa2   :  { %v3982_v4 = vpop.eup %3981  ;;  %2848 = vrot.lane.b32.xlu0 %v3980_v1, %s4012_s17 }
0x2aa3   :  { %2846 = vrot.lane.b32.xlu1 %v3982_v4, %s4012_s17 }
0x2b14   :  { %v2849_v6 = vpop.permute.xlu0 %2848 }
0x2b15   :  { %v2853_v2 = vmul.f32 %v2849_v6, %v2843_v5  ;;  %v2847_v51 = vpop.permute.xlu1 %2846 }
0x2b16   :  { %v2852_v16 = vmul.f32 %v2847_v51, %v2842_v8 }
0x2b17   :  { %v2857_v18 = vadd.f32 %v2855_v50, %v2853_v2 }
0x2b18   :  { %v2856_v19 = vadd.f32 %v2854_v15, %v2852_v16 }
0x2b19   :  { %2862 = vrot.lane.b32.xlu0 %v2857_v18, %s4012_s17 }
0x2b1a   :  { %2860 = vrot.lane.b32.xlu1 %v2856_v19, %s4012_s17  ;;  %s3985_s17 = scalar_lea.vmem %s3111_s3, 512 }
0x2b1b   :  { %p3986_p0 = scmp.ne.s32.totalorder %s3111_s3, %s3985_s17  ;;  %p3991_p2 = scmp.lt.s32.totalorder %s3985_s17, %s3985_s17 }
0x2b1d   :  { %p3992_p3 = por %p3991_p2, %p3990_p1 }
0x2b1f   :  { %p3993_p4 = pnand %p3992_p3, %p3986_p0 }
0x2b8b   :  { %v2863_v20 = vpop.permute.xlu0 %2862 }
0x2b8c   :  { %2867 = vst.msk [vmem:[#allocation3 + $0x78] sm:$0xff] %vm202_vm0, %v2863_v20  ;;  %2870 = vst.msk [vmem:[#allocation5 + $0x18] sm:$0xff] %vm202_vm0, %v2863_v20  ;;  %v2861_v41 = vpop.permute.xlu1 %2860 }
0x2b8d   :  { %2866 = vst.msk [vmem:[#allocation3 + $0x70] sm:$0xff] %vm202_vm0, %v2861_v41  ;;  %2869 = vst.msk [vmem:[#allocation5 + $0x10] sm:$0xff] %vm202_vm0, %v2861_v41 }
0x2b93   :  { %v2886_v22 = vld [vmem:[#allocation3 + $0x78] sm:$0xff] }
0x2b94   :  { %v2885_v21 = vld [vmem:[#allocation3 + $0x70] sm:$0xff] }
0x2b95   :  { %3631 = vmatprep.mubr.msk.f32.mxu0 %vm202_vm0, %v2885_v21 }
0x2b96   :  { %3632 = vmatmul.mubr.msk.f32.gmra.mrb[34].mxu0 %vm202_vm0, %v2886_v22 }
0x2b97   :  { %3996 = shalt.err (!%p3993_p4)
}
0x2b98   :  { %s3997_s18 = scalar_lea.hbm %s4827_s10, 512 }
0x2b99   :  { %p3998_p5 = scmp.ne.s32.totalorder %s4827_s10, %s3997_s18  ;;  %p4001_p6 = scmp.lt.u32.totalorder %s3997_s18, %s4827_s10 }
0x2b9b   :  { %p4003_p7 = pnand %p4001_p6, %p3998_p5 }
0x2b9d   :  { %4006 = shalt.err (!%p4003_p7)
}
0x2b9e   :  { %s4014_s23 = smov 128   ;;  %s4015_s6 = smov 8  }
0x2b9f   :  { %3116 = dma.vmem_to_hbm [thread:$0]  %s3111_s3, 512, %s4827_s10, [#allocation6], %s4014_s23, %s4014_s23, %s4015_s6  }
0x2c69   :  { %v3633_v9 = vpop.f32.mrb[34].mxu0 }
0x2c6a   :  { %v3083_v10 = vadd.f32 %v3633_v9, %v4681_v34  ;;  %v3077_v58 = vpop.f32.mrb[35].mxu0 }
0x2c6b   :  { %v3078_v23 = vadd.f32 %v3077_v58, %v4681_v34 }
0x2c6c   :  { %3102 = vst.msk [vmem:[%s4826_s9 + $0x78] sm:$0xff] %vm3086_vm2, %v3083_v10 }
0x2c6d   :  { %3101 = vst.msk [vmem:[%s4826_s9 + $0x70] sm:$0xff] %vm3086_vm2, %v3078_v23 }
0x2c6e   :  { %4007 = dma.done.wait [#allocation6], 512  }
0x2c6f   :  { %4008 = vsyncadd [#allocation6], 4294966784 }
0x2c70   :  { %3122 = vsyncpa [#allocation6], 1 }

</bundles_post_ra>
